<compile_context>
chip_gen: v7x
topology: tpu7x:2x2x1
jax: 0.10.0
libtpu: 0.0.40
codegen_flags: <defaults>
</compile_context>

<pallas_src>
import functools
from typing import NamedTuple

import jax
import jax.numpy as jnp
from jax.experimental import pallas as pl
from jax.experimental.pallas import tpu as pltpu

EPS = 1e-5          # nn.BatchNorm2d default eps
NEG_SLOPE = 0.2     # LeakyReLU(0.2)
LANE = 128
SUBLANE = 8


class TileCfg(NamedTuple):
    max_tile_rows: int = 1024       # row tile cap (multiple of 8)
    max_tile_k: int = 1024          # contraction tile cap (multiple of 128)
    max_resident_rows: int = 1024   # BN single-pass (exact-stats) path row limit


def _rup(x, m):
    return (x + m - 1) // m * m


def _pad2d(a, rows, cols, value=0.0):
    return jnp.pad(a, ((0, rows - a.shape[0]), (0, cols - a.shape[1])),
                   constant_values=value)


@functools.lru_cache(maxsize=None)
def _vmem_limit():
    """~half of physical VMEM: 64 MiB on v5e/v6e (128 MiB), 32 MiB on v7x (64 MiB)."""
    try:
        cap = int(pltpu.get_tpu_info().vmem_capacity_bytes)
    except Exception:
        cap = 64 * 1024 * 1024
    return int(min(max(cap // 2, 32 * 1024 * 1024), 100 * 1024 * 1024))


def _pick_tile_c(cp):
    for t in (512, 256, 128):
        if cp % t == 0:
            return t
    return cp


def _row_tiles(p, max_tile):
    """Minimal-waste row tiling: tile is a multiple of 8, padding < 8*n_tiles."""
    p8 = _rup(max(p, 1), SUBLANE)
    n = -(-p8 // max_tile)
    tile = _rup(-(-p8 // n), SUBLANE)
    return tile, n, tile * n


def _k_tiles(kp, max_tile):
    n = -(-kp // max_tile)
    tile = _rup(-(-kp // n), LANE)
    return tile, n, tile * n


def _choose_tiles(p, kw, cp, cfg, limit):
    tile_c = _pick_tile_c(cp)
    tile_p, n_p, pp = _row_tiles(p, cfg.max_tile_rows)
    tile_k, n_k, kp = _k_tiles(kw, cfg.max_tile_k)

    def est(tp, tk, tc):   # double-buffered inputs/outputs + f32 accumulator
        return 2 * tp * tk * 2 + 2 * tk * tc * 2 + 2 * tp * tc * 4 + tp * tc * 4 + 4 * tc * 8

    while est(tile_p, tile_k, tile_c) > 0.8 * limit and tile_p > SUBLANE:
        tile_p, n_p, pp = _row_tiles(p, max(SUBLANE, tile_p // 2))
    while est(tile_p, tile_k, tile_c) > 0.8 * limit and tile_k > LANE:
        tile_k, n_k, kp = _k_tiles(kw, max(LANE, tile_k // 2))
    return tile_p, n_p, pp, tile_k, n_k, kp, tile_c, cp // tile_c


# ----------------------------- Pallas kernels -------------------------------

def _conv_lrelu_kernel(p_ref, w_ref, o_ref, acc_ref):
    # Conv2d(bias=False) -> LeakyReLU(0.2); bf16 MXU matmul, f32 accumulation over K.
    @pl.when(pl.program_id(2) == 0)
    def _():
        acc_ref[...] = jnp.zeros_like(acc_ref)

    acc_ref[...] += jnp.dot(p_ref[...], w_ref[...], preferred_element_type=jnp.float32)

    @pl.when(pl.program_id(2) == pl.num_programs(2) - 1)
    def _():
        y = acc_ref[...]
        o_ref[...] = jnp.where(y >= 0.0, y, NEG_SLOPE * y).astype(o_ref.dtype)


def _linear_sigmoid_kernel(x_ref, w_ref, b_ref, o_ref, acc_ref):
    # nn.Linear -> nn.Sigmoid; f32 accumulation over K, fused bias + sigmoid epilogue.
    @pl.when(pl.program_id(2) == 0)
    def _():
        acc_ref[...] = jnp.zeros_like(acc_ref)

    acc_ref[...] += jnp.dot(x_ref[...], w_ref[...], preferred_element_type=jnp.float32)

    @pl.when(pl.program_id(2) == pl.num_programs(2) - 1)
    def _():
        y = acc_ref[...] + b_ref[...]
        o_ref[...] = (1.0 / (1.0 + jnp.exp(-y))).astype(o_ref.dtype)


def _conv_bn_lrelu_resident_kernel(p_ref, w_ref, g_ref, b_ref, o_ref):
    # Small-activation path: all rows resident -> exact BN stats in one pass.
    y = jnp.dot(p_ref[...], w_ref[...], preferred_element_type=jnp.float32)
    mean = jnp.mean(y, axis=0, keepdims=True)
    var = jnp.mean(jnp.square(y - mean), axis=0, keepdims=True)
    y = (y - mean) * jax.lax.rsqrt(var + EPS)
    y = y * g_ref[...] + b_ref[...]
    o_ref[...] = jnp.where(y >= 0.0, y, NEG_SLOPE * y).astype(o_ref.dtype)


def _conv_stats_kernel(p_ref, w_ref, y_ref, s_ref, acc_ref):
    # Pass A of the scalable BN path: tiled matmul + per-channel sum / sum-of-squares.
    # Grid = (cout "parallel", rows "arbitrary", K "arbitrary"); stats block is
    # resident across (rows, K) for a given cout tile (accumulator pattern).
    i = pl.program_id(1)
    k = pl.program_id(2)

    @pl.when(jnp.logical_and(i == 0, k == 0))
    def _():
        s_ref[...] = jnp.zeros_like(s_ref)

    @pl.when(k == 0)
    def _():
        acc_ref[...] = jnp.zeros_like(acc_ref)

    acc_ref[...] += jnp.dot(p_ref[...], w_ref[...], preferred_element_type=jnp.float32)

    @pl.when(k == pl.num_programs(2) - 1)
    def _():
        yb = acc_ref[...].astype(y_ref.dtype)
        y_ref[...] = yb
        y32 = yb.astype(jnp.float32)
        s_sum = jnp.sum(y32, axis=0, keepdims=True)
        s_sq = jnp.sum(y32 * y32, axis=0, keepdims=True)
        zeros = jnp.zeros((6, y32.shape[1]), jnp.float32)
        s_ref[...] += jnp.concatenate([s_sum, s_sq, zeros], axis=0)


def _bn_lrelu_kernel(y_ref, s_ref, g_ref, b_ref, o_ref, *, inv_count):
    # Pass B: normalize with the accumulated stats, scale/shift, LeakyReLU(0.2).
    y = y_ref[...].astype(jnp.float32)
    s = s_ref[...]
    mean = s[0:1, :] * inv_count
    ex2 = s[1:2, :] * inv_count
    var = jnp.maximum(ex2 - mean * mean, 0.0)        # biased variance (BN training mode)
    yn = (y - mean) * jax.lax.rsqrt(var + EPS) * g_ref[...] + b_ref[...]
    o_ref[...] = jnp.where(yn >= 0.0, yn, NEG_SLOPE * yn).astype(o_ref.dtype)


# ----------------------------- pallas_call wrappers --------------------------

def conv_lrelu(patches, w_pad, cfg):
    """patches: (P, K) bf16; w_pad: (Kw, Cp) bf16 zero-padded. Returns (Pp, Cp) bf16."""
    p, _ = patches.shape
    kw, cp = w_pad.shape
    limit = _vmem_limit()
    tile_p, n_p, pp, tile_k, n_k, kp, tile_c, n_c = _choose_tiles(p, kw, cp, cfg, limit)
    patches_p = _pad2d(patches.astype(jnp.bfloat16), pp, kp)
    w = jnp.pad(w_pad, ((0, kp - kw), (0, 0))) if kp > kw else w_pad

    return pl.pallas_call(
        _conv_lrelu_kernel,
        out_shape=jax.ShapeDtypeStruct((pp, cp), jnp.bfloat16),
        grid=(n_p, n_c, n_k),
        in_specs=[pl.BlockSpec((tile_p, tile_k), lambda i, j, kk: (i, kk)),
                  pl.BlockSpec((tile_k, tile_c), lambda i, j, kk: (kk, j))],
        out_specs=pl.BlockSpec((tile_p, tile_c), lambda i, j, kk: (i, j)),
        scratch_shapes=[pltpu.VMEM((tile_p, tile_c), jnp.float32)],
        compiler_params=pltpu.CompilerParams(
            dimension_semantics=("parallel", "parallel", "arbitrary"),
            vmem_limit_bytes=limit),
        cost_estimate=pl.CostEstimate(
            flops=int(2 * pp * kp * cp), transcendentals=0,
            bytes_accessed=int(pp * kp * 2 * n_c + kp * cp * 2 * n_p + pp * cp * 2)),
    )(patches_p, w)


def linear_sigmoid(x, w_pad, b_pad, cfg):
    """x: (N, F) bf16; w_pad: (Kw, Cp) bf16; b_pad: (1, Cp) f32. Returns (Np, Cp) f32."""
    n, _ = x.shape
    kw, cp = w_pad.shape
    limit = _vmem_limit()
    tile_p, n_p, pp, tile_k, n_k, kp, tile_c, n_c = _choose_tiles(n, kw, cp, cfg, limit)
    xp = _pad2d(x.astype(jnp.bfloat16), pp, kp)
    w = jnp.pad(w_pad, ((0, kp - kw), (0, 0))) if kp > kw else w_pad

    return pl.pallas_call(
        _linear_sigmoid_kernel,
        out_shape=jax.ShapeDtypeStruct((pp, cp), jnp.float32),
        grid=(n_p, n_c, n_k),
        in_specs=[pl.BlockSpec((tile_p, tile_k), lambda i, j, kk: (i, kk)),
                  pl.BlockSpec((tile_k, tile_c), lambda i, j, kk: (kk, j)),
                  pl.BlockSpec((1, tile_c), lambda i, j, kk: (0, j))],
        out_specs=pl.BlockSpec((tile_p, tile_c), lambda i, j, kk: (i, j)),
        scratch_shapes=[pltpu.VMEM((tile_p, tile_c), jnp.float32)],
        compiler_params=pltpu.CompilerParams(
            dimension_semantics=("parallel", "parallel", "arbitrary"),
            vmem_limit_bytes=limit),
        cost_estimate=pl.CostEstimate(
            flops=int(2 * pp * kp * cp), transcendentals=int(pp * cp),
            bytes_accessed=int(pp * kp * 2 * n_c + kp * cp * 2 * n_p + pp * cp * 4 + cp * 4)),
    )(xp, w, b_pad)


def conv_bn_lrelu(patches, w_pad, gamma_pad, beta_pad, cfg):
    """Conv + BatchNorm (batch stats over all P rows) + LeakyReLU; returns (>=P, Cp) bf16."""
    p, k = patches.shape
    kw, cp = w_pad.shape
    limit = _vmem_limit()
    tile_c = _pick_tile_c(cp)
    n_c = cp // tile_c

    # Fast path: whole activation resident -> exact statistics, single launch.
    resident_bytes = (2 * p * kw * 2 + 2 * kw * tile_c * 2 + 2 * p * tile_c * 2
                      + 4 * tile_c * 8)
    if p <= cfg.max_resident_rows and resident_bytes <= 0.45 * limit:
        patches_p = jnp.pad(patches.astype(jnp.bfloat16), ((0, 0), (0, kw - k)))
        return pl.pallas_call(
            _conv_bn_lrelu_resident_kernel,
            out_shape=jax.ShapeDtypeStruct((p, cp), jnp.bfloat16),
            grid=(n_c,),
            in_specs=[pl.BlockSpec((p, kw), lambda j: (0, 0)),
                      pl.BlockSpec((kw, tile_c), lambda j: (0, j)),
                      pl.BlockSpec((1, tile_c), lambda j: (0, j)),
                      pl.BlockSpec((1, tile_c), lambda j: (0, j))],
            out_specs=pl.BlockSpec((p, tile_c), lambda j: (0, j)),
            compiler_params=pltpu.CompilerParams(
                dimension_semantics=("parallel",),
                vmem_limit_bytes=limit),
            cost_estimate=pl.CostEstimate(
                flops=int(2 * p * kw * cp + 8 * p * cp), transcendentals=int(cp),
                bytes_accessed=int(p * kw * 2 * n_c + kw * cp * 2 + p * cp * 2 + 2 * cp * 8)),
        )(patches_p, w_pad, gamma_pad, beta_pad)

    # Scalable path: (rows, K)-tiled matmul + accumulated stats, then parallel normalize.
    tile_p, n_p, pp, tile_k, n_k, kp, tile_c, n_c = _choose_tiles(p, kw, cp, cfg, limit)
    patches_p = _pad2d(patches.astype(jnp.bfloat16), pp, kp)
    w = jnp.pad(w_pad, ((0, kp - kw), (0, 0))) if kp > kw else w_pad

    y, stats = pl.pallas_call(
        _conv_stats_kernel,
        out_shape=(jax.ShapeDtypeStruct((pp, cp), jnp.bfloat16),
                   jax.ShapeDtypeStruct((8, cp), jnp.float32)),
        grid=(n_c, n_p, n_k),
        in_specs=[pl.BlockSpec((tile_p, tile_k), lambda j, i, kk: (i, kk)),
                  pl.BlockSpec((tile_k, tile_c), lambda j, i, kk: (kk, j))],
        out_specs=(pl.BlockSpec((tile_p, tile_c), lambda j, i, kk: (i, j)),
                   pl.BlockSpec((8, tile_c), lambda j, i, kk: (0, j))),
        scratch_shapes=[pltpu.VMEM((tile_p, tile_c), jnp.float32)],
        compiler_params=pltpu.CompilerParams(
            dimension_semantics=("parallel", "arbitrary", "arbitrary"),
            vmem_limit_bytes=limit),
        cost_estimate=pl.CostEstimate(
            flops=int(2 * pp * kp * cp + 4 * pp * cp), transcendentals=0,
            bytes_accessed=int(pp * kp * 2 * n_c + kp * cp * 2 * n_p + pp * cp * 2 + 8 * cp * 4)),
    )(patches_p, w)

    return pl.pallas_call(
        functools.partial(_bn_lrelu_kernel, inv_count=1.0 / p),
        out_shape=jax.ShapeDtypeStruct((pp, cp), jnp.bfloat16),
        grid=(n_p, n_c),
        in_specs=[pl.BlockSpec((tile_p, tile_c), lambda i, j: (i, j)),
                  pl.BlockSpec((8, tile_c), lambda i, j: (0, j)),
                  pl.BlockSpec((1, tile_c), lambda i, j: (0, j)),
                  pl.BlockSpec((1, tile_c), lambda i, j: (0, j))],
        out_specs=pl.BlockSpec((tile_p, tile_c), lambda i, j: (i, j)),
        compiler_params=pltpu.CompilerParams(
            dimension_semantics=("parallel", "parallel"),
            vmem_limit_bytes=limit),
        cost_estimate=pl.CostEstimate(
            flops=int(8 * pp * cp), transcendentals=int(cp * n_p),
            bytes_accessed=int(pp * cp * 4 + 8 * cp * 4 * n_p + 2 * cp * 4 * n_p)),
    )(y, stats, gamma_pad, beta_pad)


# ----------------------------- glue (plain JAX) ------------------------------

def _im2col(x_nhwc, k=4, s=2, p=1):
    """Extract conv patches. Returns ((N*OH*OW, k*k*C), (N, OH, OW)); rows are (kh,kw,c)."""
    # TODO(synk): move this gather into the kernel (pl.ANY + strided make_async_copy)
    #             to avoid materializing the blown-up patch matrix in HBM.
    n, h, w, c = x_nhwc.shape
    oh = (h + 2 * p - k) // s + 1
    ow = (w + 2 * p - k) // s + 1
    xp = jnp.pad(x_nhwc, ((0, 0), (p, p), (p, p), (0, 0)))
    cols = []
    for kh in range(k):
        for kw_ in range(k):
            cols.append(xp[:, kh:kh + s * (oh - 1) + 1:s, kw_:kw_ + s * (ow - 1) + 1:s, :])
    patches = jnp.stack(cols, axis=3)                   # (N, OH, OW, k*k, C)
    return patches.reshape(n * oh * ow, k * k * c), (n, oh, ow)


def init_params(key, ndf, nc, nz, img_size):
    """Synthetic parameters, pre-padded so activations stay lane-dense (128) between layers."""
    max_step = 3
    r = img_size // 2 ** (max_step + 1)
    keys = jax.random.split(key, 16)
    params = {}

    # Conv2d(nc, ndf, 4, 2, 1, bias=False); rows ordered (kh, kw, cin), cin unpadded (raw input)
    k0 = 16 * nc
    w0 = 0.05 * jax.random.normal(keys[0], (k0, ndf), jnp.float32)
    params["conv0_w"] = _pad2d(w0, _rup(k0, LANE), _rup(ndf, LANE)).astype(jnp.bfloat16)

    # three Shrink blocks; weight rows ordered (kh, kw, cin_padded) with zero rows for padding
    for i in range(max_step):
        cin, cout = ndf * 2 ** i, ndf * 2 ** (i + 1)
        cin_p, cout_p = _rup(cin, LANE), _rup(cout, LANE)
        w = 0.05 * jax.random.normal(keys[1 + 3 * i], (16, cin, cout), jnp.float32)
        w_full = jnp.zeros((16, cin_p, cout_p), jnp.float32).at[:, :cin, :cout].set(w)
        params[f"shrink{i}_w"] = w_full.reshape(16 * cin_p, cout_p).astype(jnp.bfloat16)
        g = 1.0 + 0.1 * jax.random.normal(keys[2 + 3 * i], (1, cout), jnp.float32)
        b = 0.1 * jax.random.normal(keys[3 + 3 * i], (1, cout), jnp.float32)
        params[f"shrink{i}_gamma"] = _pad2d(g, 1, cout_p, value=1.0)   # f32, padded ch -> 1
        params[f"shrink{i}_beta"] = _pad2d(b, 1, cout_p)               # f32, padded ch -> 0

    # Linear(ndf*8*r*r, nz) + Sigmoid; rows laid out as (oh, ow, c_padded) so the NHWC
    # channel-padded flatten feeds it directly (no NCHW transpose at runtime).
    c_last = ndf * 2 ** max_step
    c_last_p = _rup(c_last, LANE)
    nz_p = _rup(nz, LANE)
    fc_w = 0.05 * jax.random.normal(keys[10], (r, r, c_last, nz), jnp.float32)
    fc_full = jnp.zeros((r, r, c_last_p, nz_p), jnp.float32).at[:, :, :c_last, :nz].set(fc_w)
    params["fc_w"] = fc_full.reshape(r * r * c_last_p, nz_p).astype(jnp.bfloat16)
    fc_b = 0.05 * jax.random.normal(keys[11], (1, nz), jnp.float32)
    params["fc_b"] = _pad2d(fc_b, 1, nz_p)                              # f32
    return params


@functools.partial(jax.jit, static_argnums=(2, 3, 4))
def discriminator_forward(x_nchw, params, ndf, nz, cfg):
    """Forward: x (N, nc, H, W) -> sigmoid(Encoder(x)) of shape (N, nz)."""
    assert params["conv0_w"].shape[1] == _rup(ndf, LANE)
    x = jnp.transpose(x_nchw, (0, 2, 3, 1)).astype(jnp.bfloat16)       # NCHW -> NHWC

    # Conv2d(nc, ndf, 4, 2, 1) + LeakyReLU(0.2); output kept channel-padded (lane-dense).
    patches, (n, oh, ow) = _im2col(x)
    y = conv_lrelu(patches, params["conv0_w"], cfg)
    x = y[:n * oh * ow].reshape(n, oh, ow, params["conv0_w"].shape[1])

    # 3 x Shrink: Conv + BatchNorm (batch stats) + LeakyReLU(0.2), channel-padded throughout.
    for i in range(3):
        w = params[f"shrink{i}_w"]
        patches, (n, oh, ow) = _im2col(x)
        y = conv_bn_lrelu(patches, w, params[f"shrink{i}_gamma"],
                          params[f"shrink{i}_beta"], cfg)
        x = y[:n * oh * ow].reshape(n, oh, ow, w.shape[1])

    # NHWC (channel-padded) flatten; fc_w rows were laid out at init to match.
    x_flat = x.reshape(x.shape[0], -1)
    out = linear_sigmoid(x_flat, params["fc_w"], params["fc_b"], cfg)
    return out[:x_flat.shape[0], :nz]


# ----------------------------- main -----------------------------------------

if __name__ == "__main__":
    key = jax.random.PRNGKey(0)
    k_x, k_p, k_x2, k_p2 = jax.random.split(key, 4)

    # Test 1: the shipped tiny config (default tiling -> resident-BN fast path).
    ndf, nc, nz, img_size, batch = 8, 4, 8, 16, 2
    cfg = TileCfg()
    x = jax.random.normal(k_x, (batch, nc, img_size, img_size), jnp.float32)
    params = init_params(k_p, ndf, nc, nz, img_size)
    out = jax.block_until_ready(discriminator_forward(x, params, ndf, nz, cfg))
    assert out.shape == (batch, nz), out.shape
    assert bool(jnp.all(jnp.isfinite(out)))
    assert bool(jnp.all((out > 0.0) & (out < 1.0)))     # sigmoid range

    # Test 2: tightened tiling config to exercise the scalable paths
    # (multi row-tile conv, K-axis accumulation, two-pass row-tiled BatchNorm).
    ndf2, nc2, nz2, img2, batch2 = 16, 3, 16, 32, 2
    cfg2 = TileCfg(max_tile_rows=128, max_tile_k=1024, max_resident_rows=0)
    x2 = jax.random.normal(k_x2, (batch2, nc2, img2, img2), jnp.float32)
    params2 = init_params(k_p2, ndf2, nc2, nz2, img2)
    out2 = jax.block_until_ready(discriminator_forward(x2, params2, ndf2, nz2, cfg2))
    assert out2.shape == (batch2, nz2), out2.shape
    assert bool(jnp.all(jnp.isfinite(out2)))
    assert bool(jnp.all((out2 > 0.0) & (out2 < 1.0)))

    print("KERNEL_OK")
</pallas_src>

<mosaic_0001>
module attributes {stable_mosaic.version = 11 : i64} {
  func.func @_conv_lrelu_kernel(%arg0: i32, %arg1: i32, %arg2: i32, %arg3: memref<128x128xbf16, #tpu.memory_space<vmem>>, %arg4: memref<128x128xbf16, #tpu.memory_space<vmem>>, %arg5: memref<128x128xbf16, #tpu.memory_space<vmem>>, %arg6: memref<128x128xf32, #tpu.memory_space<vmem>>) attributes {dimension_semantics = [#tpu.dimension_semantics<parallel>, #tpu.dimension_semantics<parallel>, #tpu.dimension_semantics<arbitrary>], iteration_bounds = array<i64: 1, 1, 1>, scalar_prefetch = 0 : i64, scratch_operands = 1 : i64, tpu.core_type = #tpu.core_type<tc>, window_params = [{transform_indices = @transform_0, window_bounds = array<i64: 128, 128>}, {transform_indices = @transform_1, window_bounds = array<i64: 128, 128>}, {transform_indices = @transform_2, window_bounds = array<i64: 128, 128>}]} {
    %c0_i32 = arith.constant 0 : i32
    %0 = arith.cmpi eq, %arg2, %c0_i32 : i32
    %1 = arith.extui %0 : i1 to i32
    %c0_i32_0 = arith.constant 0 : i32
    %2 = arith.cmpi ne, %1, %c0_i32_0 : i32
    scf.if %2 {
      %cst_10 = arith.constant 0.000000e+00 : f32
      %12 = vector.broadcast %cst_10 : f32 to vector<128x128xf32>
      %c0_11 = arith.constant 0 : index
      %c0_12 = arith.constant 0 : index
      %13 = vector.load %arg6[%c0_11, %c0_12] : memref<128x128xf32, #tpu.memory_space<vmem>>, vector<128x128xf32>
      tpu.vector_store %arg6[%c0_11, %c0_12], %12 {strides = array<i32>} : memref<128x128xf32, #tpu.memory_space<vmem>>, vector<128x128xf32>,
    } else {
    }
    %c0 = arith.constant 0 : index
    %c0_1 = arith.constant 0 : index
    %3 = vector.load %arg6[%c0, %c0_1] : memref<128x128xf32, #tpu.memory_space<vmem>>, vector<128x128xf32>
    %c0_2 = arith.constant 0 : index
    %c0_3 = arith.constant 0 : index
    %4 = vector.load %arg3[%c0_2, %c0_3] : memref<128x128xbf16, #tpu.memory_space<vmem>>, vector<128x128xbf16>
    %c0_4 = arith.constant 0 : index
    %c0_5 = arith.constant 0 : index
    %5 = vector.load %arg4[%c0_4, %c0_5] : memref<128x128xbf16, #tpu.memory_space<vmem>>, vector<128x128xbf16>
    %cst = arith.constant dense<0.000000e+00> : vector<128x128xf32>
    %6 = tpu.matmul %4, %5, %cst {dimension_numbers = #tpu.dot_dimension_numbers<[1], [0], [0], [1], [0, 0, 1, 1], [], []>} : vector<128x128xbf16>, vector<128x128xbf16>, vector<128x128xf32> -> vector<128x128xf32>
    %7 = arith.addf %3, %6 : vector<128x128xf32>
    %c0_6 = arith.constant 0 : index
    %c0_7 = arith.constant 0 : index
    %8 = vector.load %arg6[%c0_6, %c0_7] : memref<128x128xf32, #tpu.memory_space<vmem>>, vector<128x128xf32>
    tpu.vector_store %arg6[%c0_6, %c0_7], %7 {strides = array<i32>} : memref<128x128xf32, #tpu.memory_space<vmem>>, vector<128x128xf32>,
    %c0_i32_8 = arith.constant 0 : i32
    %9 = arith.cmpi eq, %arg2, %c0_i32_8 : i32
    %10 = arith.extui %9 : i1 to i32
    %c0_i32_9 = arith.constant 0 : i32
    %11 = arith.cmpi ne, %10, %c0_i32_9 : i32
    scf.if %11 {
      %c0_10 = arith.constant 0 : index
      %c0_11 = arith.constant 0 : index
      %12 = vector.load %arg6[%c0_10, %c0_11] : memref<128x128xf32, #tpu.memory_space<vmem>>, vector<128x128xf32>
      %cst_12 = arith.constant 0.000000e+00 : f32
      %13 = vector.broadcast %cst_12 : f32 to vector<128x128xf32>
      %14 = arith.cmpf oge, %12, %13 : vector<128x128xf32>
      %cst_13 = arith.constant 2.000000e-01 : f32
      %15 = vector.broadcast %cst_13 : f32 to vector<128x128xf32>
      %16 = arith.mulf %15, %12 : vector<128x128xf32>
      %17 = arith.select %14, %12, %16 : vector<128x128xi1>, vector<128x128xf32>
      %18 = arith.truncf %17 : vector<128x128xf32> to vector<128x128xbf16>
      %c0_14 = arith.constant 0 : index
      %c0_15 = arith.constant 0 : index
      %19 = vector.load %arg5[%c0_14, %c0_15] : memref<128x128xbf16, #tpu.memory_space<vmem>>, vector<128x128xbf16>
      tpu.vector_store %arg5[%c0_14, %c0_15], %18 {strides = array<i32>} : memref<128x128xbf16, #tpu.memory_space<vmem>>, vector<128x128xbf16>,
    } else {
    }
    return
  }
  func.func @transform_0(%arg0: i32, %arg1: i32, %arg2: i32) -> (i32, i32) {
    %c0_i32 = arith.constant 0 : i32
    return %arg0, %arg2 : i32, i32
  }
  func.func @transform_1(%arg0: i32, %arg1: i32, %arg2: i32) -> (i32, i32) {
    %c0_i32 = arith.constant 0 : i32
    return %arg2, %arg1 : i32, i32
  }
  func.func @transform_2(%arg0: i32, %arg1: i32, %arg2: i32) -> (i32, i32) {
    %c0_i32 = arith.constant 0 : i32
    return %arg0, %arg1 : i32, i32
  }
}

module attributes {stable_mosaic.version = 11 : i64} {
  func.func @_conv_bn_lrelu_resident_kernel(%arg0: i32, %arg1: memref<32x2048xbf16, #tpu.memory_space<vmem>>, %arg2: memref<2048x128xbf16, #tpu.memory_space<vmem>>, %arg3: memref<1x128xf32, #tpu.memory_space<vmem>>, %arg4: memref<1x128xf32, #tpu.memory_space<vmem>>, %arg5: memref<32x128xbf16, #tpu.memory_space<vmem>>) attributes {dimension_semantics = [#tpu.dimension_semantics<parallel>], iteration_bounds = array<i64: 1>, scalar_prefetch = 0 : i64, scratch_operands = 0 : i64, tpu.core_type = #tpu.core_type<tc>, window_params = [{pipeline_mode = #tpu.pipeline_mode<synchronous>, transform_indices = @transform_0, window_bounds = array<i64: 32, 2048>}, {transform_indices = @transform_1, window_bounds = array<i64: 2048, 128>}, {transform_indices = @transform_2, window_bounds = array<i64: 1, 128>}, {transform_indices = @transform_3, window_bounds = array<i64: 1, 128>}, {transform_indices = @transform_4, window_bounds = array<i64: 32, 128>}]} {
    %c0 = arith.constant 0 : index
    %c0_0 = arith.constant 0 : index
    %0 = vector.load %arg1[%c0, %c0_0] : memref<32x2048xbf16, #tpu.memory_space<vmem>>, vector<32x2048xbf16>
    %c0_1 = arith.constant 0 : index
    %c0_2 = arith.constant 0 : index
    %1 = vector.load %arg2[%c0_1, %c0_2] : memref<2048x128xbf16, #tpu.memory_space<vmem>>, vector<2048x128xbf16>
    %cst = arith.constant dense<0.000000e+00> : vector<32x128xf32>
    %2 = tpu.matmul %0, %1, %cst {dimension_numbers = #tpu.dot_dimension_numbers<[1], [0], [0], [1], [0, 0, 1, 1], [], []>} : vector<32x2048xbf16>, vector<2048x128xbf16>, vector<32x128xf32> -> vector<32x128xf32>
    %cst_3 = arith.constant dense<0.000000e+00> : vector<128xf32>
    %3 = vector.multi_reduction <add>, %2, %cst_3 [0] : vector<32x128xf32> to vector<128xf32>
    %4 = vector.shape_cast %3 : vector<128xf32> to vector<1x128xf32>
    %cst_4 = arith.constant 3.200000e+01 : f32
    %5 = vector.broadcast %cst_4 : f32 to vector<1x128xf32>
    %6 = arith.divf %4, %5 : vector<1x128xf32>
    %7 = vector.broadcast %6 : vector<1x128xf32> to vector<32x128xf32>
    %8 = arith.subf %2, %7 : vector<32x128xf32>
    %9 = arith.mulf %8, %8 : vector<32x128xf32>
    %cst_5 = arith.constant dense<0.000000e+00> : vector<128xf32>
    %10 = vector.multi_reduction <add>, %9, %cst_5 [0] : vector<32x128xf32> to vector<128xf32>
    %11 = vector.shape_cast %10 : vector<128xf32> to vector<1x128xf32>
    %cst_6 = arith.constant 3.200000e+01 : f32
    %12 = vector.broadcast %cst_6 : f32 to vector<1x128xf32>
    %13 = arith.divf %11, %12 : vector<1x128xf32>
    %14 = vector.broadcast %6 : vector<1x128xf32> to vector<32x128xf32>
    %15 = arith.subf %2, %14 : vector<32x128xf32>
    %cst_7 = arith.constant 9.99999974E-6 : f32
    %16 = vector.broadcast %cst_7 : f32 to vector<1x128xf32>
    %17 = arith.addf %13, %16 : vector<1x128xf32>
    %18 = math.rsqrt %17 : vector<1x128xf32>
    %19 = vector.broadcast %18 : vector<1x128xf32> to vector<32x128xf32>
    %20 = arith.mulf %15, %19 : vector<32x128xf32>
    %c0_8 = arith.constant 0 : index
    %c0_9 = arith.constant 0 : index
    %21 = vector.load %arg3[%c0_8, %c0_9] : memref<1x128xf32, #tpu.memory_space<vmem>>, vector<1x128xf32>
    %22 = vector.broadcast %21 : vector<1x128xf32> to vector<32x128xf32>
    %23 = arith.mulf %20, %22 : vector<32x128xf32>
    %c0_10 = arith.constant 0 : index
    %c0_11 = arith.constant 0 : index
    %24 = vector.load %arg4[%c0_10, %c0_11] : memref<1x128xf32, #tpu.memory_space<vmem>>, vector<1x128xf32>
    %25 = vector.broadcast %24 : vector<1x128xf32> to vector<32x128xf32>
    %26 = arith.addf %23, %25 : vector<32x128xf32>
    %cst_12 = arith.constant 0.000000e+00 : f32
    %27 = vector.broadcast %cst_12 : f32 to vector<32x128xf32>
    %28 = arith.cmpf oge, %26, %27 : vector<32x128xf32>
    %cst_13 = arith.constant 2.000000e-01 : f32
    %29 = vector.broadcast %cst_13 : f32 to vector<32x128xf32>
    %30 = arith.mulf %29, %26 : vector<32x128xf32>
    %31 = arith.select %28, %26, %30 : vector<32x128xi1>, vector<32x128xf32>
    %32 = arith.truncf %31 : vector<32x128xf32> to vector<32x128xbf16>
    %c0_14 = arith.constant 0 : index
    %c0_15 = arith.constant 0 : index
    %33 = vector.load %arg5[%c0_14, %c0_15] : memref<32x128xbf16, #tpu.memory_space<vmem>>, vector<32x128xbf16>
    tpu.vector_store %arg5[%c0_14, %c0_15], %32 {strides = array<i32>} : memref<32x128xbf16, #tpu.memory_space<vmem>>, vector<32x128xbf16>,
    return
  }
  func.func @transform_0(%arg0: i32) -> (i32, i32) {
    %c0_i32 = arith.constant 0 : i32
    %c0_i32_0 = arith.constant 0 : i32
    %c0_i32_1 = arith.constant 0 : i32
    return %c0_i32, %c0_i32_0 : i32, i32
  }
  func.func @transform_1(%arg0: i32) -> (i32, i32) {
    %c0_i32 = arith.constant 0 : i32
    %c0_i32_0 = arith.constant 0 : i32
    return %c0_i32, %arg0 : i32, i32
  }
  func.func @transform_2(%arg0: i32) -> (i32, i32) {
    %c0_i32 = arith.constant 0 : i32
    %c0_i32_0 = arith.constant 0 : i32
    return %c0_i32, %arg0 : i32, i32
  }
  func.func @transform_3(%arg0: i32) -> (i32, i32) {
    %c0_i32 = arith.constant 0 : i32
    %c0_i32_0 = arith.constant 0 : i32
    return %c0_i32, %arg0 : i32, i32
  }
  func.func @transform_4(%arg0: i32) -> (i32, i32) {
    %c0_i32 = arith.constant 0 : i32
    %c0_i32_0 = arith.constant 0 : i32
    return %c0_i32, %arg0 : i32, i32
  }
}

module attributes {stable_mosaic.version = 11 : i64} {
  func.func @_conv_bn_lrelu_resident_kernel(%arg0: i32, %arg1: memref<8x2048xbf16, #tpu.memory_space<vmem>>, %arg2: memref<2048x128xbf16, #tpu.memory_space<vmem>>, %arg3: memref<1x128xf32, #tpu.memory_space<vmem>>, %arg4: memref<1x128xf32, #tpu.memory_space<vmem>>, %arg5: memref<8x128xbf16, #tpu.memory_space<vmem>>) attributes {dimension_semantics = [#tpu.dimension_semantics<parallel>], iteration_bounds = array<i64: 1>, scalar_prefetch = 0 : i64, scratch_operands = 0 : i64, tpu.core_type = #tpu.core_type<tc>, window_params = [{pipeline_mode = #tpu.pipeline_mode<synchronous>, transform_indices = @transform_0, window_bounds = array<i64: 8, 2048>}, {transform_indices = @transform_1, window_bounds = array<i64: 2048, 128>}, {transform_indices = @transform_2, window_bounds = array<i64: 1, 128>}, {transform_indices = @transform_3, window_bounds = array<i64: 1, 128>}, {transform_indices = @transform_4, window_bounds = array<i64: 8, 128>}]} {
    %c0 = arith.constant 0 : index
    %c0_0 = arith.constant 0 : index
    %0 = vector.load %arg1[%c0, %c0_0] : memref<8x2048xbf16, #tpu.memory_space<vmem>>, vector<8x2048xbf16>
    %c0_1 = arith.constant 0 : index
    %c0_2 = arith.constant 0 : index
    %1 = vector.load %arg2[%c0_1, %c0_2] : memref<2048x128xbf16, #tpu.memory_space<vmem>>, vector<2048x128xbf16>
    %cst = arith.constant dense<0.000000e+00> : vector<8x128xf32>
    %2 = tpu.matmul %0, %1, %cst {dimension_numbers = #tpu.dot_dimension_numbers<[1], [0], [0], [1], [0, 0, 1, 1], [], []>} : vector<8x2048xbf16>, vector<2048x128xbf16>, vector<8x128xf32> -> vector<8x128xf32>
    %cst_3 = arith.constant dense<0.000000e+00> : vector<128xf32>
    %3 = vector.multi_reduction <add>, %2, %cst_3 [0] : vector<8x128xf32> to vector<128xf32>
    %4 = vector.shape_cast %3 : vector<128xf32> to vector<1x128xf32>
    %cst_4 = arith.constant 8.000000e+00 : f32
    %5 = vector.broadcast %cst_4 : f32 to vector<1x128xf32>
    %6 = arith.divf %4, %5 : vector<1x128xf32>
    %7 = vector.broadcast %6 : vector<1x128xf32> to vector<8x128xf32>
    %8 = arith.subf %2, %7 : vector<8x128xf32>
    %9 = arith.mulf %8, %8 : vector<8x128xf32>
    %cst_5 = arith.constant dense<0.000000e+00> : vector<128xf32>
    %10 = vector.multi_reduction <add>, %9, %cst_5 [0] : vector<8x128xf32> to vector<128xf32>
    %11 = vector.shape_cast %10 : vector<128xf32> to vector<1x128xf32>
    %cst_6 = arith.constant 8.000000e+00 : f32
    %12 = vector.broadcast %cst_6 : f32 to vector<1x128xf32>
    %13 = arith.divf %11, %12 : vector<1x128xf32>
    %14 = vector.broadcast %6 : vector<1x128xf32> to vector<8x128xf32>
    %15 = arith.subf %2, %14 : vector<8x128xf32>
    %cst_7 = arith.constant 9.99999974E-6 : f32
    %16 = vector.broadcast %cst_7 : f32 to vector<1x128xf32>
    %17 = arith.addf %13, %16 : vector<1x128xf32>
    %18 = math.rsqrt %17 : vector<1x128xf32>
    %19 = vector.broadcast %18 : vector<1x128xf32> to vector<8x128xf32>
    %20 = arith.mulf %15, %19 : vector<8x128xf32>
    %c0_8 = arith.constant 0 : index
    %c0_9 = arith.constant 0 : index
    %21 = vector.load %arg3[%c0_8, %c0_9] : memref<1x128xf32, #tpu.memory_space<vmem>>, vector<1x128xf32>
    %22 = vector.broadcast %21 : vector<1x128xf32> to vector<8x128xf32>
    %23 = arith.mulf %20, %22 : vector<8x128xf32>
    %c0_10 = arith.constant 0 : index
    %c0_11 = arith.constant 0 : index
    %24 = vector.load %arg4[%c0_10, %c0_11] : memref<1x128xf32, #tpu.memory_space<vmem>>, vector<1x128xf32>
    %25 = vector.broadcast %24 : vector<1x128xf32> to vector<8x128xf32>
    %26 = arith.addf %23, %25 : vector<8x128xf32>
    %cst_12 = arith.constant 0.000000e+00 : f32
    %27 = vector.broadcast %cst_12 : f32 to vector<8x128xf32>
    %28 = arith.cmpf oge, %26, %27 : vector<8x128xf32>
    %cst_13 = arith.constant 2.000000e-01 : f32
    %29 = vector.broadcast %cst_13 : f32 to vector<8x128xf32>
    %30 = arith.mulf %29, %26 : vector<8x128xf32>
    %31 = arith.select %28, %26, %30 : vector<8x128xi1>, vector<8x128xf32>
    %32 = arith.truncf %31 : vector<8x128xf32> to vector<8x128xbf16>
    %c0_14 = arith.constant 0 : index
    %c0_15 = arith.constant 0 : index
    %33 = vector.load %arg5[%c0_14, %c0_15] : memref<8x128xbf16, #tpu.memory_space<vmem>>, vector<8x128xbf16>
    tpu.vector_store %arg5[%c0_14, %c0_15], %32 {strides = array<i32>} : memref<8x128xbf16, #tpu.memory_space<vmem>>, vector<8x128xbf16>,
    return
  }
  func.func @transform_0(%arg0: i32) -> (i32, i32) {
    %c0_i32 = arith.constant 0 : i32
    %c0_i32_0 = arith.constant 0 : i32
    %c0_i32_1 = arith.constant 0 : i32
    return %c0_i32, %c0_i32_0 : i32, i32
  }
  func.func @transform_1(%arg0: i32) -> (i32, i32) {
    %c0_i32 = arith.constant 0 : i32
    %c0_i32_0 = arith.constant 0 : i32
    return %c0_i32, %arg0 : i32, i32
  }
  func.func @transform_2(%arg0: i32) -> (i32, i32) {
    %c0_i32 = arith.constant 0 : i32
    %c0_i32_0 = arith.constant 0 : i32
    return %c0_i32, %arg0 : i32, i32
  }
  func.func @transform_3(%arg0: i32) -> (i32, i32) {
    %c0_i32 = arith.constant 0 : i32
    %c0_i32_0 = arith.constant 0 : i32
    return %c0_i32, %arg0 : i32, i32
  }
  func.func @transform_4(%arg0: i32) -> (i32, i32) {
    %c0_i32 = arith.constant 0 : i32
    %c0_i32_0 = arith.constant 0 : i32
    return %c0_i32, %arg0 : i32, i32
  }
}

module attributes {stable_mosaic.version = 11 : i64} {
  func.func @_linear_sigmoid_kernel(%arg0: i32, %arg1: i32, %arg2: i32, %arg3: memref<8x128xbf16, #tpu.memory_space<vmem>>, %arg4: memref<128x128xbf16, #tpu.memory_space<vmem>>, %arg5: memref<1x128xf32, #tpu.memory_space<vmem>>, %arg6: memref<8x128xf32, #tpu.memory_space<vmem>>, %arg7: memref<8x128xf32, #tpu.memory_space<vmem>>) attributes {dimension_semantics = [#tpu.dimension_semantics<parallel>, #tpu.dimension_semantics<parallel>, #tpu.dimension_semantics<arbitrary>], iteration_bounds = array<i64: 1, 1, 1>, scalar_prefetch = 0 : i64, scratch_operands = 1 : i64, tpu.core_type = #tpu.core_type<tc>, window_params = [{transform_indices = @transform_0, window_bounds = array<i64: 8, 128>}, {transform_indices = @transform_1, window_bounds = array<i64: 128, 128>}, {transform_indices = @transform_2, window_bounds = array<i64: 1, 128>}, {transform_indices = @transform_3, window_bounds = array<i64: 8, 128>}]} {
    %c0_i32 = arith.constant 0 : i32
    %0 = arith.cmpi eq, %arg2, %c0_i32 : i32
    %1 = arith.extui %0 : i1 to i32
    %c0_i32_0 = arith.constant 0 : i32
    %2 = arith.cmpi ne, %1, %c0_i32_0 : i32
    scf.if %2 {
      %cst_10 = arith.constant 0.000000e+00 : f32
      %12 = vector.broadcast %cst_10 : f32 to vector<8x128xf32>
      %c0_11 = arith.constant 0 : index
      %c0_12 = arith.constant 0 : index
      %13 = vector.load %arg7[%c0_11, %c0_12] : memref<8x128xf32, #tpu.memory_space<vmem>>, vector<8x128xf32>
      tpu.vector_store %arg7[%c0_11, %c0_12], %12 {strides = array<i32>} : memref<8x128xf32, #tpu.memory_space<vmem>>, vector<8x128xf32>,
    } else {
    }
    %c0 = arith.constant 0 : index
    %c0_1 = arith.constant 0 : index
    %3 = vector.load %arg7[%c0, %c0_1] : memref<8x128xf32, #tpu.memory_space<vmem>>, vector<8x128xf32>
    %c0_2 = arith.constant 0 : index
    %c0_3 = arith.constant 0 : index
    %4 = vector.load %arg3[%c0_2, %c0_3] : memref<8x128xbf16, #tpu.memory_space<vmem>>, vector<8x128xbf16>
    %c0_4 = arith.constant 0 : index
    %c0_5 = arith.constant 0 : index
    %5 = vector.load %arg4[%c0_4, %c0_5] : memref<128x128xbf16, #tpu.memory_space<vmem>>, vector<128x128xbf16>
    %cst = arith.constant dense<0.000000e+00> : vector<8x128xf32>
    %6 = tpu.matmul %4, %5, %cst {dimension_numbers = #tpu.dot_dimension_numbers<[1], [0], [0], [1], [0, 0, 1, 1], [], []>} : vector<8x128xbf16>, vector<128x128xbf16>, vector<8x128xf32> -> vector<8x128xf32>
    %7 = arith.addf %3, %6 : vector<8x128xf32>
    %c0_6 = arith.constant 0 : index
    %c0_7 = arith.constant 0 : index
    %8 = vector.load %arg7[%c0_6, %c0_7] : memref<8x128xf32, #tpu.memory_space<vmem>>, vector<8x128xf32>
    tpu.vector_store %arg7[%c0_6, %c0_7], %7 {strides = array<i32>} : memref<8x128xf32, #tpu.memory_space<vmem>>, vector<8x128xf32>,
    %c0_i32_8 = arith.constant 0 : i32
    %9 = arith.cmpi eq, %arg2, %c0_i32_8 : i32
    %10 = arith.extui %9 : i1 to i32
    %c0_i32_9 = arith.constant 0 : i32
    %11 = arith.cmpi ne, %10, %c0_i32_9 : i32
    scf.if %11 {
      %c0_10 = arith.constant 0 : index
      %c0_11 = arith.constant 0 : index
      %12 = vector.load %arg7[%c0_10, %c0_11] : memref<8x128xf32, #tpu.memory_space<vmem>>, vector<8x128xf32>
      %c0_12 = arith.constant 0 : index
      %c0_13 = arith.constant 0 : index
      %13 = vector.load %arg5[%c0_12, %c0_13] : memref<1x128xf32, #tpu.memory_space<vmem>>, vector<1x128xf32>
      %14 = vector.broadcast %13 : vector<1x128xf32> to vector<8x128xf32>
      %15 = arith.addf %12, %14 : vector<8x128xf32>
      %cst_14 = arith.constant 0.000000e+00 : f32
      %16 = vector.broadcast %cst_14 : f32 to vector<8x128xf32>
      %17 = arith.subf %16, %15 : vector<8x128xf32>
      %18 = math.exp %17 : vector<8x128xf32>
      %cst_15 = arith.constant 1.000000e+00 : f32
      %19 = vector.broadcast %cst_15 : f32 to vector<8x128xf32>
      %20 = arith.addf %19, %18 : vector<8x128xf32>
      %cst_16 = arith.constant 1.000000e+00 : f32
      %21 = vector.broadcast %cst_16 : f32 to vector<8x128xf32>
      %22 = arith.divf %21, %20 : vector<8x128xf32>
      %c0_17 = arith.constant 0 : index
      %c0_18 = arith.constant 0 : index
      %23 = vector.load %arg6[%c0_17, %c0_18] : memref<8x128xf32, #tpu.memory_space<vmem>>, vector<8x128xf32>
      tpu.vector_store %arg6[%c0_17, %c0_18], %22 {strides = array<i32>} : memref<8x128xf32, #tpu.memory_space<vmem>>, vector<8x128xf32>,
    } else {
    }
    return
  }
  func.func @transform_0(%arg0: i32, %arg1: i32, %arg2: i32) -> (i32, i32) {
    %c0_i32 = arith.constant 0 : i32
    return %arg0, %arg2 : i32, i32
  }
  func.func @transform_1(%arg0: i32, %arg1: i32, %arg2: i32) -> (i32, i32) {
    %c0_i32 = arith.constant 0 : i32
    return %arg2, %arg1 : i32, i32
  }
  func.func @transform_2(%arg0: i32, %arg1: i32, %arg2: i32) -> (i32, i32) {
    %c0_i32 = arith.constant 0 : i32
    %c0_i32_0 = arith.constant 0 : i32
    return %c0_i32, %arg1 : i32, i32
  }
  func.func @transform_3(%arg0: i32, %arg1: i32, %arg2: i32) -> (i32, i32) {
    %c0_i32 = arith.constant 0 : i32
    return %arg0, %arg1 : i32, i32
  }
}

module attributes {stable_mosaic.version = 11 : i64} {
  func.func @_conv_bn_lrelu_resident_kernel(%arg0: i32, %arg1: memref<2x2048xbf16, #tpu.memory_space<vmem>>, %arg2: memref<2048x128xbf16, #tpu.memory_space<vmem>>, %arg3: memref<1x128xf32, #tpu.memory_space<vmem>>, %arg4: memref<1x128xf32, #tpu.memory_space<vmem>>, %arg5: memref<2x128xbf16, #tpu.memory_space<vmem>>) attributes {dimension_semantics = [#tpu.dimension_semantics<parallel>], iteration_bounds = array<i64: 1>, scalar_prefetch = 0 : i64, scratch_operands = 0 : i64, tpu.core_type = #tpu.core_type<tc>, window_params = [{pipeline_mode = #tpu.pipeline_mode<synchronous>, transform_indices = @transform_0, window_bounds = array<i64: 2, 2048>}, {transform_indices = @transform_1, window_bounds = array<i64: 2048, 128>}, {transform_indices = @transform_2, window_bounds = array<i64: 1, 128>}, {transform_indices = @transform_3, window_bounds = array<i64: 1, 128>}, {transform_indices = @transform_4, window_bounds = array<i64: 2, 128>}]} {
    %c0 = arith.constant 0 : index
    %c0_0 = arith.constant 0 : index
    %0 = vector.load %arg1[%c0, %c0_0] : memref<2x2048xbf16, #tpu.memory_space<vmem>>, vector<2x2048xbf16>
    %c0_1 = arith.constant 0 : index
    %c0_2 = arith.constant 0 : index
    %1 = vector.load %arg2[%c0_1, %c0_2] : memref<2048x128xbf16, #tpu.memory_space<vmem>>, vector<2048x128xbf16>
    %cst = arith.constant dense<0.000000e+00> : vector<2x128xf32>
    %2 = tpu.matmul %0, %1, %cst {dimension_numbers = #tpu.dot_dimension_numbers<[1], [0], [0], [1], [0, 0, 1, 1], [], []>} : vector<2x2048xbf16>, vector<2048x128xbf16>, vector<2x128xf32> -> vector<2x128xf32>
    %cst_3 = arith.constant dense<0.000000e+00> : vector<128xf32>
    %3 = vector.multi_reduction <add>, %2, %cst_3 [0] : vector<2x128xf32> to vector<128xf32>
    %4 = vector.shape_cast %3 : vector<128xf32> to vector<1x128xf32>
    %cst_4 = arith.constant 2.000000e+00 : f32
    %5 = vector.broadcast %cst_4 : f32 to vector<1x128xf32>
    %6 = arith.divf %4, %5 : vector<1x128xf32>
    %7 = vector.broadcast %6 : vector<1x128xf32> to vector<2x128xf32>
    %8 = arith.subf %2, %7 : vector<2x128xf32>
    %9 = arith.mulf %8, %8 : vector<2x128xf32>
    %cst_5 = arith.constant dense<0.000000e+00> : vector<128xf32>
    %10 = vector.multi_reduction <add>, %9, %cst_5 [0] : vector<2x128xf32> to vector<128xf32>
    %11 = vector.shape_cast %10 : vector<128xf32> to vector<1x128xf32>
    %cst_6 = arith.constant 2.000000e+00 : f32
    %12 = vector.broadcast %cst_6 : f32 to vector<1x128xf32>
    %13 = arith.divf %11, %12 : vector<1x128xf32>
    %14 = vector.broadcast %6 : vector<1x128xf32> to vector<2x128xf32>
    %15 = arith.subf %2, %14 : vector<2x128xf32>
    %cst_7 = arith.constant 9.99999974E-6 : f32
    %16 = vector.broadcast %cst_7 : f32 to vector<1x128xf32>
    %17 = arith.addf %13, %16 : vector<1x128xf32>
    %18 = math.rsqrt %17 : vector<1x128xf32>
    %19 = vector.broadcast %18 : vector<1x128xf32> to vector<2x128xf32>
    %20 = arith.mulf %15, %19 : vector<2x128xf32>
    %c0_8 = arith.constant 0 : index
    %c0_9 = arith.constant 0 : index
    %21 = vector.load %arg3[%c0_8, %c0_9] : memref<1x128xf32, #tpu.memory_space<vmem>>, vector<1x128xf32>
    %22 = vector.broadcast %21 : vector<1x128xf32> to vector<2x128xf32>
    %23 = arith.mulf %20, %22 : vector<2x128xf32>
    %c0_10 = arith.constant 0 : index
    %c0_11 = arith.constant 0 : index
    %24 = vector.load %arg4[%c0_10, %c0_11] : memref<1x128xf32, #tpu.memory_space<vmem>>, vector<1x128xf32>
    %25 = vector.broadcast %24 : vector<1x128xf32> to vector<2x128xf32>
    %26 = arith.addf %23, %25 : vector<2x128xf32>
    %cst_12 = arith.constant 0.000000e+00 : f32
    %27 = vector.broadcast %cst_12 : f32 to vector<2x128xf32>
    %28 = arith.cmpf oge, %26, %27 : vector<2x128xf32>
    %cst_13 = arith.constant 2.000000e-01 : f32
    %29 = vector.broadcast %cst_13 : f32 to vector<2x128xf32>
    %30 = arith.mulf %29, %26 : vector<2x128xf32>
    %31 = arith.select %28, %26, %30 : vector<2x128xi1>, vector<2x128xf32>
    %32 = arith.truncf %31 : vector<2x128xf32> to vector<2x128xbf16>
    %c0_14 = arith.constant 0 : index
    %c0_15 = arith.constant 0 : index
    %33 = vector.load %arg5[%c0_14, %c0_15] : memref<2x128xbf16, #tpu.memory_space<vmem>>, vector<2x128xbf16>
    tpu.vector_store %arg5[%c0_14, %c0_15], %32 {strides = array<i32>} : memref<2x128xbf16, #tpu.memory_space<vmem>>, vector<2x128xbf16>,
    return
  }
  func.func @transform_0(%arg0: i32) -> (i32, i32) {
    %c0_i32 = arith.constant 0 : i32
    %c0_i32_0 = arith.constant 0 : i32
    %c0_i32_1 = arith.constant 0 : i32
    return %c0_i32, %c0_i32_0 : i32, i32
  }
  func.func @transform_1(%arg0: i32) -> (i32, i32) {
    %c0_i32 = arith.constant 0 : i32
    %c0_i32_0 = arith.constant 0 : i32
    return %c0_i32, %arg0 : i32, i32
  }
  func.func @transform_2(%arg0: i32) -> (i32, i32) {
    %c0_i32 = arith.constant 0 : i32
    %c0_i32_0 = arith.constant 0 : i32
    return %c0_i32, %arg0 : i32, i32
  }
  func.func @transform_3(%arg0: i32) -> (i32, i32) {
    %c0_i32 = arith.constant 0 : i32
    %c0_i32_0 = arith.constant 0 : i32
    return %c0_i32, %arg0 : i32, i32
  }
  func.func @transform_4(%arg0: i32) -> (i32, i32) {
    %c0_i32 = arith.constant 0 : i32
    %c0_i32_0 = arith.constant 0 : i32
    return %c0_i32, %arg0 : i32, i32
  }
}

</mosaic_0001>

<bundles_post_ra>
// kernel: discriminator_forward.5
= control target key start
LH: loop header
LB: loop body
LE: loop exit
PB: predicated region body
PF: predicated region fallthrough
CT: control target
= control target key end

     0   :  { %s719_s1 = inlined_call_operand.vmem [shape: bf16[128,128], index: 1, kind: input, shape index: {}]   ;;  %s720_s0 = inlined_call_operand.vmem [shape: bf16[128,128], index: 0, kind: input, shape index: {}]   ;;  %s721_s2 = inlined_call_operand.vmem [shape: bf16[128,128], index: 2, kind: output, shape index: {}]  }
   0x1   :  { %v615_v0 = vld [vmem:[%s719_s1] sm:$0xff]   ;;  %v616_v1 = vld [vmem:[%s719_s1 + $0x8] sm:$0xff]   ;;  %v617_v2 = vld [vmem:[%s719_s1 + $0x10] sm:$0xff]  }
   0x2   :  { %567 = vmatprep.subr.bf16.mxu0 %v615_v0  ;;  %599 = vmatprep.subr.bf16.mxu1 %v615_v0  ;;  %v618_v3 = vld [vmem:[%s719_s1 + $0x18] sm:$0xff]   ;;  %v623_v4 = vld [vmem:[%s720_s0] sm:$0xff]   ;;  %v620_v7 = vld [vmem:[%s719_s1 + $0x28] sm:$0xff]  }
   0x3   :  { %568 = vmatpush3.bf16.msra.mxu0 %v615_v0  ;;  %607 = vmatpush3.bf16.msra.mxu1 %v615_v0  ;;  %v624_v5 = vld [vmem:[%s720_s0 + $0x20] sm:$0xff]   ;;  %v621_v8 = vld [vmem:[%s719_s1 + $0x30] sm:$0xff]   ;;  %v622_v9 = vld [vmem:[%s719_s1 + $0x38] sm:$0xff]  }
   0x4   :  { %569 = vmatprep.subr.bf16.mxu0 %v616_v1  ;;  %600 = vmatprep.subr.bf16.mxu1 %v616_v1  ;;  %v619_v6 = vld [vmem:[%s719_s1 + $0x20] sm:$0xff]   ;;  %v625_v10 = vld [vmem:[%s720_s0 + $0x8] sm:$0xff]   ;;  %v627_v12 = vld [vmem:[%s720_s0 + $0x10] sm:$0xff]  }
   0x5   :  { %583 = vmatprep.mubr.bf16.mxu0 %v623_v4  ;;  %591 = vmatprep.mubr.bf16.mxu1 %v624_v5  ;;  %v626_v11 = vld [vmem:[%s720_s0 + $0x28] sm:$0xff]   ;;  %v628_v13 = vld [vmem:[%s720_s0 + $0x30] sm:$0xff]   ;;  %v629_v14 = vld [vmem:[%s720_s0 + $0x18] sm:$0xff]  }
   0x6   :  { %v630_v15 = vld [vmem:[%s720_s0 + $0x38] sm:$0xff]  }
   0x7   :  { %570 = vmatpush3.bf16.msra.mxu0 %v616_v1  ;;  %608 = vmatpush3.bf16.msra.mxu1 %v616_v1 }
   0x8   :  { %571 = vmatprep.subr.bf16.mxu0 %v617_v2  ;;  %601 = vmatprep.subr.bf16.mxu1 %v617_v2 }
   0xb   :  { %572 = vmatpush3.bf16.msra.mxu0 %v617_v2  ;;  %609 = vmatpush3.bf16.msra.mxu1 %v617_v2 }
   0xc   :  { %573 = vmatprep.subr.bf16.mxu0 %v618_v3  ;;  %602 = vmatprep.subr.bf16.mxu1 %v618_v3 }
   0xf   :  { %574 = vmatpush3.bf16.msra.mxu0 %v618_v3  ;;  %610 = vmatpush3.bf16.msra.mxu1 %v618_v3 }
  0x10   :  { %575 = vmatprep.subr.bf16.mxu0 %v619_v6  ;;  %603 = vmatprep.subr.bf16.mxu1 %v619_v6 }
  0x13   :  { %576 = vmatpush3.bf16.msra.mxu0 %v619_v6  ;;  %611 = vmatpush3.bf16.msra.mxu1 %v619_v6 }
  0x14   :  { %577 = vmatprep.subr.bf16.mxu0 %v620_v7  ;;  %604 = vmatprep.subr.bf16.mxu1 %v620_v7 }
  0x17   :  { %578 = vmatpush3.bf16.msra.mxu0 %v620_v7  ;;  %612 = vmatpush3.bf16.msra.mxu1 %v620_v7 }
  0x18   :  { %579 = vmatprep.subr.bf16.mxu0 %v621_v8  ;;  %605 = vmatprep.subr.bf16.mxu1 %v621_v8 }
  0x1b   :  { %580 = vmatpush3.bf16.msra.mxu0 %v621_v8  ;;  %613 = vmatpush3.bf16.msra.mxu1 %v621_v8 }
  0x1c   :  { %581 = vmatprep.subr.bf16.mxu0 %v622_v9  ;;  %606 = vmatprep.subr.bf16.mxu1 %v622_v9 }
  0x1f   :  { %582 = vmatpush3.bf16.msra.mxu0 %v622_v9  ;;  %614 = vmatpush3.bf16.msra.mxu1 %v622_v9 }
  0x22   :  { %584 = vmatmul.mubr.bf16.vlgmr.msra.gmra.mrb[0].mxu0 %v625_v10  ;;  %592 = vmatmul.mubr.bf16.vlgmr.msra.gmra.mrb[0].mxu1 %v626_v11 }
  0x23   :  { %587 = vmatprep.mubr.bf16.mxu0 %v627_v12  ;;  %595 = vmatprep.mubr.bf16.mxu1 %v628_v13 }
  0x2a   :  { %588 = vmatmul.mubr.bf16.gmra.mrb[4].mxu0 %v629_v14  ;;  %596 = vmatmul.mubr.bf16.gmra.mrb[4].mxu1 %v630_v15 }
  0xf5   :  { %v585_v16 = vpop.f32.mrb[0].mxu0  ;;  %v593_v17 = vpop.f32.mrb[0].mxu1 }
  0xf6   :  { %vm326_vm0 = vcmp.ge.f32.partialorder %v585_v16, 0.0  ;;  %v342_v18 = vmul.f32 0.2, %v585_v16  ;;  %v350_v19 = vmul.f32 0.2, %v593_v17  ;;  %vm334_vm1 = vcmp.ge.f32.partialorder %v593_v17, 0.0 }
  0xf7   :  { %v210_v20 = vpop.f32.mrb[1].mxu0  ;;  %v242_v21 = vpop.f32.mrb[1].mxu1 }
  0xf8   :  { %v340_v22 = vmul.f32 0.2, %v210_v20  ;;  %v586_v23 = vpop.f32.mrb[2].mxu0  ;;  %v594_v24 = vpop.f32.mrb[2].mxu1  ;;  %v358_v25 = vsel %vm326_vm0, %v585_v16, %v342_v18  ;;  %v348_v26 = vmul.f32 0.2, %v242_v21  ;;  %v366_v28 = vsel %vm334_vm1, %v593_v17, %v350_v19 }
  0xf9   :  { %vm327_vm2 = vcmp.ge.f32.partialorder %v586_v23, 0.0  ;;  %v343_v27 = vmul.f32 0.2, %v586_v23  ;;  %vm324_vm3 = vcmp.ge.f32.partialorder %v210_v20, 0.0  ;;  %vm335_vm4 = vcmp.ge.f32.partialorder %v594_v24, 0.0  ;;  %v213_v30 = vpop.f32.mrb[3].mxu0 }
  0xfa   :  { %v351_v29 = vmul.f32 0.2, %v594_v24  ;;  %v245_v31 = vpop.f32.mrb[3].mxu1  ;;  %vm332_vm5 = vcmp.ge.f32.partialorder %v242_v21, 0.0  ;;  %vm325_vm6 = vcmp.ge.f32.partialorder %v213_v30, 0.0  ;;  %v356_v37 = vsel %vm324_vm3, %v210_v20, %v340_v22 }
  0xfb   :  { %v359_v32 = vsel %vm327_vm2, %v586_v23, %v343_v27  ;;  %v341_v33 = vmul.f32 0.2, %v213_v30  ;;  %vm333_vm7 = vcmp.ge.f32.partialorder %v245_v31, 0.0  ;;  %v349_v36 = vmul.f32 0.2, %v245_v31 }
  0xfc   :  { %v512_v34 = vpack.c.bf16 %v359_v32, %v358_v25  ;;  %v367_v35 = vsel %vm335_vm4, %v594_v24, %v351_v29  ;;  %v364_v42 = vsel %vm332_vm5, %v242_v21, %v348_v26 }
  0xfd   :  { %v532_v38 = vpack.c.bf16 %v367_v35, %v366_v28  ;;  %v357_v39 = vsel %vm325_vm6, %v213_v30, %v341_v33  ;;  %v589_v40 = vpop.f32.mrb[4].mxu0  ;;  %v597_v41 = vpop.f32.mrb[4].mxu1  ;;  %v365_v44 = vsel %vm333_vm7, %v245_v31, %v349_v36 }
  0xfe   :  { %544 = vst [vmem:[%s721_s2 + $0x8] sm:$0xff] %v512_v34   ;;  %v507_v43 = vpack.c.bf16 %v357_v39, %v356_v37  ;;  %v346_v45 = vmul.f32 0.2, %v589_v40  ;;  %v226_v46 = vpop.f32.mrb[5].mxu0  ;;  %v258_v47 = vpop.f32.mrb[5].mxu1  ;;  %v527_v48 = vpack.c.bf16 %v365_v44, %v364_v42  ;;  %vm330_vm8 = vcmp.ge.f32.partialorder %v589_v40, 0.0 }
  0xff   :  { %548 = vst [vmem:[%s721_s2 + $0x28] sm:$0xff] %v532_v38   ;;  %v354_v49 = vmul.f32 0.2, %v597_v41  ;;  %v590_v50 = vpop.f32.mrb[6].mxu0  ;;  %v598_v51 = vpop.f32.mrb[6].mxu1  ;;  %vm338_vm9 = vcmp.ge.f32.partialorder %v597_v41, 0.0 }
 0x100   :  { %508 = vst [vmem:[%s721_s2] sm:$0xff] %v507_v43   ;;  %v344_v52 = vmul.f32 0.2, %v226_v46  ;;  %v352_v53 = vmul.f32 0.2, %v258_v47  ;;  %v229_v54 = vpop.f32.mrb[7].mxu0  ;;  %547 = vst [vmem:[%s721_s2 + $0x20] sm:$0xff] %v527_v48   ;;  %v362_v57 = vsel %vm330_vm8, %v589_v40, %v346_v45 }
 0x101   :  { %vm328_vm10 = vcmp.ge.f32.partialorder %v226_v46, 0.0  ;;  %vm331_vm11 = vcmp.ge.f32.partialorder %v590_v50, 0.0  ;;  %v347_v55 = vmul.f32 0.2, %v590_v50  ;;  %vm339_vm12 = vcmp.ge.f32.partialorder %v598_v51, 0.0  ;;  %v261_v56 = vpop.f32.mrb[7].mxu1 }
 0x102   :  { %vm336_vm13 = vcmp.ge.f32.partialorder %v258_v47, 0.0  ;;  %v355_v58 = vmul.f32 0.2, %v598_v51  ;;  %vm329_vm14 = vcmp.ge.f32.partialorder %v229_v54, 0.0  ;;  %v345_v60 = vmul.f32 0.2, %v229_v54 }
 0x103   :  { %v363_v59 = vsel %vm331_vm11, %v590_v50, %v347_v55  ;;  %vm337_vm15 = vcmp.ge.f32.partialorder %v261_v56, 0.0  ;;  %v353_v61 = vmul.f32 0.2, %v261_v56  ;;  %v370_v62 = vsel %vm338_vm9, %v597_v41, %v354_v49 }
 0x104   :  { %v360_v63 = vsel %vm328_vm10, %v226_v46, %v344_v52  ;;  %v522_v0 = vpack.c.bf16 %v363_v59, %v362_v57  ;;  %v371_v1 = vsel %vm339_vm12, %v598_v51, %v355_v58  ;;  %v368_v2 = vsel %vm336_vm13, %v258_v47, %v352_v53 }
 0x105   :  { %v542_v3 = vpack.c.bf16 %v371_v1, %v370_v62  ;;  %v361_v4 = vsel %vm329_vm14, %v229_v54, %v345_v60  ;;  %v369_v5 = vsel %vm337_vm15, %v261_v56, %v353_v61 }
 0x106   :  { %546 = vst [vmem:[%s721_s2 + $0x18] sm:$0xff] %v522_v0   ;;  %v517_v6 = vpack.c.bf16 %v361_v4, %v360_v63  ;;  %v537_v7 = vpack.c.bf16 %v369_v5, %v368_v2 }
 0x107   :  { %550 = vst [vmem:[%s721_s2 + $0x38] sm:$0xff] %v542_v3  }
 0x108   :  { %545 = vst [vmem:[%s721_s2 + $0x10] sm:$0xff] %v517_v6   ;;  %549 = vst [vmem:[%s721_s2 + $0x30] sm:$0xff] %v537_v7  }

// kernel: discriminator_forward.6
= control target key start
LH: loop header
LB: loop body
LE: loop exit
PB: predicated region body
PF: predicated region fallthrough
CT: control target
= control target key end

     0   :  { %s2771_s1 = inlined_call_operand.vmem [shape: bf16[2048,128], index: 1, kind: input, shape index: {}]   ;;  %s2772_s0 = inlined_call_operand.vmem [shape: bf16[32,2048], index: 0, kind: input, shape index: {}]   ;;  %s2773_s2 = inlined_call_operand.vmem [shape: f32[1,128], index: 2, kind: input, shape index: {}]   ;;  %s2774_s3 = inlined_call_operand.vmem [shape: f32[1,128], index: 3, kind: input, shape index: {}]   ;;  %s2775_s4 = inlined_call_operand.vmem [shape: bf16[32,128], index: 4, kind: output, shape index: {}]  }
   0x1   :  { %v2124_v0 = vld [vmem:[%s2771_s1 + $0x40] sm:$0xff]   ;;  %v2128_v4 = vld [vmem:[%s2771_s1 + $0x48] sm:$0xff]   ;;  %v2132_v8 = vld [vmem:[%s2771_s1 + $0x50] sm:$0xff]  }
   0x2   :  { %v2125_v1 = vld [vmem:[%s2771_s1 + $0xc0] sm:$0xff]   ;;  %1900 = vmatprep.subr.bf16.mxu0 %v2124_v0  ;;  %v2129_v5 = vld [vmem:[%s2771_s1 + $0xc8] sm:$0xff]   ;;  %v2133_v9 = vld [vmem:[%s2771_s1 + $0xd0] sm:$0xff]  }
   0x3   :  { %v2126_v2 = vld [vmem:[%s2771_s1] sm:$0xff]   ;;  %1928 = vmatprep.subr.bf16.mxu1 %v2125_v1  ;;  %v2130_v6 = vld [vmem:[%s2771_s1 + $0x8] sm:$0xff]   ;;  %v2134_v10 = vld [vmem:[%s2771_s1 + $0x10] sm:$0xff]  }
   0x4   :  { %v2127_v3 = vld [vmem:[%s2771_s1 + $0x80] sm:$0xff]   ;;  %1901 = vmatpush3.bf16.msra.mxu0 %v2126_v2  ;;  %v2131_v7 = vld [vmem:[%s2771_s1 + $0x88] sm:$0xff]   ;;  %v2135_v11 = vld [vmem:[%s2771_s1 + $0x90] sm:$0xff]  }
   0x5   :  { %1929 = vmatpush3.bf16.msra.mxu1 %v2127_v3  ;;  %1902 = vmatprep.subr.bf16.mxu0 %v2128_v4  ;;  %v2136_v12 = vld [vmem:[%s2771_s1 + $0x58] sm:$0xff]   ;;  %v2140_v16 = vld [vmem:[%s2771_s1 + $0x60] sm:$0xff]   ;;  %v2144_v20 = vld [vmem:[%s2771_s1 + $0x68] sm:$0xff]  }
   0x6   :  { %1930 = vmatprep.subr.bf16.mxu1 %v2129_v5  ;;  %v2137_v13 = vld [vmem:[%s2771_s1 + $0xd8] sm:$0xff]   ;;  %v2141_v17 = vld [vmem:[%s2771_s1 + $0xe0] sm:$0xff]   ;;  %v2145_v21 = vld [vmem:[%s2771_s1 + $0xe8] sm:$0xff]  }
   0x7   :  { %v2138_v14 = vld [vmem:[%s2771_s1 + $0x18] sm:$0xff]   ;;  %v2142_v18 = vld [vmem:[%s2771_s1 + $0x20] sm:$0xff]   ;;  %v2146_v22 = vld [vmem:[%s2771_s1 + $0x28] sm:$0xff]  }
   0x8   :  { %1903 = vmatpush3.bf16.msra.mxu0 %v2130_v6  ;;  %v2139_v15 = vld [vmem:[%s2771_s1 + $0x98] sm:$0xff]   ;;  %v2143_v19 = vld [vmem:[%s2771_s1 + $0xa0] sm:$0xff]   ;;  %v2147_v23 = vld [vmem:[%s2771_s1 + $0xa8] sm:$0xff]  }
   0x9   :  { %1931 = vmatpush3.bf16.msra.mxu1 %v2131_v7  ;;  %1904 = vmatprep.subr.bf16.mxu0 %v2132_v8  ;;  %v2148_v24 = vld [vmem:[%s2771_s1 + $0x70] sm:$0xff]   ;;  %v2152_v28 = vld [vmem:[%s2771_s1 + $0x78] sm:$0xff]   ;;  %v18_v32 = vld [vmem:[%s2772_s0] sm:$0xff] }
   0xa   :  { %1932 = vmatprep.subr.bf16.mxu1 %v2133_v9  ;;  %v2149_v25 = vld [vmem:[%s2771_s1 + $0xf0] sm:$0xff]   ;;  %v2153_v29 = vld [vmem:[%s2771_s1 + $0xf8] sm:$0xff]   ;;  %v26_v33 = vld [vmem:[%s2772_s0 + $0x40] sm:$0xff] }
   0xb   :  { %v2150_v26 = vld [vmem:[%s2771_s1 + $0x30] sm:$0xff]   ;;  %v2154_v30 = vld [vmem:[%s2771_s1 + $0x38] sm:$0xff]   ;;  %v19_v34 = vld [vmem:[%s2772_s0 + $0x8] sm:$0xff]  ;;  %v1719_v35 = vcombine.low %v18_v32, %v26_v33  ;;  %v1720_v36 = vcombine.high %v18_v32, %v26_v33 }
   0xc   :  { %1905 = vmatpush3.bf16.msra.mxu0 %v2134_v10  ;;  %v2151_v27 = vld [vmem:[%s2771_s1 + $0xb0] sm:$0xff]   ;;  %v2155_v31 = vld [vmem:[%s2771_s1 + $0xb8] sm:$0xff]   ;;  %v27_v37 = vld [vmem:[%s2772_s0 + $0x48] sm:$0xff] }
   0xd   :  { %1933 = vmatpush3.bf16.msra.mxu1 %v2135_v11  ;;  %1906 = vmatprep.subr.bf16.mxu0 %v2136_v12  ;;  %v1721_v38 = vcombine.low %v19_v34, %v27_v37  ;;  %v1722_v39 = vcombine.high %v19_v34, %v27_v37  ;;  %v2156_v40 = vld [vmem:[%s2771_s1 + $0x140] sm:$0xff]   ;;  %v2160_v44 = vld [vmem:[%s2771_s1 + $0x148] sm:$0xff]   ;;  %v2164_v48 = vld [vmem:[%s2771_s1 + $0x150] sm:$0xff]  }
   0xe   :  { %1934 = vmatprep.subr.bf16.mxu1 %v2137_v13  ;;  %1266 = vmatprep.mubr.bf16.mxu0 %v1720_v36  ;;  %v2157_v41 = vld [vmem:[%s2771_s1 + $0x1c0] sm:$0xff]   ;;  %v2161_v45 = vld [vmem:[%s2771_s1 + $0x1c8] sm:$0xff]   ;;  %v2165_v49 = vld [vmem:[%s2771_s1 + $0x1d0] sm:$0xff]  }
   0xf   :  { %1315 = vmatprep.mubr.bf16.mxu1 %v1722_v39  ;;  %v2158_v42 = vld [vmem:[%s2771_s1 + $0x100] sm:$0xff]   ;;  %v2162_v46 = vld [vmem:[%s2771_s1 + $0x108] sm:$0xff]   ;;  %v2166_v50 = vld [vmem:[%s2771_s1 + $0x110] sm:$0xff]  }
  0x10   :  { %1907 = vmatpush3.bf16.msra.mxu0 %v2138_v14  ;;  %v2159_v43 = vld [vmem:[%s2771_s1 + $0x180] sm:$0xff]   ;;  %v2163_v47 = vld [vmem:[%s2771_s1 + $0x188] sm:$0xff]   ;;  %v2167_v51 = vld [vmem:[%s2771_s1 + $0x190] sm:$0xff]  }
  0x11   :  { %1935 = vmatpush3.bf16.msra.mxu1 %v2139_v15  ;;  %1908 = vmatprep.subr.bf16.mxu0 %v2140_v16  ;;  %v2168_v52 = vld [vmem:[%s2771_s1 + $0x158] sm:$0xff]   ;;  %v2172_v56 = vld [vmem:[%s2771_s1 + $0x160] sm:$0xff]   ;;  %v2176_v60 = vld [vmem:[%s2771_s1 + $0x168] sm:$0xff]  }
  0x12   :  { %1936 = vmatprep.subr.bf16.mxu1 %v2141_v17  ;;  %v2169_v53 = vld [vmem:[%s2771_s1 + $0x1d8] sm:$0xff]   ;;  %v2173_v57 = vld [vmem:[%s2771_s1 + $0x1e0] sm:$0xff]   ;;  %v2177_v61 = vld [vmem:[%s2771_s1 + $0x1e8] sm:$0xff]  }
  0x13   :  { %v2170_v54 = vld [vmem:[%s2771_s1 + $0x118] sm:$0xff]   ;;  %v2174_v58 = vld [vmem:[%s2771_s1 + $0x120] sm:$0xff]   ;;  %v35_v1 = vld [vmem:[%s2772_s0 + $0x88] sm:$0xff] }
  0x14   :  { %1909 = vmatpush3.bf16.msra.mxu0 %v2142_v18  ;;  %v2171_v55 = vld [vmem:[%s2771_s1 + $0x198] sm:$0xff]   ;;  %v2175_v59 = vld [vmem:[%s2771_s1 + $0x1a0] sm:$0xff]   ;;  %v43_v2 = vld [vmem:[%s2772_s0 + $0xc8] sm:$0xff] }
  0x15   :  { %1937 = vmatpush3.bf16.msra.mxu1 %v2143_v19  ;;  %1910 = vmatprep.subr.bf16.mxu0 %v2144_v20  ;;  %v34_v62 = vld [vmem:[%s2772_s0 + $0x80] sm:$0xff]  ;;  %v1738_v4 = vcombine.high %v35_v1, %v43_v2  ;;  %v2178_v5 = vld [vmem:[%s2771_s1 + $0x128] sm:$0xff]   ;;  %v1737_v6 = vcombine.low %v35_v1, %v43_v2  ;;  %v2180_v8 = vld [vmem:[%s2771_s1 + $0x170] sm:$0xff]  }
  0x16   :  { %1938 = vmatprep.subr.bf16.mxu1 %v2145_v21  ;;  %v42_v63 = vld [vmem:[%s2772_s0 + $0xc0] sm:$0xff]  ;;  %v2179_v7 = vld [vmem:[%s2771_s1 + $0x1a8] sm:$0xff]   ;;  %v2181_v9 = vld [vmem:[%s2771_s1 + $0x1f0] sm:$0xff]  }
  0x17   :  { %v1736_v0 = vcombine.high %v34_v62, %v42_v63  ;;  %v1735_v3 = vcombine.low %v34_v62, %v42_v63  ;;  %v2182_v10 = vld [vmem:[%s2771_s1 + $0x130] sm:$0xff]   ;;  %v2184_v12 = vld [vmem:[%s2771_s1 + $0x178] sm:$0xff]   ;;  %v30_v1 = vld [vmem:[%s2772_s0 + $0x60] sm:$0xff] }
  0x18   :  { %1911 = vmatpush3.bf16.msra.mxu0 %v2146_v22  ;;  %v2183_v11 = vld [vmem:[%s2771_s1 + $0x1b0] sm:$0xff]   ;;  %v2185_v13 = vld [vmem:[%s2771_s1 + $0x1f8] sm:$0xff]  }
  0x19   :  { %1939 = vmatpush3.bf16.msra.mxu1 %v2147_v23  ;;  %1912 = vmatprep.subr.bf16.mxu0 %v2148_v24  ;;  %v2186_v14 = vld [vmem:[%s2771_s1 + $0x138] sm:$0xff]   ;;  %v20_v16 = vld [vmem:[%s2772_s0 + $0x10] sm:$0xff]  ;;  %v2188_v24 = vld [vmem:[%s2771_s1 + $0x240] sm:$0xff]  }
  0x1a   :  { %1940 = vmatprep.subr.bf16.mxu1 %v2149_v25  ;;  %v2187_v15 = vld [vmem:[%s2771_s1 + $0x1b8] sm:$0xff]   ;;  %v28_v17 = vld [vmem:[%s2772_s0 + $0x50] sm:$0xff]  ;;  %v2189_v25 = vld [vmem:[%s2771_s1 + $0x2c0] sm:$0xff]  }
  0x1b   :  { %v21_v18 = vld [vmem:[%s2772_s0 + $0x18] sm:$0xff]  ;;  %v1723_v20 = vcombine.low %v20_v16, %v28_v17  ;;  %v1724_v21 = vcombine.high %v20_v16, %v28_v17  ;;  %v36_v32 = vld [vmem:[%s2772_s0 + $0x90] sm:$0xff]  ;;  %v38_v16 = vld [vmem:[%s2772_s0 + $0xa0] sm:$0xff] }
  0x1c   :  { %1913 = vmatpush3.bf16.msra.mxu0 %v2150_v26  ;;  %v29_v19 = vld [vmem:[%s2772_s0 + $0x58] sm:$0xff]  ;;  %v2190_v26 = vld [vmem:[%s2771_s1 + $0x200] sm:$0xff]   ;;  %v44_v33 = vld [vmem:[%s2772_s0 + $0xd0] sm:$0xff] }
  0x1d   :  { %1941 = vmatpush3.bf16.msra.mxu1 %v2151_v27  ;;  %1914 = vmatprep.subr.bf16.mxu0 %v2152_v28  ;;  %v1725_v22 = vcombine.low %v21_v18, %v29_v19  ;;  %v1726_v23 = vcombine.high %v21_v18, %v29_v19  ;;  %v2191_v27 = vld [vmem:[%s2771_s1 + $0x280] sm:$0xff]   ;;  %v2192_v28 = vld [vmem:[%s2771_s1 + $0x248] sm:$0xff]   ;;  %v1740_v34 = vcombine.high %v36_v32, %v44_v33  ;;  %v2196_v36 = vld [vmem:[%s2771_s1 + $0x250] sm:$0xff]  }
  0x1e   :  { %1942 = vmatprep.subr.bf16.mxu1 %v2153_v29  ;;  %v2193_v29 = vld [vmem:[%s2771_s1 + $0x2c8] sm:$0xff]   ;;  %v2197_v37 = vld [vmem:[%s2771_s1 + $0x2d0] sm:$0xff]   ;;  %v45_v39 = vld [vmem:[%s2772_s0 + $0xd8] sm:$0xff] }
  0x1f   :  { %v2218_v62 = vld [vmem:[%s2771_s1 + $0x238] sm:$0xff]   ;;  %v46_v17 = vld [vmem:[%s2772_s0 + $0xe0] sm:$0xff] }
  0x20   :  { %1915 = vmatpush3.bf16.msra.mxu0 %v2154_v30  ;;  %v2194_v30 = vld [vmem:[%s2771_s1 + $0x208] sm:$0xff]   ;;  %v2219_v63 = vld [vmem:[%s2771_s1 + $0x2b8] sm:$0xff]   ;;  %v1744_v18 = vcombine.high %v38_v16, %v46_v17  ;;  %v1743_v19 = vcombine.low %v38_v16, %v46_v17 }
  0x21   :  { %1943 = vmatpush3.bf16.msra.mxu1 %v2155_v31  ;;  %1956 = vmatprep.subr.bf16.mxu0 %v2156_v40  ;;  %v2195_v31 = vld [vmem:[%s2771_s1 + $0x288] sm:$0xff]  }
  0x22   :  { %1984 = vmatprep.subr.bf16.mxu1 %v2157_v41  ;;  %v2198_v41 = vld [vmem:[%s2771_s1 + $0x210] sm:$0xff]  }
  0x23   :  { %1267 = vmatmul.mubr.bf16.vlgmr.msra.gmra.mrb[0].mxu0 %v1719_v35  ;;  %v1739_v35 = vcombine.low %v36_v32, %v44_v33  ;;  %v2236_v32 = vld [vmem:[%s2771_s1 + $0x360] sm:$0xff]  }
  0x24   :  { %1316 = vmatmul.mubr.bf16.vlgmr.msra.gmra.mrb[0].mxu1 %v1721_v38  ;;  %1957 = vmatpush3.bf16.msra.mxu0 %v2158_v42  ;;  %v37_v38 = vld [vmem:[%s2772_s0 + $0x98] sm:$0xff]  ;;  %v2237_v33 = vld [vmem:[%s2771_s1 + $0x3e0] sm:$0xff]  }
  0x25   :  { %1985 = vmatpush3.bf16.msra.mxu1 %v2159_v43  ;;  %1958 = vmatprep.subr.bf16.mxu0 %v2160_v44  ;;  %v1742_v40 = vcombine.high %v37_v38, %v45_v39  ;;  %v1741_v42 = vcombine.low %v37_v38, %v45_v39  ;;  %v2199_v43 = vld [vmem:[%s2771_s1 + $0x290] sm:$0xff]   ;;  %v2200_v44 = vld [vmem:[%s2771_s1 + $0x258] sm:$0xff]   ;;  %v2242_v38 = vld [vmem:[%s2771_s1 + $0x328] sm:$0xff]  }
  0x26   :  { %1986 = vmatprep.subr.bf16.mxu1 %v2161_v45  ;;  %1274 = vmatprep.mubr.bf16.mxu0 %v1736_v0  ;;  %v2201_v45 = vld [vmem:[%s2771_s1 + $0x2d8] sm:$0xff]   ;;  %v22_v0 = vld [vmem:[%s2772_s0 + $0x20] sm:$0xff]  ;;  %v2243_v39 = vld [vmem:[%s2771_s1 + $0x3a8] sm:$0xff]  }
  0x27   :  { %1323 = vmatprep.mubr.bf16.mxu1 %v1738_v4  ;;  %v1727_v2 = vcombine.low %v22_v0, %v30_v1  ;;  %v23_v4 = vld [vmem:[%s2772_s0 + $0x28] sm:$0xff] }
  0x28   :  { %1959 = vmatpush3.bf16.msra.mxu0 %v2162_v46  ;;  %v2202_v46 = vld [vmem:[%s2771_s1 + $0x218] sm:$0xff]  }
  0x29   :  { %1987 = vmatpush3.bf16.msra.mxu1 %v2163_v47  ;;  %1960 = vmatprep.subr.bf16.mxu0 %v2164_v48  ;;  %v2203_v47 = vld [vmem:[%s2771_s1 + $0x298] sm:$0xff]   ;;  %v2204_v48 = vld [vmem:[%s2771_s1 + $0x260] sm:$0xff]  }
  0x2a   :  { %1988 = vmatprep.subr.bf16.mxu1 %v2165_v49  ;;  %v2205_v49 = vld [vmem:[%s2771_s1 + $0x2e0] sm:$0xff]  }
  0x2b   :  { %1275 = vmatmul.mubr.bf16.gmra.mrb[4].mxu0 %v1735_v3  ;;  %v1728_v3 = vcombine.high %v22_v0, %v30_v1 }
  0x2c   :  { %1961 = vmatpush3.bf16.msra.mxu0 %v2166_v50  ;;  %1324 = vmatmul.mubr.bf16.gmra.mrb[4].mxu1 %v1737_v6  ;;  %v2206_v50 = vld [vmem:[%s2771_s1 + $0x220] sm:$0xff]  }
  0x2d   :  { %1989 = vmatpush3.bf16.msra.mxu1 %v2167_v51  ;;  %1962 = vmatprep.subr.bf16.mxu0 %v2168_v52  ;;  %v2207_v51 = vld [vmem:[%s2771_s1 + $0x2a0] sm:$0xff]   ;;  %v2208_v52 = vld [vmem:[%s2771_s1 + $0x268] sm:$0xff]  }
  0x2e   :  { %1990 = vmatprep.subr.bf16.mxu1 %v2169_v53  ;;  %1364 = vmatprep.mubr.bf16.mxu0 %v1724_v21  ;;  %v2209_v53 = vld [vmem:[%s2771_s1 + $0x2e8] sm:$0xff]   ;;  %v2229_v21 = vld [vmem:[%s2771_s1 + $0x3d0] sm:$0xff]  }
  0x2f   :  { %1413 = vmatprep.mubr.bf16.mxu1 %v1726_v23  ;;  %v47_v23 = vld [vmem:[%s2772_s0 + $0xe8] sm:$0xff] }
  0x30   :  { %1963 = vmatpush3.bf16.msra.mxu0 %v2170_v54  ;;  %v2210_v54 = vld [vmem:[%s2771_s1 + $0x228] sm:$0xff]  }
  0x31   :  { %1991 = vmatpush3.bf16.msra.mxu1 %v2171_v55  ;;  %1964 = vmatprep.subr.bf16.mxu0 %v2172_v56  ;;  %v2211_v55 = vld [vmem:[%s2771_s1 + $0x2a8] sm:$0xff]   ;;  %v2212_v56 = vld [vmem:[%s2771_s1 + $0x270] sm:$0xff]  }
  0x32   :  { %1992 = vmatprep.subr.bf16.mxu1 %v2173_v57  ;;  %v2213_v57 = vld [vmem:[%s2771_s1 + $0x2f0] sm:$0xff]  }
  0x34   :  { %1965 = vmatpush3.bf16.msra.mxu0 %v2174_v58  ;;  %v2214_v58 = vld [vmem:[%s2771_s1 + $0x230] sm:$0xff]  }
  0x35   :  { %1993 = vmatpush3.bf16.msra.mxu1 %v2175_v59  ;;  %1966 = vmatprep.subr.bf16.mxu0 %v2176_v60  ;;  %v2215_v59 = vld [vmem:[%s2771_s1 + $0x2b0] sm:$0xff]   ;;  %v2216_v60 = vld [vmem:[%s2771_s1 + $0x278] sm:$0xff]  }
  0x36   :  { %1994 = vmatprep.subr.bf16.mxu1 %v2177_v61  ;;  %v2217_v61 = vld [vmem:[%s2771_s1 + $0x2f8] sm:$0xff]  }
  0x38   :  { %1967 = vmatpush3.bf16.msra.mxu0 %v2178_v5  ;;  %v31_v5 = vld [vmem:[%s2772_s0 + $0x68] sm:$0xff] }
  0x39   :  { %1995 = vmatpush3.bf16.msra.mxu1 %v2179_v7  ;;  %1968 = vmatprep.subr.bf16.mxu0 %v2180_v8  ;;  %v1729_v6 = vcombine.low %v23_v4, %v31_v5  ;;  %v1730_v7 = vcombine.high %v23_v4, %v31_v5  ;;  %v2220_v8 = vld [vmem:[%s2771_s1 + $0x340] sm:$0xff]  }
  0x3a   :  { %1996 = vmatprep.subr.bf16.mxu1 %v2181_v9  ;;  %v2221_v9 = vld [vmem:[%s2771_s1 + $0x3c0] sm:$0xff]  }
  0x3c   :  { %1969 = vmatpush3.bf16.msra.mxu0 %v2182_v10  ;;  %v2222_v10 = vld [vmem:[%s2771_s1 + $0x300] sm:$0xff]  }
  0x3d   :  { %1997 = vmatpush3.bf16.msra.mxu1 %v2183_v11  ;;  %1970 = vmatprep.subr.bf16.mxu0 %v2184_v12  ;;  %v2223_v11 = vld [vmem:[%s2771_s1 + $0x380] sm:$0xff]   ;;  %v2224_v12 = vld [vmem:[%s2771_s1 + $0x348] sm:$0xff]  }
  0x3e   :  { %1998 = vmatprep.subr.bf16.mxu1 %v2185_v13  ;;  %v2225_v13 = vld [vmem:[%s2771_s1 + $0x3c8] sm:$0xff]  }
  0x40   :  { %1971 = vmatpush3.bf16.msra.mxu0 %v2186_v14  ;;  %v2226_v14 = vld [vmem:[%s2771_s1 + $0x308] sm:$0xff]  }
  0x41   :  { %1999 = vmatpush3.bf16.msra.mxu1 %v2187_v15  ;;  %2012 = vmatprep.subr.bf16.mxu0 %v2188_v24  ;;  %v2227_v15 = vld [vmem:[%s2771_s1 + $0x388] sm:$0xff]  }
  0x42   :  { %2040 = vmatprep.subr.bf16.mxu1 %v2189_v25  ;;  %v2230_v25 = vld [vmem:[%s2771_s1 + $0x310] sm:$0xff]  }
  0x43   :  { %1365 = vmatmul.mubr.bf16.vlgmr.msra.gmra.mrb[8].mxu0 %v1723_v20  ;;  %v2228_v20 = vld [vmem:[%s2771_s1 + $0x350] sm:$0xff]  }
  0x44   :  { %1414 = vmatmul.mubr.bf16.vlgmr.msra.gmra.mrb[8].mxu1 %v1725_v22  ;;  %2013 = vmatpush3.bf16.msra.mxu0 %v2190_v26  ;;  %v39_v22 = vld [vmem:[%s2772_s0 + $0xa8] sm:$0xff] }
  0x45   :  { %2041 = vmatpush3.bf16.msra.mxu1 %v2191_v27  ;;  %2014 = vmatprep.subr.bf16.mxu0 %v2192_v28  ;;  %v1746_v24 = vcombine.high %v39_v22, %v47_v23  ;;  %v1745_v26 = vcombine.low %v39_v22, %v47_v23  ;;  %v2231_v27 = vld [vmem:[%s2771_s1 + $0x390] sm:$0xff]   ;;  %v2232_v28 = vld [vmem:[%s2771_s1 + $0x358] sm:$0xff]  }
  0x46   :  { %2042 = vmatprep.subr.bf16.mxu1 %v2193_v29  ;;  %1372 = vmatprep.mubr.bf16.mxu0 %v1740_v34  ;;  %v2233_v29 = vld [vmem:[%s2771_s1 + $0x3d8] sm:$0xff]   ;;  %v2238_v34 = vld [vmem:[%s2771_s1 + $0x320] sm:$0xff]  }
  0x47   :  { %1421 = vmatprep.mubr.bf16.mxu1 %v1742_v40  ;;  %v2244_v40 = vld [vmem:[%s2771_s1 + $0x370] sm:$0xff]  }
  0x48   :  { %2015 = vmatpush3.bf16.msra.mxu0 %v2194_v30  ;;  %v2234_v30 = vld [vmem:[%s2771_s1 + $0x318] sm:$0xff]  }
  0x49   :  { %2043 = vmatpush3.bf16.msra.mxu1 %v2195_v31  ;;  %2016 = vmatprep.subr.bf16.mxu0 %v2196_v36  ;;  %v2235_v31 = vld [vmem:[%s2771_s1 + $0x398] sm:$0xff]   ;;  %v2240_v36 = vld [vmem:[%s2771_s1 + $0x368] sm:$0xff]  }
  0x4a   :  { %2044 = vmatprep.subr.bf16.mxu1 %v2197_v37  ;;  %v2241_v37 = vld [vmem:[%s2771_s1 + $0x3e8] sm:$0xff]  }
  0x4b   :  { %1373 = vmatmul.mubr.bf16.gmra.mrb[12].mxu0 %v1739_v35  ;;  %v2239_v35 = vld [vmem:[%s2771_s1 + $0x3a0] sm:$0xff]  }
  0x4c   :  { %2017 = vmatpush3.bf16.msra.mxu0 %v2198_v41  ;;  %1422 = vmatmul.mubr.bf16.gmra.mrb[12].mxu1 %v1741_v42  ;;  %v2245_v41 = vld [vmem:[%s2771_s1 + $0x3f0] sm:$0xff]  }
  0x4d   :  { %2045 = vmatpush3.bf16.msra.mxu1 %v2199_v43  ;;  %2018 = vmatprep.subr.bf16.mxu0 %v2200_v44  ;;  %v2246_v42 = vld [vmem:[%s2771_s1 + $0x330] sm:$0xff]   ;;  %v2248_v44 = vld [vmem:[%s2771_s1 + $0x378] sm:$0xff]  }
  0x4e   :  { %2046 = vmatprep.subr.bf16.mxu1 %v2201_v45  ;;  %1462 = vmatprep.mubr.bf16.mxu0 %v1728_v3  ;;  %v2247_v43 = vld [vmem:[%s2771_s1 + $0x3b0] sm:$0xff]   ;;  %v2249_v45 = vld [vmem:[%s2771_s1 + $0x3f8] sm:$0xff]  }
  0x4f   :  { %1511 = vmatprep.mubr.bf16.mxu1 %v1730_v7 }
  0x50   :  { %2019 = vmatpush3.bf16.msra.mxu0 %v2202_v46  ;;  %v2250_v46 = vld [vmem:[%s2771_s1 + $0x338] sm:$0xff]  }
  0x51   :  { %2047 = vmatpush3.bf16.msra.mxu1 %v2203_v47  ;;  %2020 = vmatprep.subr.bf16.mxu0 %v2204_v48  ;;  %v2251_v47 = vld [vmem:[%s2771_s1 + $0x3b8] sm:$0xff]   ;;  %v24_v48 = vld [vmem:[%s2772_s0 + $0x30] sm:$0xff] }
  0x52   :  { %2048 = vmatprep.subr.bf16.mxu1 %v2205_v49  ;;  %v32_v49 = vld [vmem:[%s2772_s0 + $0x70] sm:$0xff] }
  0x54   :  { %2021 = vmatpush3.bf16.msra.mxu0 %v2206_v50  ;;  %v25_v50 = vld [vmem:[%s2772_s0 + $0x38] sm:$0xff] }
  0x55   :  { %2049 = vmatpush3.bf16.msra.mxu1 %v2207_v51  ;;  %2022 = vmatprep.subr.bf16.mxu0 %v2208_v52  ;;  %v1731_v51 = vcombine.low %v24_v48, %v32_v49  ;;  %v1732_v52 = vcombine.high %v24_v48, %v32_v49 }
  0x56   :  { %2050 = vmatprep.subr.bf16.mxu1 %v2209_v53  ;;  %v33_v53 = vld [vmem:[%s2772_s0 + $0x78] sm:$0xff] }
  0x58   :  { %2023 = vmatpush3.bf16.msra.mxu0 %v2210_v54  ;;  %v40_v54 = vld [vmem:[%s2772_s0 + $0xb0] sm:$0xff] }
  0x59   :  { %2051 = vmatpush3.bf16.msra.mxu1 %v2211_v55  ;;  %2024 = vmatprep.subr.bf16.mxu0 %v2212_v56  ;;  %v48_v55 = vld [vmem:[%s2772_s0 + $0xf0] sm:$0xff]  ;;  %v1733_v56 = vcombine.low %v25_v50, %v33_v53 }
  0x5a   :  { %2052 = vmatprep.subr.bf16.mxu1 %v2213_v57  ;;  %v1734_v57 = vcombine.high %v25_v50, %v33_v53 }
  0x5c   :  { %2025 = vmatpush3.bf16.msra.mxu0 %v2214_v58  ;;  %v1748_v58 = vcombine.high %v40_v54, %v48_v55 }
  0x5d   :  { %2053 = vmatpush3.bf16.msra.mxu1 %v2215_v59  ;;  %2026 = vmatprep.subr.bf16.mxu0 %v2216_v60  ;;  %v41_v59 = vld [vmem:[%s2772_s0 + $0xb8] sm:$0xff] }
  0x5e   :  { %2054 = vmatprep.subr.bf16.mxu1 %v2217_v61  ;;  %v49_v60 = vld [vmem:[%s2772_s0 + $0xf8] sm:$0xff] }
  0x5f   :  { %v1750_v61 = vcombine.high %v41_v59, %v49_v60 }
  0x60   :  { %2027 = vmatpush3.bf16.msra.mxu0 %v2218_v62  ;;  %v1747_v62 = vcombine.low %v40_v54, %v48_v55 }
  0x61   :  { %2055 = vmatpush3.bf16.msra.mxu1 %v2219_v63  ;;  %2068 = vmatprep.subr.bf16.mxu0 %v2220_v8  ;;  %v1749_v63 = vcombine.low %v41_v59, %v49_v60 }
  0x62   :  { %2096 = vmatprep.subr.bf16.mxu1 %v2221_v9 }
  0x63   :  { %1463 = vmatmul.mubr.bf16.vlgmr.msra.gmra.mrb[16].mxu0 %v1727_v2 }
  0x64   :  { %1512 = vmatmul.mubr.bf16.vlgmr.msra.gmra.mrb[16].mxu1 %v1729_v6  ;;  %2069 = vmatpush3.bf16.msra.mxu0 %v2222_v10 }
  0x65   :  { %2097 = vmatpush3.bf16.msra.mxu1 %v2223_v11  ;;  %2070 = vmatprep.subr.bf16.mxu0 %v2224_v12 }
  0x66   :  { %2098 = vmatprep.subr.bf16.mxu1 %v2225_v13  ;;  %1470 = vmatprep.mubr.bf16.mxu0 %v1744_v18 }
  0x67   :  { %1519 = vmatprep.mubr.bf16.mxu1 %v1746_v24 }
  0x68   :  { %2071 = vmatpush3.bf16.msra.mxu0 %v2226_v14 }
  0x69   :  { %2099 = vmatpush3.bf16.msra.mxu1 %v2227_v15  ;;  %2072 = vmatprep.subr.bf16.mxu0 %v2228_v20 }
  0x6a   :  { %2100 = vmatprep.subr.bf16.mxu1 %v2229_v21 }
  0x6b   :  { %1471 = vmatmul.mubr.bf16.gmra.mrb[20].mxu0 %v1743_v19 }
  0x6c   :  { %2073 = vmatpush3.bf16.msra.mxu0 %v2230_v25  ;;  %1520 = vmatmul.mubr.bf16.gmra.mrb[20].mxu1 %v1745_v26 }
  0x6d   :  { %2101 = vmatpush3.bf16.msra.mxu1 %v2231_v27  ;;  %2074 = vmatprep.subr.bf16.mxu0 %v2232_v28 }
  0x6e   :  { %2102 = vmatprep.subr.bf16.mxu1 %v2233_v29  ;;  %1560 = vmatprep.mubr.bf16.mxu0 %v1732_v52 }
  0x6f   :  { %1609 = vmatprep.mubr.bf16.mxu1 %v1734_v57 }
  0x70   :  { %2075 = vmatpush3.bf16.msra.mxu0 %v2234_v30 }
  0x71   :  { %2103 = vmatpush3.bf16.msra.mxu1 %v2235_v31  ;;  %2076 = vmatprep.subr.bf16.mxu0 %v2236_v32 }
  0x72   :  { %2104 = vmatprep.subr.bf16.mxu1 %v2237_v33 }
  0x74   :  { %2077 = vmatpush3.bf16.msra.mxu0 %v2238_v34 }
  0x75   :  { %2105 = vmatpush3.bf16.msra.mxu1 %v2239_v35  ;;  %2078 = vmatprep.subr.bf16.mxu0 %v2240_v36 }
  0x76   :  { %2106 = vmatprep.subr.bf16.mxu1 %v2241_v37 }
  0x78   :  { %2079 = vmatpush3.bf16.msra.mxu0 %v2242_v38 }
  0x79   :  { %2107 = vmatpush3.bf16.msra.mxu1 %v2243_v39  ;;  %2080 = vmatprep.subr.bf16.mxu0 %v2244_v40 }
  0x7a   :  { %2108 = vmatprep.subr.bf16.mxu1 %v2245_v41 }
  0x7c   :  { %2081 = vmatpush3.bf16.msra.mxu0 %v2246_v42 }
  0x7d   :  { %2109 = vmatpush3.bf16.msra.mxu1 %v2247_v43  ;;  %2082 = vmatprep.subr.bf16.mxu0 %v2248_v44 }
  0x7e   :  { %2110 = vmatprep.subr.bf16.mxu1 %v2249_v45 }
  0x80   :  { %2083 = vmatpush3.bf16.msra.mxu0 %v2250_v46 }
  0x81   :  { %2111 = vmatpush3.bf16.msra.mxu1 %v2251_v47 }
  0x83   :  { %1561 = vmatmul.mubr.bf16.vlgmr.msra.gmra.mrb[24].mxu0 %v1731_v51 }
  0x84   :  { %1610 = vmatmul.mubr.bf16.vlgmr.msra.gmra.mrb[24].mxu1 %v1733_v56  ;;  %1568 = vmatprep.mubr.bf16.mxu0 %v1748_v58 }
  0x85   :  { %1617 = vmatprep.mubr.bf16.mxu1 %v1750_v61 }
  0x8b   :  { %1569 = vmatmul.mubr.bf16.gmra.mrb[28].mxu0 %v1747_v62 }
  0x8c   :  { %1618 = vmatmul.mubr.bf16.gmra.mrb[28].mxu1 %v1749_v63 }
  0xf6   :  { %v1916_v0 = vpop.f32.mrb[0].mxu0 }
  0xf7   :  { %v1944_v1 = vpop.f32.mrb[0].mxu1  ;;  %v1917_v2 = vpop.f32.mrb[1].mxu0 }
  0xf8   :  { %v1918_v3 = vadd.f32 %v1917_v2, %v1916_v0  ;;  %v1945_v4 = vpop.f32.mrb[1].mxu1  ;;  %v1919_v5 = vpop.f32.mrb[2].mxu0 }
  0xf9   :  { %v1946_v6 = vadd.f32 %v1945_v4, %v1944_v1  ;;  %v1947_v7 = vpop.f32.mrb[2].mxu1  ;;  %v1920_v8 = vpop.f32.mrb[3].mxu0 }
  0xfa   :  { %v1921_v9 = vadd.f32 %v1920_v8, %v1919_v5  ;;  %v1948_v10 = vpop.f32.mrb[3].mxu1 }
  0xfb   :  { %v1318_v11 = vadd.f32 %v1946_v6, %v1918_v3  ;;  %v1949_v12 = vadd.f32 %v1948_v10, %v1947_v7 }
  0xfd   :  { %v1321_v13 = vadd.f32 %v1949_v12, %v1921_v9 }
  0xfe   :  { %v1922_v14 = vpop.f32.mrb[4].mxu0 }
  0xff   :  { %v1950_v15 = vpop.f32.mrb[4].mxu1  ;;  %v1923_v16 = vpop.f32.mrb[5].mxu0 }
 0x100   :  { %v1924_v17 = vadd.f32 %v1923_v16, %v1922_v14  ;;  %v1951_v18 = vpop.f32.mrb[5].mxu1  ;;  %v1925_v19 = vpop.f32.mrb[6].mxu0 }
 0x101   :  { %v1952_v20 = vadd.f32 %v1951_v18, %v1950_v15  ;;  %v1953_v21 = vpop.f32.mrb[6].mxu1  ;;  %v1926_v22 = vpop.f32.mrb[7].mxu0 }
 0x102   :  { %v1927_v23 = vadd.f32 %v1926_v22, %v1925_v19  ;;  %v1954_v24 = vpop.f32.mrb[7].mxu1 }
 0x103   :  { %v1326_v25 = vadd.f32 %v1952_v20, %v1924_v17  ;;  %v1955_v26 = vadd.f32 %v1954_v24, %v1953_v21 }
 0x105   :  { %v1329_v27 = vadd.f32 %v1955_v26, %v1927_v23 }
 0x116   :  { %v1972_v28 = vpop.f32.mrb[8].mxu0 }
 0x117   :  { %v2000_v29 = vpop.f32.mrb[8].mxu1  ;;  %v1973_v30 = vpop.f32.mrb[9].mxu0 }
 0x118   :  { %v2001_v31 = vpop.f32.mrb[9].mxu1  ;;  %v1974_v32 = vadd.f32 %v1973_v30, %v1972_v28  ;;  %v1975_v34 = vpop.f32.mrb[10].mxu0 }
 0x119   :  { %v2002_v33 = vadd.f32 %v2001_v31, %v2000_v29  ;;  %v2003_v35 = vpop.f32.mrb[10].mxu1  ;;  %v1976_v36 = vpop.f32.mrb[11].mxu0 }
 0x11a   :  { %v2004_v37 = vpop.f32.mrb[11].mxu1  ;;  %v1367_v38 = vadd.f32 %v1974_v32, %v1318_v11  ;;  %v1977_v39 = vadd.f32 %v1976_v36, %v1975_v34 }
 0x11b   :  { %v2005_v40 = vadd.f32 %v2004_v37, %v2003_v35 }
 0x11c   :  { %v1416_v41 = vadd.f32 %v2002_v33, %v1367_v38  ;;  %v1370_v42 = vadd.f32 %v1977_v39, %v1321_v13 }
 0x11e   :  { %v1419_v43 = vadd.f32 %v2005_v40, %v1370_v42  ;;  %v1978_v44 = vpop.f32.mrb[12].mxu0 }
 0x11f   :  { %v1979_v45 = vpop.f32.mrb[13].mxu0  ;;  %v2006_v50 = vpop.f32.mrb[12].mxu1 }
 0x120   :  { %v1980_v46 = vadd.f32 %v1979_v45, %v1978_v44  ;;  %v1981_v47 = vpop.f32.mrb[14].mxu0  ;;  %v2007_v52 = vpop.f32.mrb[13].mxu1 }
 0x121   :  { %v1982_v48 = vpop.f32.mrb[15].mxu0  ;;  %v2008_v54 = vadd.f32 %v2007_v52, %v2006_v50  ;;  %v2009_v55 = vpop.f32.mrb[14].mxu1 }
 0x122   :  { %v1375_v49 = vadd.f32 %v1980_v46, %v1326_v25  ;;  %v1983_v51 = vadd.f32 %v1982_v48, %v1981_v47  ;;  %v2010_v56 = vpop.f32.mrb[15].mxu1 }
 0x123   :  { %v2011_v58 = vadd.f32 %v2010_v56, %v2009_v55 }
 0x124   :  { %v1378_v53 = vadd.f32 %v1983_v51, %v1329_v27  ;;  %v1424_v57 = vadd.f32 %v2008_v54, %v1375_v49 }
 0x126   :  { %v1427_v59 = vadd.f32 %v2011_v58, %v1378_v53 }
 0x136   :  { %v2028_v60 = vpop.f32.mrb[16].mxu0 }
 0x137   :  { %v2056_v61 = vpop.f32.mrb[16].mxu1  ;;  %v2029_v62 = vpop.f32.mrb[17].mxu0 }
 0x138   :  { %v2030_v63 = vadd.f32 %v2029_v62, %v2028_v60  ;;  %v2057_v0 = vpop.f32.mrb[17].mxu1  ;;  %v2031_v1 = vpop.f32.mrb[18].mxu0 }
 0x139   :  { %v2058_v2 = vadd.f32 %v2057_v0, %v2056_v61  ;;  %v2059_v3 = vpop.f32.mrb[18].mxu1  ;;  %v2032_v4 = vpop.f32.mrb[19].mxu0 }
 0x13a   :  { %v1465_v5 = vadd.f32 %v2030_v63, %v1416_v41  ;;  %v2033_v6 = vadd.f32 %v2032_v4, %v2031_v1  ;;  %v2060_v7 = vpop.f32.mrb[19].mxu1 }
 0x13b   :  { %v2061_v8 = vadd.f32 %v2060_v7, %v2059_v3 }
 0x13c   :  { %v1514_v9 = vadd.f32 %v2058_v2, %v1465_v5  ;;  %v1468_v10 = vadd.f32 %v2033_v6, %v1419_v43 }
 0x13e   :  { %v1517_v11 = vadd.f32 %v2061_v8, %v1468_v10  ;;  %v2034_v12 = vpop.f32.mrb[20].mxu0 }
 0x13f   :  { %v2035_v13 = vpop.f32.mrb[21].mxu0  ;;  %v2062_v16 = vpop.f32.mrb[20].mxu1 }
 0x140   :  { %v2036_v14 = vadd.f32 %v2035_v13, %v2034_v12  ;;  %v2037_v15 = vpop.f32.mrb[22].mxu0  ;;  %v2063_v20 = vpop.f32.mrb[21].mxu1 }
 0x141   :  { %v2038_v17 = vpop.f32.mrb[23].mxu0  ;;  %v2064_v21 = vadd.f32 %v2063_v20, %v2062_v16  ;;  %v2065_v22 = vpop.f32.mrb[22].mxu1 }
 0x142   :  { %v1473_v18 = vadd.f32 %v2036_v14, %v1424_v57  ;;  %v2039_v19 = vadd.f32 %v2038_v17, %v2037_v15  ;;  %v2066_v24 = vpop.f32.mrb[23].mxu1 }
 0x143   :  { %v2067_v26 = vadd.f32 %v2066_v24, %v2065_v22 }
 0x144   :  { %v1476_v23 = vadd.f32 %v2039_v19, %v1427_v59  ;;  %v1522_v25 = vadd.f32 %v2064_v21, %v1473_v18 }
 0x146   :  { %v1525_v27 = vadd.f32 %v2067_v26, %v1476_v23  ;;  %v1879_v26 = vld [vmem:[%s2773_s2] ss:$0 sm:$0xff] }
 0x156   :  { %v2084_v28 = vpop.f32.mrb[24].mxu0 }
 0x157   :  { %v2112_v29 = vpop.f32.mrb[24].mxu1  ;;  %v2085_v30 = vpop.f32.mrb[25].mxu0 }
 0x158   :  { %v2086_v31 = vadd.f32 %v2085_v30, %v2084_v28  ;;  %v2113_v32 = vpop.f32.mrb[25].mxu1  ;;  %v2087_v33 = vpop.f32.mrb[26].mxu0 }
 0x159   :  { %v2114_v34 = vadd.f32 %v2113_v32, %v2112_v29  ;;  %v2115_v35 = vpop.f32.mrb[26].mxu1  ;;  %v2088_v36 = vpop.f32.mrb[27].mxu0 }
 0x15a   :  { %v1563_v37 = vadd.f32 %v2086_v31, %v1514_v9  ;;  %v2089_v38 = vadd.f32 %v2088_v36, %v2087_v33  ;;  %v2116_v39 = vpop.f32.mrb[27].mxu1  ;;  %v1880_v31 = vld [vmem:[%s2774_s3] ss:$0 sm:$0xff] }
 0x15b   :  { %v2117_v40 = vadd.f32 %v2116_v39, %v2115_v35 }
 0x15c   :  { %v1612_v41 = vadd.f32 %v2114_v34, %v1563_v37  ;;  %v1566_v42 = vadd.f32 %v2089_v38, %v1517_v11 }
 0x15e   :  { %v1615_v43 = vadd.f32 %v2117_v40, %v1566_v42  ;;  %v2090_v44 = vpop.f32.mrb[28].mxu0 }
 0x15f   :  { %v2118_v45 = vpop.f32.mrb[28].mxu1  ;;  %v2091_v46 = vpop.f32.mrb[29].mxu0 }
 0x160   :  { %v1626_v47 = vadd.f32 %v1615_v43, %v1612_v41  ;;  %v2092_v48 = vadd.f32 %v2091_v46, %v2090_v44  ;;  %v2119_v49 = vpop.f32.mrb[29].mxu1  ;;  %v2093_v50 = vpop.f32.mrb[30].mxu0 }
 0x161   :  { %v2120_v51 = vadd.f32 %v2119_v49, %v2118_v45  ;;  %v2121_v52 = vpop.f32.mrb[30].mxu1  ;;  %v2094_v53 = vpop.f32.mrb[31].mxu0 }
 0x162   :  { %v1571_v54 = vadd.f32 %v2092_v48, %v1522_v25  ;;  %v2095_v55 = vadd.f32 %v2094_v53, %v2093_v50  ;;  %v2122_v56 = vpop.f32.mrb[31].mxu1 }
 0x163   :  { %v2123_v57 = vadd.f32 %v2122_v56, %v2121_v52 }
 0x164   :  { %v1620_v58 = vadd.f32 %v2120_v51, %v1571_v54  ;;  %v1574_v59 = vadd.f32 %v2095_v55, %v1525_v27 }
 0x166   :  { %v1627_v60 = vadd.f32 %v1626_v47, %v1620_v58  ;;  %v1623_v61 = vadd.f32 %v2123_v57, %v1574_v59 }
 0x168   :  { %v1628_v62 = vadd.f32 %v1627_v60, %v1623_v61 }
 0x16a   :  { %v1629_v63 = vrot.slane %v1628_v62, 4 }
 0x16c   :  { %v1630_v0 = vadd.f32 %v1629_v63, %v1628_v62 }
 0x16e   :  { %v1631_v1 = vrot.slane %v1630_v0, 2 }
 0x170   :  { %v1632_v2 = vadd.f32 %v1631_v1, %v1630_v0 }
 0x172   :  { %v1633_v3 = vrot.slane %v1632_v2, 1 }
 0x174   :  { %v1634_v4 = vadd.f32 %v1633_v3, %v1632_v2 }
 0x176   :  { %v1636_v5 = vmul.f32 0.03125, %v1634_v4 }
 0x178   :  { %v1637_v6 = vsub.f32 %v1612_v41, %v1636_v5  ;;  %v1638_v7 = vsub.f32 %v1615_v43, %v1636_v5  ;;  %v1639_v8 = vsub.f32 %v1620_v58, %v1636_v5  ;;  %v1640_v9 = vsub.f32 %v1623_v61, %v1636_v5 }
 0x17a   :  { %v1641_v10 = vmul.f32 %v1637_v6, %v1637_v6  ;;  %v1642_v11 = vmul.f32 %v1638_v7, %v1638_v7  ;;  %v1643_v12 = vmul.f32 %v1639_v8, %v1639_v8  ;;  %v1644_v14 = vmul.f32 %v1640_v9, %v1640_v9 }
 0x17c   :  { %v1645_v13 = vadd.f32 %v1642_v11, %v1641_v10 }
 0x17e   :  { %v1646_v15 = vadd.f32 %v1645_v13, %v1643_v12 }
 0x180   :  { %v1647_v16 = vadd.f32 %v1646_v15, %v1644_v14 }
 0x182   :  { %v1648_v17 = vrot.slane %v1647_v16, 4 }
 0x184   :  { %v1649_v18 = vadd.f32 %v1648_v17, %v1647_v16 }
 0x186   :  { %v1650_v19 = vrot.slane %v1649_v18, 2 }
 0x188   :  { %v1651_v20 = vadd.f32 %v1650_v19, %v1649_v18 }
 0x18a   :  { %v1652_v21 = vrot.slane %v1651_v20, 1 }
 0x18c   :  { %v1653_v22 = vadd.f32 %v1652_v21, %v1651_v20 }
 0x18e   :  { %v1654_v23 = vmul.f32 0.03125, %v1653_v22 }
 0x190   :  { %v1655_v24 = vadd.f32 1e-05, %v1654_v23 }
 0x192   :  { %2252 = vrsqrt.f32 %v1655_v24 }
 0x19c   :  { %v2253_v25 = vpop.eup %2252 }
 0x19d   :  { %v1657_v27 = vmul.f32 %v2253_v25, %v1637_v6  ;;  %v1658_v28 = vmul.f32 %v2253_v25, %v1638_v7  ;;  %v1659_v29 = vmul.f32 %v2253_v25, %v1639_v8  ;;  %v1660_v30 = vmul.f32 %v2253_v25, %v1640_v9 }
 0x19f   :  { %v1668_v32 = vmul.f32 %v1879_v26, %v1657_v27  ;;  %v1669_v33 = vmul.f32 %v1879_v26, %v1658_v28  ;;  %v1670_v34 = vmul.f32 %v1879_v26, %v1659_v29  ;;  %v1671_v35 = vmul.f32 %v1879_v26, %v1660_v30 }
 0x1a1   :  { %v1679_v36 = vadd.f32 %v1880_v31, %v1668_v32  ;;  %v1680_v37 = vadd.f32 %v1880_v31, %v1669_v33  ;;  %v1681_v38 = vadd.f32 %v1880_v31, %v1670_v34  ;;  %v1682_v39 = vadd.f32 %v1880_v31, %v1671_v35 }
 0x1a3   :  { %vm1683_vm0 = vcmp.ge.f32.partialorder %v1679_v36, 0.0  ;;  %vm1684_vm1 = vcmp.ge.f32.partialorder %v1680_v37, 0.0  ;;  %vm1685_vm2 = vcmp.ge.f32.partialorder %v1681_v38, 0.0  ;;  %vm1686_vm3 = vcmp.ge.f32.partialorder %v1682_v39, 0.0 }
 0x1a4   :  { %v1687_v40 = vmul.f32 0.2, %v1679_v36  ;;  %v1688_v41 = vmul.f32 0.2, %v1680_v37  ;;  %v1689_v42 = vmul.f32 0.2, %v1681_v38 }
 0x1a5   :  { %v1690_v43 = vmul.f32 0.2, %v1682_v39 }
 0x1a6   :  { %v1691_v44 = vsel %vm1683_vm0, %v1679_v36, %v1687_v40  ;;  %v1692_v45 = vsel %vm1684_vm1, %v1680_v37, %v1688_v41  ;;  %v1693_v46 = vsel %vm1685_vm2, %v1681_v38, %v1689_v42 }
 0x1a7   :  { %v1694_v47 = vsel %vm1686_vm3, %v1682_v39, %v1690_v43  ;;  %v1892_v48 = vpack.c.bf16 %v1692_v45, %v1691_v44 }
 0x1a8   :  { %v1897_v49 = vpack.c.bf16 %v1694_v47, %v1693_v46 }
 0x1a9   :  { %1893 = vst [vmem:[%s2775_s4] sm:$0xff] %v1892_v48  }
 0x1aa   :  { %1899 = vst [vmem:[%s2775_s4 + $0x8] sm:$0xff] %v1897_v49  }

// kernel: discriminator_forward.9
= control target key start
LH: loop header
LB: loop body
LE: loop exit
PB: predicated region body
PF: predicated region fallthrough
CT: control target
= control target key end

     0   :  { %v203_v0 = vmov 0.0   ;;  %vm204_vm0 = vmmov 0   ;;  %s258_s1 = inlined_call_operand.vmem [shape: bf16[128,128], index: 1, kind: input, shape index: {}]   ;;  %s259_s0 = inlined_call_operand.vmem [shape: bf16[8,128], index: 0, kind: input, shape index: {}]   ;;  %s260_s2 = inlined_call_operand.vmem [shape: f32[1,128], index: 2, kind: input, shape index: {}]   ;;  %s261_s3 = inlined_call_operand.vmem [shape: f32[8,128], index: 3, kind: output, shape index: {}]  }
   0x1   :  { %169 = vmatprep.subr.bf16.mxu0 %v203_v0  ;;  %v191_v1 = vld [vmem:[%s258_s1] sm:$0xff]   ;;  %185 = vmatprep.mubr.msk.bf16.mxu0 %vm204_vm0, %v203_v0  ;;  %v192_v2 = vld [vmem:[%s258_s1 + $0x8] sm:$0xff]   ;;  %v193_v3 = vld [vmem:[%s258_s1 + $0x10] sm:$0xff]  }
   0x2   :  { %170 = vmatpush3.bf16.msra.mxu0 %v191_v1  ;;  %v194_v4 = vld [vmem:[%s258_s1 + $0x18] sm:$0xff]   ;;  %v195_v5 = vld [vmem:[%s258_s1 + $0x20] sm:$0xff]   ;;  %v196_v6 = vld [vmem:[%s258_s1 + $0x28] sm:$0xff]  }
   0x3   :  { %171 = vmatprep.subr.bf16.mxu0 %v203_v0  ;;  %v197_v7 = vld [vmem:[%s258_s1 + $0x30] sm:$0xff]   ;;  %v198_v8 = vld [vmem:[%s258_s1 + $0x38] sm:$0xff]   ;;  %v21_v9 = vld [vmem:[%s259_s0] sm:$0xf] }
   0x4   :  { %v159_v10 = vld [vmem:[%s260_s2] ss:$0 sm:$0xff] }
   0x6   :  { %172 = vmatpush3.bf16.msra.mxu0 %v192_v2 }
   0x7   :  { %173 = vmatprep.subr.bf16.mxu0 %v203_v0 }
   0xa   :  { %174 = vmatpush3.bf16.msra.mxu0 %v193_v3 }
   0xb   :  { %175 = vmatprep.subr.bf16.mxu0 %v203_v0 }
   0xe   :  { %176 = vmatpush3.bf16.msra.mxu0 %v194_v4 }
   0xf   :  { %177 = vmatprep.subr.bf16.mxu0 %v203_v0 }
  0x12   :  { %178 = vmatpush3.bf16.msra.mxu0 %v195_v5 }
  0x13   :  { %179 = vmatprep.subr.bf16.mxu0 %v203_v0 }
  0x16   :  { %180 = vmatpush3.bf16.msra.mxu0 %v196_v6 }
  0x17   :  { %181 = vmatprep.subr.bf16.mxu0 %v203_v0 }
  0x1a   :  { %182 = vmatpush3.bf16.msra.mxu0 %v197_v7 }
  0x1b   :  { %183 = vmatprep.subr.bf16.mxu0 %v203_v0 }
  0x1e   :  { %184 = vmatpush3.bf16.msra.mxu0 %v198_v8 }
  0x21   :  { %186 = vmatmul.mubr.bf16.vlgmr.msra.gmra.mrb[0].mxu0 %v21_v9 }
  0xf4   :  { %v120_v11 = vpop.f32.mrb[0].mxu0 }
  0xf5   :  { %v139_v12 = vadd.f32 %v159_v10, %v120_v11  ;;  %v187_v13 = vpop.f32.mrb[1].mxu0 }
  0xf6   :  { %v123_v14 = vpop.f32.mrb[2].mxu0 }
  0xf7   :  { %v140_v15 = vsub.f32 0.0, %v139_v12  ;;  %v188_v16 = vpop.f32.mrb[3].mxu0 }
  0xf9   :  { %v141_v17 = vmul.f32 1.442695, %v140_v15 }
  0xfb   :  { %199 = vpow2.f32 %v141_v17 }
 0x105   :  { %v200_v18 = vpop.eup %199 }
 0x106   :  { %v143_v19 = vadd.f32 1.0, %v200_v18 }
 0x108   :  { %201 = vrcp.f32 %v143_v19 }
 0x112   :  { %v202_v20 = vpop.eup %201 }
 0x113   :  { %146 = vst [vmem:[%s261_s3] sm:$0xff] %v202_v20 }

// kernel: discriminator_forward.7
= control target key start
LH: loop header
LB: loop body
LE: loop exit
PB: predicated region body
PF: predicated region fallthrough
CT: control target
= control target key end

     0   :  { %s2381_s1 = inlined_call_operand.vmem [shape: bf16[2048,128], index: 1, kind: input, shape index: {}]   ;;  %s2382_s0 = inlined_call_operand.vmem [shape: bf16[8,2048], index: 0, kind: input, shape index: {}]   ;;  %s2383_s2 = inlined_call_operand.vmem [shape: f32[1,128], index: 2, kind: input, shape index: {}]   ;;  %s2384_s3 = inlined_call_operand.vmem [shape: f32[1,128], index: 3, kind: input, shape index: {}]   ;;  %s2385_s4 = inlined_call_operand.vmem [shape: bf16[8,128], index: 4, kind: output, shape index: {}]  }
   0x1   :  { %v1793_v0 = vld [vmem:[%s2381_s1 + $0x40] sm:$0xff]   ;;  %v1797_v4 = vld [vmem:[%s2381_s1 + $0x48] sm:$0xff]   ;;  %v1801_v8 = vld [vmem:[%s2381_s1 + $0x50] sm:$0xff]  }
   0x2   :  { %v1794_v1 = vld [vmem:[%s2381_s1 + $0xc0] sm:$0xff]   ;;  %1617 = vmatprep.subr.bf16.mxu0 %v1793_v0  ;;  %v1798_v5 = vld [vmem:[%s2381_s1 + $0xc8] sm:$0xff]   ;;  %v1802_v9 = vld [vmem:[%s2381_s1 + $0xd0] sm:$0xff]  }
   0x3   :  { %v1795_v2 = vld [vmem:[%s2381_s1] sm:$0xff]   ;;  %1639 = vmatprep.subr.bf16.mxu1 %v1794_v1  ;;  %v1799_v6 = vld [vmem:[%s2381_s1 + $0x8] sm:$0xff]   ;;  %v1803_v10 = vld [vmem:[%s2381_s1 + $0x10] sm:$0xff]  }
   0x4   :  { %v1796_v3 = vld [vmem:[%s2381_s1 + $0x80] sm:$0xff]   ;;  %1618 = vmatpush3.bf16.msra.mxu0 %v1795_v2  ;;  %v1800_v7 = vld [vmem:[%s2381_s1 + $0x88] sm:$0xff]   ;;  %v1804_v11 = vld [vmem:[%s2381_s1 + $0x90] sm:$0xff]  }
   0x5   :  { %1640 = vmatpush3.bf16.msra.mxu1 %v1796_v3  ;;  %1619 = vmatprep.subr.bf16.mxu0 %v1797_v4  ;;  %v1805_v12 = vld [vmem:[%s2381_s1 + $0x58] sm:$0xff]   ;;  %v1809_v16 = vld [vmem:[%s2381_s1 + $0x60] sm:$0xff]   ;;  %v1813_v20 = vld [vmem:[%s2381_s1 + $0x68] sm:$0xff]  }
   0x6   :  { %1641 = vmatprep.subr.bf16.mxu1 %v1798_v5  ;;  %v1806_v13 = vld [vmem:[%s2381_s1 + $0xd8] sm:$0xff]   ;;  %v1810_v17 = vld [vmem:[%s2381_s1 + $0xe0] sm:$0xff]   ;;  %v1814_v21 = vld [vmem:[%s2381_s1 + $0xe8] sm:$0xff]  }
   0x7   :  { %v1807_v14 = vld [vmem:[%s2381_s1 + $0x18] sm:$0xff]   ;;  %v1811_v18 = vld [vmem:[%s2381_s1 + $0x20] sm:$0xff]   ;;  %v1815_v22 = vld [vmem:[%s2381_s1 + $0x28] sm:$0xff]  }
   0x8   :  { %1620 = vmatpush3.bf16.msra.mxu0 %v1799_v6  ;;  %v1808_v15 = vld [vmem:[%s2381_s1 + $0x98] sm:$0xff]   ;;  %v1812_v19 = vld [vmem:[%s2381_s1 + $0xa0] sm:$0xff]   ;;  %v1816_v23 = vld [vmem:[%s2381_s1 + $0xa8] sm:$0xff]  }
   0x9   :  { %1642 = vmatpush3.bf16.msra.mxu1 %v1800_v7  ;;  %1621 = vmatprep.subr.bf16.mxu0 %v1801_v8  ;;  %v1817_v24 = vld [vmem:[%s2381_s1 + $0x70] sm:$0xff]   ;;  %v1821_v28 = vld [vmem:[%s2381_s1 + $0x78] sm:$0xff]   ;;  %v18_v32 = vld [vmem:[%s2382_s0] sm:$0xff] }
   0xa   :  { %1643 = vmatprep.subr.bf16.mxu1 %v1802_v9  ;;  %v1818_v25 = vld [vmem:[%s2381_s1 + $0xf0] sm:$0xff]   ;;  %v1822_v29 = vld [vmem:[%s2381_s1 + $0xf8] sm:$0xff]   ;;  %v19_v33 = vld [vmem:[%s2382_s0 + $0x8] sm:$0xff]  ;;  %v1471_v34 = vcombine.low %v18_v32, %v18_v32  ;;  %v1472_v35 = vcombine.high %v18_v32, %v18_v32 }
   0xb   :  { %v1819_v26 = vld [vmem:[%s2381_s1 + $0x30] sm:$0xff]   ;;  %v1823_v30 = vld [vmem:[%s2381_s1 + $0x38] sm:$0xff]   ;;  %v1473_v36 = vcombine.low %v19_v33, %v19_v33  ;;  %v1474_v37 = vcombine.high %v19_v33, %v19_v33  ;;  %v1829_v38 = vld [vmem:[%s2381_s1 + $0x140] sm:$0xff]  }
   0xc   :  { %1622 = vmatpush3.bf16.msra.mxu0 %v1803_v10  ;;  %v1820_v27 = vld [vmem:[%s2381_s1 + $0xb0] sm:$0xff]   ;;  %v1824_v31 = vld [vmem:[%s2381_s1 + $0xb8] sm:$0xff]   ;;  %v1830_v39 = vld [vmem:[%s2381_s1 + $0x1c0] sm:$0xff]   ;;  %1138 = vmatprep.mubr.bf16.mxu0 %v1472_v35 }
   0xd   :  { %1644 = vmatpush3.bf16.msra.mxu1 %v1804_v11  ;;  %1623 = vmatprep.subr.bf16.mxu0 %v1805_v12  ;;  %v1831_v40 = vld [vmem:[%s2381_s1 + $0x100] sm:$0xff]   ;;  %v1833_v42 = vld [vmem:[%s2381_s1 + $0x148] sm:$0xff]   ;;  %v1837_v46 = vld [vmem:[%s2381_s1 + $0x150] sm:$0xff]  }
   0xe   :  { %1645 = vmatprep.subr.bf16.mxu1 %v1806_v13  ;;  %1178 = vmatprep.mubr.bf16.mxu1 %v1474_v37  ;;  %v1832_v41 = vld [vmem:[%s2381_s1 + $0x180] sm:$0xff]   ;;  %v1834_v43 = vld [vmem:[%s2381_s1 + $0x1c8] sm:$0xff]   ;;  %v1838_v47 = vld [vmem:[%s2381_s1 + $0x1d0] sm:$0xff]  }
   0xf   :  { %v1835_v44 = vld [vmem:[%s2381_s1 + $0x108] sm:$0xff]   ;;  %v1839_v48 = vld [vmem:[%s2381_s1 + $0x110] sm:$0xff]   ;;  %v1841_v50 = vld [vmem:[%s2381_s1 + $0x158] sm:$0xff]  }
  0x10   :  { %1624 = vmatpush3.bf16.msra.mxu0 %v1807_v14  ;;  %v1836_v45 = vld [vmem:[%s2381_s1 + $0x188] sm:$0xff]   ;;  %v1840_v49 = vld [vmem:[%s2381_s1 + $0x190] sm:$0xff]   ;;  %v1842_v51 = vld [vmem:[%s2381_s1 + $0x1d8] sm:$0xff]  }
  0x11   :  { %1646 = vmatpush3.bf16.msra.mxu1 %v1808_v15  ;;  %1625 = vmatprep.subr.bf16.mxu0 %v1809_v16  ;;  %v1843_v52 = vld [vmem:[%s2381_s1 + $0x118] sm:$0xff]   ;;  %v1845_v54 = vld [vmem:[%s2381_s1 + $0x160] sm:$0xff]   ;;  %v1849_v58 = vld [vmem:[%s2381_s1 + $0x168] sm:$0xff]  }
  0x12   :  { %1647 = vmatprep.subr.bf16.mxu1 %v1810_v17  ;;  %v1844_v53 = vld [vmem:[%s2381_s1 + $0x198] sm:$0xff]   ;;  %v1846_v55 = vld [vmem:[%s2381_s1 + $0x1e0] sm:$0xff]   ;;  %v1850_v59 = vld [vmem:[%s2381_s1 + $0x1e8] sm:$0xff]  }
  0x13   :  { %v1847_v56 = vld [vmem:[%s2381_s1 + $0x120] sm:$0xff]   ;;  %v1851_v60 = vld [vmem:[%s2381_s1 + $0x128] sm:$0xff]   ;;  %v1853_v62 = vld [vmem:[%s2381_s1 + $0x170] sm:$0xff]  }
  0x14   :  { %1626 = vmatpush3.bf16.msra.mxu0 %v1811_v18  ;;  %v1848_v57 = vld [vmem:[%s2381_s1 + $0x1a0] sm:$0xff]   ;;  %v1852_v61 = vld [vmem:[%s2381_s1 + $0x1a8] sm:$0xff]   ;;  %v1854_v63 = vld [vmem:[%s2381_s1 + $0x1f0] sm:$0xff]  }
  0x15   :  { %1648 = vmatpush3.bf16.msra.mxu1 %v1812_v19  ;;  %1627 = vmatprep.subr.bf16.mxu0 %v1813_v20  ;;  %v1855_v0 = vld [vmem:[%s2381_s1 + $0x130] sm:$0xff]   ;;  %v1857_v2 = vld [vmem:[%s2381_s1 + $0x178] sm:$0xff]   ;;  %v1865_v12 = vld [vmem:[%s2381_s1 + $0x240] sm:$0xff]  }
  0x16   :  { %1649 = vmatprep.subr.bf16.mxu1 %v1814_v21  ;;  %v1856_v1 = vld [vmem:[%s2381_s1 + $0x1b0] sm:$0xff]   ;;  %v1858_v3 = vld [vmem:[%s2381_s1 + $0x1f8] sm:$0xff]   ;;  %v1866_v13 = vld [vmem:[%s2381_s1 + $0x2c0] sm:$0xff]  }
  0x17   :  { %v1859_v4 = vld [vmem:[%s2381_s1 + $0x138] sm:$0xff]   ;;  %v20_v6 = vld [vmem:[%s2382_s0 + $0x10] sm:$0xff]  ;;  %v1867_v14 = vld [vmem:[%s2381_s1 + $0x200] sm:$0xff]  }
  0x18   :  { %1628 = vmatpush3.bf16.msra.mxu0 %v1815_v22  ;;  %v1860_v5 = vld [vmem:[%s2381_s1 + $0x1b8] sm:$0xff]   ;;  %v1475_v7 = vcombine.low %v20_v6, %v20_v6  ;;  %v1476_v8 = vcombine.high %v20_v6, %v20_v6  ;;  %v1868_v15 = vld [vmem:[%s2381_s1 + $0x280] sm:$0xff]   ;;  %v1869_v16 = vld [vmem:[%s2381_s1 + $0x248] sm:$0xff]  }
  0x19   :  { %1650 = vmatpush3.bf16.msra.mxu1 %v1816_v23  ;;  %1629 = vmatprep.subr.bf16.mxu0 %v1817_v24  ;;  %v21_v9 = vld [vmem:[%s2382_s0 + $0x18] sm:$0xff]  ;;  %v1870_v17 = vld [vmem:[%s2381_s1 + $0x2c8] sm:$0xff]   ;;  %v1873_v20 = vld [vmem:[%s2381_s1 + $0x250] sm:$0xff]  }
  0x1a   :  { %1651 = vmatprep.subr.bf16.mxu1 %v1818_v25  ;;  %v1477_v10 = vcombine.low %v21_v9, %v21_v9  ;;  %v1478_v11 = vcombine.high %v21_v9, %v21_v9  ;;  %v1871_v18 = vld [vmem:[%s2381_s1 + $0x208] sm:$0xff]   ;;  %v1874_v21 = vld [vmem:[%s2381_s1 + $0x2d0] sm:$0xff]   ;;  %v1877_v24 = vld [vmem:[%s2381_s1 + $0x258] sm:$0xff]  }
  0x1b   :  { %v1872_v19 = vld [vmem:[%s2381_s1 + $0x288] sm:$0xff]   ;;  %v1875_v22 = vld [vmem:[%s2381_s1 + $0x210] sm:$0xff]   ;;  %v1878_v25 = vld [vmem:[%s2381_s1 + $0x2d8] sm:$0xff]  }
  0x1c   :  { %1630 = vmatpush3.bf16.msra.mxu0 %v1819_v26  ;;  %v1876_v23 = vld [vmem:[%s2381_s1 + $0x290] sm:$0xff]   ;;  %v1879_v26 = vld [vmem:[%s2381_s1 + $0x218] sm:$0xff]   ;;  %v1885_v32 = vld [vmem:[%s2381_s1 + $0x268] sm:$0xff]  }
  0x1d   :  { %1652 = vmatpush3.bf16.msra.mxu1 %v1820_v27  ;;  %1631 = vmatprep.subr.bf16.mxu0 %v1821_v28  ;;  %v1880_v27 = vld [vmem:[%s2381_s1 + $0x298] sm:$0xff]   ;;  %v1881_v28 = vld [vmem:[%s2381_s1 + $0x260] sm:$0xff]   ;;  %v1886_v33 = vld [vmem:[%s2381_s1 + $0x2e8] sm:$0xff]  }
  0x1e   :  { %1653 = vmatprep.subr.bf16.mxu1 %v1822_v29  ;;  %v1882_v29 = vld [vmem:[%s2381_s1 + $0x2e0] sm:$0xff]   ;;  %v1888_v35 = vld [vmem:[%s2381_s1 + $0x2a8] sm:$0xff]   ;;  %v1890_v37 = vld [vmem:[%s2381_s1 + $0x2f0] sm:$0xff]  }
  0x1f   :  { %v1921_v6 = vld [vmem:[%s2381_s1 + $0x368] sm:$0xff]  }
  0x20   :  { %1632 = vmatpush3.bf16.msra.mxu0 %v1823_v30  ;;  %v1883_v30 = vld [vmem:[%s2381_s1 + $0x220] sm:$0xff]   ;;  %v1924_v9 = vld [vmem:[%s2381_s1 + $0x3a8] sm:$0xff]  }
  0x21   :  { %1654 = vmatpush3.bf16.msra.mxu1 %v1824_v31  ;;  %1661 = vmatprep.subr.bf16.mxu0 %v1829_v38  ;;  %v1884_v31 = vld [vmem:[%s2381_s1 + $0x2a0] sm:$0xff]   ;;  %v1891_v38 = vld [vmem:[%s2381_s1 + $0x230] sm:$0xff]  }
  0x22   :  { %1683 = vmatprep.subr.bf16.mxu1 %v1830_v39  ;;  %v1892_v39 = vld [vmem:[%s2381_s1 + $0x2b0] sm:$0xff]  }
  0x23   :  { %1139 = vmatmul.mubr.bf16.vlgmr.msra.gmra.mrb[0].mxu0 %v1471_v34  ;;  %v1887_v34 = vld [vmem:[%s2381_s1 + $0x228] sm:$0xff]  }
  0x24   :  { %1179 = vmatmul.mubr.bf16.vlgmr.msra.gmra.mrb[0].mxu1 %v1473_v36  ;;  %1662 = vmatpush3.bf16.msra.mxu0 %v1831_v40  ;;  %v1889_v36 = vld [vmem:[%s2381_s1 + $0x270] sm:$0xff]   ;;  %v1893_v40 = vld [vmem:[%s2381_s1 + $0x278] sm:$0xff]  }
  0x25   :  { %1684 = vmatpush3.bf16.msra.mxu1 %v1832_v41  ;;  %1663 = vmatprep.subr.bf16.mxu0 %v1833_v42  ;;  %v1894_v41 = vld [vmem:[%s2381_s1 + $0x2f8] sm:$0xff]  }
  0x26   :  { %1685 = vmatprep.subr.bf16.mxu1 %v1834_v43  ;;  %1218 = vmatprep.mubr.bf16.mxu0 %v1476_v8  ;;  %v1895_v42 = vld [vmem:[%s2381_s1 + $0x238] sm:$0xff]   ;;  %v1923_v8 = vld [vmem:[%s2381_s1 + $0x328] sm:$0xff]  }
  0x27   :  { %1258 = vmatprep.mubr.bf16.mxu1 %v1478_v11  ;;  %v1896_v43 = vld [vmem:[%s2381_s1 + $0x2b8] sm:$0xff]   ;;  %v1926_v11 = vld [vmem:[%s2381_s1 + $0x3f0] sm:$0xff]  }
  0x28   :  { %1664 = vmatpush3.bf16.msra.mxu0 %v1835_v44  ;;  %v22_v44 = vld [vmem:[%s2382_s0 + $0x20] sm:$0xff] }
  0x29   :  { %1686 = vmatpush3.bf16.msra.mxu1 %v1836_v45  ;;  %1665 = vmatprep.subr.bf16.mxu0 %v1837_v46  ;;  %v23_v45 = vld [vmem:[%s2382_s0 + $0x28] sm:$0xff]  ;;  %v1479_v46 = vcombine.low %v22_v44, %v22_v44 }
  0x2a   :  { %1687 = vmatprep.subr.bf16.mxu1 %v1838_v47  ;;  %v1480_v47 = vcombine.high %v22_v44, %v22_v44 }
  0x2c   :  { %1666 = vmatpush3.bf16.msra.mxu0 %v1839_v48  ;;  %v1481_v48 = vcombine.low %v23_v45, %v23_v45 }
  0x2d   :  { %1688 = vmatpush3.bf16.msra.mxu1 %v1840_v49  ;;  %1667 = vmatprep.subr.bf16.mxu0 %v1841_v50  ;;  %v1482_v49 = vcombine.high %v23_v45, %v23_v45  ;;  %v1901_v50 = vld [vmem:[%s2381_s1 + $0x340] sm:$0xff]  }
  0x2e   :  { %1689 = vmatprep.subr.bf16.mxu1 %v1842_v51  ;;  %v1902_v51 = vld [vmem:[%s2381_s1 + $0x3c0] sm:$0xff]  }
  0x30   :  { %1668 = vmatpush3.bf16.msra.mxu0 %v1843_v52  ;;  %v1903_v52 = vld [vmem:[%s2381_s1 + $0x300] sm:$0xff]  }
  0x31   :  { %1690 = vmatpush3.bf16.msra.mxu1 %v1844_v53  ;;  %1669 = vmatprep.subr.bf16.mxu0 %v1845_v54  ;;  %v1904_v53 = vld [vmem:[%s2381_s1 + $0x380] sm:$0xff]   ;;  %v1905_v54 = vld [vmem:[%s2381_s1 + $0x348] sm:$0xff]  }
  0x32   :  { %1691 = vmatprep.subr.bf16.mxu1 %v1846_v55  ;;  %v1906_v55 = vld [vmem:[%s2381_s1 + $0x3c8] sm:$0xff]  }
  0x34   :  { %1670 = vmatpush3.bf16.msra.mxu0 %v1847_v56  ;;  %v1907_v56 = vld [vmem:[%s2381_s1 + $0x308] sm:$0xff]  }
  0x35   :  { %1692 = vmatpush3.bf16.msra.mxu1 %v1848_v57  ;;  %1671 = vmatprep.subr.bf16.mxu0 %v1849_v58  ;;  %v1908_v57 = vld [vmem:[%s2381_s1 + $0x388] sm:$0xff]   ;;  %v1909_v58 = vld [vmem:[%s2381_s1 + $0x350] sm:$0xff]  }
  0x36   :  { %1693 = vmatprep.subr.bf16.mxu1 %v1850_v59  ;;  %v1910_v59 = vld [vmem:[%s2381_s1 + $0x3d0] sm:$0xff]  }
  0x38   :  { %1672 = vmatpush3.bf16.msra.mxu0 %v1851_v60  ;;  %v1911_v60 = vld [vmem:[%s2381_s1 + $0x310] sm:$0xff]  }
  0x39   :  { %1694 = vmatpush3.bf16.msra.mxu1 %v1852_v61  ;;  %1673 = vmatprep.subr.bf16.mxu0 %v1853_v62  ;;  %v1912_v61 = vld [vmem:[%s2381_s1 + $0x390] sm:$0xff]   ;;  %v1913_v62 = vld [vmem:[%s2381_s1 + $0x358] sm:$0xff]  }
  0x3a   :  { %1695 = vmatprep.subr.bf16.mxu1 %v1854_v63  ;;  %v1914_v63 = vld [vmem:[%s2381_s1 + $0x3d8] sm:$0xff]  }
  0x3c   :  { %1674 = vmatpush3.bf16.msra.mxu0 %v1855_v0  ;;  %v1915_v0 = vld [vmem:[%s2381_s1 + $0x318] sm:$0xff]  }
  0x3d   :  { %1696 = vmatpush3.bf16.msra.mxu1 %v1856_v1  ;;  %1675 = vmatprep.subr.bf16.mxu0 %v1857_v2  ;;  %v1916_v1 = vld [vmem:[%s2381_s1 + $0x398] sm:$0xff]   ;;  %v1917_v2 = vld [vmem:[%s2381_s1 + $0x360] sm:$0xff]  }
  0x3e   :  { %1697 = vmatprep.subr.bf16.mxu1 %v1858_v3  ;;  %v1918_v3 = vld [vmem:[%s2381_s1 + $0x3e0] sm:$0xff]  }
  0x40   :  { %1676 = vmatpush3.bf16.msra.mxu0 %v1859_v4  ;;  %v1919_v4 = vld [vmem:[%s2381_s1 + $0x320] sm:$0xff]  }
  0x41   :  { %1698 = vmatpush3.bf16.msra.mxu1 %v1860_v5  ;;  %1705 = vmatprep.subr.bf16.mxu0 %v1865_v12  ;;  %v1920_v5 = vld [vmem:[%s2381_s1 + $0x3a0] sm:$0xff]   ;;  %v1927_v12 = vld [vmem:[%s2381_s1 + $0x330] sm:$0xff]  }
  0x42   :  { %1727 = vmatprep.subr.bf16.mxu1 %v1866_v13  ;;  %v1928_v13 = vld [vmem:[%s2381_s1 + $0x3b0] sm:$0xff]  }
  0x43   :  { %1219 = vmatmul.mubr.bf16.vlgmr.msra.gmra.mrb[4].mxu0 %v1475_v7  ;;  %v1922_v7 = vld [vmem:[%s2381_s1 + $0x3e8] sm:$0xff]  }
  0x44   :  { %1259 = vmatmul.mubr.bf16.vlgmr.msra.gmra.mrb[4].mxu1 %v1477_v10  ;;  %1706 = vmatpush3.bf16.msra.mxu0 %v1867_v14  ;;  %v1925_v10 = vld [vmem:[%s2381_s1 + $0x370] sm:$0xff]   ;;  %v1929_v14 = vld [vmem:[%s2381_s1 + $0x378] sm:$0xff]  }
  0x45   :  { %1728 = vmatpush3.bf16.msra.mxu1 %v1868_v15  ;;  %1707 = vmatprep.subr.bf16.mxu0 %v1869_v16  ;;  %v1930_v15 = vld [vmem:[%s2381_s1 + $0x3f8] sm:$0xff]  }
  0x46   :  { %1729 = vmatprep.subr.bf16.mxu1 %v1870_v17  ;;  %1298 = vmatprep.mubr.bf16.mxu0 %v1480_v47  ;;  %v1931_v16 = vld [vmem:[%s2381_s1 + $0x338] sm:$0xff]  }
  0x47   :  { %1338 = vmatprep.mubr.bf16.mxu1 %v1482_v49  ;;  %v1932_v17 = vld [vmem:[%s2381_s1 + $0x3b8] sm:$0xff]  }
  0x48   :  { %1708 = vmatpush3.bf16.msra.mxu0 %v1871_v18  ;;  %v24_v18 = vld [vmem:[%s2382_s0 + $0x30] sm:$0xff] }
  0x49   :  { %1730 = vmatpush3.bf16.msra.mxu1 %v1872_v19  ;;  %1709 = vmatprep.subr.bf16.mxu0 %v1873_v20  ;;  %v25_v19 = vld [vmem:[%s2382_s0 + $0x38] sm:$0xff]  ;;  %v1483_v20 = vcombine.low %v24_v18, %v24_v18 }
  0x4a   :  { %1731 = vmatprep.subr.bf16.mxu1 %v1874_v21  ;;  %v1484_v21 = vcombine.high %v24_v18, %v24_v18 }
  0x4c   :  { %1710 = vmatpush3.bf16.msra.mxu0 %v1875_v22  ;;  %v1485_v22 = vcombine.low %v25_v19, %v25_v19 }
  0x4d   :  { %1732 = vmatpush3.bf16.msra.mxu1 %v1876_v23  ;;  %1711 = vmatprep.subr.bf16.mxu0 %v1877_v24  ;;  %v1486_v23 = vcombine.high %v25_v19, %v25_v19 }
  0x4e   :  { %1733 = vmatprep.subr.bf16.mxu1 %v1878_v25 }
  0x50   :  { %1712 = vmatpush3.bf16.msra.mxu0 %v1879_v26 }
  0x51   :  { %1734 = vmatpush3.bf16.msra.mxu1 %v1880_v27  ;;  %1713 = vmatprep.subr.bf16.mxu0 %v1881_v28 }
  0x52   :  { %1735 = vmatprep.subr.bf16.mxu1 %v1882_v29 }
  0x54   :  { %1714 = vmatpush3.bf16.msra.mxu0 %v1883_v30 }
  0x55   :  { %1736 = vmatpush3.bf16.msra.mxu1 %v1884_v31  ;;  %1715 = vmatprep.subr.bf16.mxu0 %v1885_v32 }
  0x56   :  { %1737 = vmatprep.subr.bf16.mxu1 %v1886_v33 }
  0x58   :  { %1716 = vmatpush3.bf16.msra.mxu0 %v1887_v34 }
  0x59   :  { %1738 = vmatpush3.bf16.msra.mxu1 %v1888_v35  ;;  %1717 = vmatprep.subr.bf16.mxu0 %v1889_v36 }
  0x5a   :  { %1739 = vmatprep.subr.bf16.mxu1 %v1890_v37 }
  0x5c   :  { %1718 = vmatpush3.bf16.msra.mxu0 %v1891_v38 }
  0x5d   :  { %1740 = vmatpush3.bf16.msra.mxu1 %v1892_v39  ;;  %1719 = vmatprep.subr.bf16.mxu0 %v1893_v40 }
  0x5e   :  { %1741 = vmatprep.subr.bf16.mxu1 %v1894_v41 }
  0x60   :  { %1720 = vmatpush3.bf16.msra.mxu0 %v1895_v42 }
  0x61   :  { %1742 = vmatpush3.bf16.msra.mxu1 %v1896_v43  ;;  %1749 = vmatprep.subr.bf16.mxu0 %v1901_v50 }
  0x62   :  { %1771 = vmatprep.subr.bf16.mxu1 %v1902_v51 }
  0x63   :  { %1299 = vmatmul.mubr.bf16.vlgmr.msra.gmra.mrb[8].mxu0 %v1479_v46 }
  0x64   :  { %1339 = vmatmul.mubr.bf16.vlgmr.msra.gmra.mrb[8].mxu1 %v1481_v48  ;;  %1750 = vmatpush3.bf16.msra.mxu0 %v1903_v52 }
  0x65   :  { %1772 = vmatpush3.bf16.msra.mxu1 %v1904_v53  ;;  %1751 = vmatprep.subr.bf16.mxu0 %v1905_v54 }
  0x66   :  { %1773 = vmatprep.subr.bf16.mxu1 %v1906_v55  ;;  %1378 = vmatprep.mubr.bf16.mxu0 %v1484_v21 }
  0x67   :  { %1418 = vmatprep.mubr.bf16.mxu1 %v1486_v23 }
  0x68   :  { %1752 = vmatpush3.bf16.msra.mxu0 %v1907_v56 }
  0x69   :  { %1774 = vmatpush3.bf16.msra.mxu1 %v1908_v57  ;;  %1753 = vmatprep.subr.bf16.mxu0 %v1909_v58 }
  0x6a   :  { %1775 = vmatprep.subr.bf16.mxu1 %v1910_v59 }
  0x6c   :  { %1754 = vmatpush3.bf16.msra.mxu0 %v1911_v60 }
  0x6d   :  { %1776 = vmatpush3.bf16.msra.mxu1 %v1912_v61  ;;  %1755 = vmatprep.subr.bf16.mxu0 %v1913_v62 }
  0x6e   :  { %1777 = vmatprep.subr.bf16.mxu1 %v1914_v63 }
  0x70   :  { %1756 = vmatpush3.bf16.msra.mxu0 %v1915_v0 }
  0x71   :  { %1778 = vmatpush3.bf16.msra.mxu1 %v1916_v1  ;;  %1757 = vmatprep.subr.bf16.mxu0 %v1917_v2 }
  0x72   :  { %1779 = vmatprep.subr.bf16.mxu1 %v1918_v3 }
  0x74   :  { %1758 = vmatpush3.bf16.msra.mxu0 %v1919_v4 }
  0x75   :  { %1780 = vmatpush3.bf16.msra.mxu1 %v1920_v5  ;;  %1759 = vmatprep.subr.bf16.mxu0 %v1921_v6 }
  0x76   :  { %1781 = vmatprep.subr.bf16.mxu1 %v1922_v7 }
  0x78   :  { %1760 = vmatpush3.bf16.msra.mxu0 %v1923_v8 }
  0x79   :  { %1782 = vmatpush3.bf16.msra.mxu1 %v1924_v9  ;;  %1761 = vmatprep.subr.bf16.mxu0 %v1925_v10 }
  0x7a   :  { %1783 = vmatprep.subr.bf16.mxu1 %v1926_v11 }
  0x7c   :  { %1762 = vmatpush3.bf16.msra.mxu0 %v1927_v12 }
  0x7d   :  { %1784 = vmatpush3.bf16.msra.mxu1 %v1928_v13  ;;  %1763 = vmatprep.subr.bf16.mxu0 %v1929_v14 }
  0x7e   :  { %1785 = vmatprep.subr.bf16.mxu1 %v1930_v15 }
  0x80   :  { %1764 = vmatpush3.bf16.msra.mxu0 %v1931_v16 }
  0x81   :  { %1786 = vmatpush3.bf16.msra.mxu1 %v1932_v17 }
  0x83   :  { %1379 = vmatmul.mubr.bf16.vlgmr.msra.gmra.mrb[12].mxu0 %v1483_v20 }
  0x84   :  { %1419 = vmatmul.mubr.bf16.vlgmr.msra.gmra.mrb[12].mxu1 %v1485_v22 }
  0xf6   :  { %v1633_v24 = vpop.f32.mrb[0].mxu0 }
  0xf7   :  { %v1655_v25 = vpop.f32.mrb[0].mxu1  ;;  %v1634_v26 = vpop.f32.mrb[1].mxu0 }
  0xf8   :  { %v1656_v27 = vpop.f32.mrb[1].mxu1  ;;  %v1635_v28 = vadd.f32 %v1634_v26, %v1633_v24  ;;  %v1636_v30 = vpop.f32.mrb[2].mxu0 }
  0xf9   :  { %v1657_v29 = vadd.f32 %v1656_v27, %v1655_v25  ;;  %v1658_v31 = vpop.f32.mrb[2].mxu1  ;;  %v1637_v32 = vpop.f32.mrb[3].mxu0  ;;  %v1615_v25 = vld [vmem:[%s2383_s2] ss:$0 sm:$0xff] }
  0xfa   :  { %v1659_v33 = vpop.f32.mrb[3].mxu1  ;;  %v1616_v27 = vld [vmem:[%s2384_s3] ss:$0 sm:$0xff] }
  0xfb   :  { %v1181_v34 = vadd.f32 %v1657_v29, %v1635_v28 }
 0x116   :  { %v1677_v35 = vpop.f32.mrb[4].mxu0 }
 0x117   :  { %v1699_v36 = vpop.f32.mrb[4].mxu1  ;;  %v1678_v37 = vpop.f32.mrb[5].mxu0 }
 0x118   :  { %v1700_v38 = vpop.f32.mrb[5].mxu1  ;;  %v1679_v39 = vadd.f32 %v1678_v37, %v1677_v35  ;;  %v1680_v41 = vpop.f32.mrb[6].mxu0 }
 0x119   :  { %v1701_v40 = vadd.f32 %v1700_v38, %v1699_v36  ;;  %v1702_v42 = vpop.f32.mrb[6].mxu1  ;;  %v1681_v43 = vpop.f32.mrb[7].mxu0 }
 0x11a   :  { %v1703_v44 = vpop.f32.mrb[7].mxu1  ;;  %v1221_v45 = vadd.f32 %v1679_v39, %v1181_v34 }
 0x11c   :  { %v1261_v46 = vadd.f32 %v1701_v40, %v1221_v45 }
 0x136   :  { %v1721_v47 = vpop.f32.mrb[8].mxu0 }
 0x137   :  { %v1743_v48 = vpop.f32.mrb[8].mxu1  ;;  %v1722_v49 = vpop.f32.mrb[9].mxu0 }
 0x138   :  { %v1723_v50 = vadd.f32 %v1722_v49, %v1721_v47  ;;  %v1744_v51 = vpop.f32.mrb[9].mxu1  ;;  %v1724_v52 = vpop.f32.mrb[10].mxu0 }
 0x139   :  { %v1745_v53 = vadd.f32 %v1744_v51, %v1743_v48  ;;  %v1746_v54 = vpop.f32.mrb[10].mxu1  ;;  %v1725_v55 = vpop.f32.mrb[11].mxu0 }
 0x13a   :  { %v1301_v56 = vadd.f32 %v1723_v50, %v1261_v46  ;;  %v1747_v57 = vpop.f32.mrb[11].mxu1 }
 0x13c   :  { %v1341_v58 = vadd.f32 %v1745_v53, %v1301_v56 }
 0x156   :  { %v1765_v59 = vpop.f32.mrb[12].mxu0 }
 0x157   :  { %v1787_v60 = vpop.f32.mrb[12].mxu1  ;;  %v1766_v61 = vpop.f32.mrb[13].mxu0 }
 0x158   :  { %v1767_v62 = vadd.f32 %v1766_v61, %v1765_v59  ;;  %v1788_v63 = vpop.f32.mrb[13].mxu1  ;;  %v1768_v0 = vpop.f32.mrb[14].mxu0 }
 0x159   :  { %v1789_v1 = vadd.f32 %v1788_v63, %v1787_v60  ;;  %v1790_v2 = vpop.f32.mrb[14].mxu1  ;;  %v1769_v3 = vpop.f32.mrb[15].mxu0 }
 0x15a   :  { %v1381_v4 = vadd.f32 %v1767_v62, %v1341_v58  ;;  %v1791_v5 = vpop.f32.mrb[15].mxu1 }
 0x15c   :  { %v1421_v6 = vadd.f32 %v1789_v1, %v1381_v4 }
 0x15e   :  { %v1426_v7 = vrot.slane %v1421_v6, 4 }
 0x160   :  { %v1427_v8 = vadd.f32 %v1426_v7, %v1421_v6 }
 0x162   :  { %v1428_v9 = vrot.slane %v1427_v8, 2 }
 0x164   :  { %v1429_v10 = vadd.f32 %v1428_v9, %v1427_v8 }
 0x166   :  { %v1430_v11 = vrot.slane %v1429_v10, 1 }
 0x168   :  { %v1431_v12 = vadd.f32 %v1430_v11, %v1429_v10 }
 0x16a   :  { %v1433_v13 = vmul.f32 0.125, %v1431_v12 }
 0x16c   :  { %v1434_v14 = vsub.f32 %v1421_v6, %v1433_v13 }
 0x16e   :  { %v1435_v15 = vmul.f32 %v1434_v14, %v1434_v14 }
 0x170   :  { %v1436_v16 = vrot.slane %v1435_v15, 4 }
 0x172   :  { %v1437_v17 = vadd.f32 %v1436_v16, %v1435_v15 }
 0x174   :  { %v1438_v18 = vrot.slane %v1437_v17, 2 }
 0x176   :  { %v1439_v19 = vadd.f32 %v1438_v18, %v1437_v17 }
 0x178   :  { %v1440_v20 = vrot.slane %v1439_v19, 1 }
 0x17a   :  { %v1441_v21 = vadd.f32 %v1440_v20, %v1439_v19 }
 0x17c   :  { %v1442_v22 = vmul.f32 0.125, %v1441_v21 }
 0x17e   :  { %v1443_v23 = vadd.f32 1e-05, %v1442_v22 }
 0x180   :  { %1937 = vrsqrt.f32 %v1443_v23 }
 0x18a   :  { %v1938_v24 = vpop.eup %1937 }
 0x18b   :  { %v1445_v26 = vmul.f32 %v1938_v24, %v1434_v14 }
 0x18d   :  { %v1453_v28 = vmul.f32 %v1615_v25, %v1445_v26 }
 0x18f   :  { %v1461_v29 = vadd.f32 %v1616_v27, %v1453_v28 }
 0x191   :  { %vm1462_vm0 = vcmp.ge.f32.partialorder %v1461_v29, 0.0  ;;  %v1463_v30 = vmul.f32 0.2, %v1461_v29 }
 0x193   :  { %v1464_v31 = vsel %vm1462_vm0, %v1461_v29, %v1463_v30 }
 0x194   :  { %v1465_v32 = vpack.c.bf16 %v1464_v31, %v1464_v31 }
 0x196   :  { %1466 = vst [vmem:[%s2385_s4] sm:$0xf] %v1465_v32 }

// kernel: discriminator_forward.8
= control target key start
LH: loop header
LB: loop body
LE: loop exit
PB: predicated region body
PF: predicated region fallthrough
CT: control target
= control target key end

     0   :  { %v1967_v22 = vmov 1966171168   ;;  %v282_v24 = vlaneseq  ;;  %vm1480_vm0 = vcmask 1041408   ;;  %s2426_s1 = inlined_call_operand.vmem [shape: bf16[2048,128], index: 1, kind: input, shape index: {}]   ;;  %s2427_s0 = inlined_call_operand.vmem [shape: bf16[2,2048], index: 0, kind: input, shape index: {}]   ;;  %s2428_s2 = inlined_call_operand.vmem [shape: f32[1,128], index: 2, kind: input, shape index: {}]   ;;  %s2429_s3 = inlined_call_operand.vmem [shape: f32[1,128], index: 3, kind: input, shape index: {}]   ;;  %s2430_s4 = inlined_call_operand.vmem [shape: bf16[2,128], index: 4, kind: output, shape index: {}]  }
   0x1   :  { %v1835_v0 = vld [vmem:[%s2426_s1 + $0x40] sm:$0xff]   ;;  %v1839_v4 = vld [vmem:[%s2426_s1 + $0x48] sm:$0xff]   ;;  %v1843_v8 = vld [vmem:[%s2426_s1 + $0x50] sm:$0xff]   ;;  %v280_v23 = vunpack.c.l.s4 %v1967_v22 }
   0x2   :  { %v1836_v1 = vld [vmem:[%s2426_s1 + $0xc0] sm:$0xff]   ;;  %1658 = vmatprep.subr.bf16.mxu0 %v1835_v0  ;;  %v1840_v5 = vld [vmem:[%s2426_s1 + $0xc8] sm:$0xff]   ;;  %v1844_v9 = vld [vmem:[%s2426_s1 + $0xd0] sm:$0xff]   ;;  %v283_v30 = vshrl.u32 %v282_v24, 7 }
   0x3   :  { %v1837_v2 = vld [vmem:[%s2426_s1] sm:$0xff]   ;;  %1680 = vmatprep.subr.bf16.mxu1 %v1836_v1  ;;  %v1841_v6 = vld [vmem:[%s2426_s1 + $0x8] sm:$0xff]   ;;  %v1845_v10 = vld [vmem:[%s2426_s1 + $0x10] sm:$0xff]   ;;  %v281_v29 = vunpack.c.0.s8 %v280_v23 }
   0x4   :  { %v1838_v3 = vld [vmem:[%s2426_s1 + $0x80] sm:$0xff]   ;;  %1659 = vmatpush3.bf16.msra.mxu0 %v1837_v2  ;;  %v1842_v7 = vld [vmem:[%s2426_s1 + $0x88] sm:$0xff]   ;;  %v1846_v11 = vld [vmem:[%s2426_s1 + $0x90] sm:$0xff]  }
   0x5   :  { %1681 = vmatpush3.bf16.msra.mxu1 %v1838_v3  ;;  %1660 = vmatprep.subr.bf16.mxu0 %v1839_v4  ;;  %v1847_v12 = vld [vmem:[%s2426_s1 + $0x58] sm:$0xff]   ;;  %v1851_v16 = vld [vmem:[%s2426_s1 + $0x60] sm:$0xff]   ;;  %v1855_v20 = vld [vmem:[%s2426_s1 + $0x68] sm:$0xff]   ;;  %v2083_v35 = vsub.s32 %v281_v29, %v283_v30 }
   0x6   :  { %1682 = vmatprep.subr.bf16.mxu1 %v1840_v5  ;;  %v1848_v13 = vld [vmem:[%s2426_s1 + $0xd8] sm:$0xff]   ;;  %v1852_v17 = vld [vmem:[%s2426_s1 + $0xe0] sm:$0xff]   ;;  %v1856_v21 = vld [vmem:[%s2426_s1 + $0xe8] sm:$0xff]  }
   0x7   :  { %v1849_v14 = vld [vmem:[%s2426_s1 + $0x18] sm:$0xff]   ;;  %v1853_v18 = vld [vmem:[%s2426_s1 + $0x20] sm:$0xff]   ;;  %v1857_v25 = vld [vmem:[%s2426_s1 + $0x28] sm:$0xff]  }
   0x8   :  { %1661 = vmatpush3.bf16.msra.mxu0 %v1841_v6  ;;  %v1850_v15 = vld [vmem:[%s2426_s1 + $0x98] sm:$0xff]   ;;  %v1854_v19 = vld [vmem:[%s2426_s1 + $0xa0] sm:$0xff]   ;;  %v1858_v26 = vld [vmem:[%s2426_s1 + $0xa8] sm:$0xff]  }
   0x9   :  { %1683 = vmatpush3.bf16.msra.mxu1 %v1842_v7  ;;  %1662 = vmatprep.subr.bf16.mxu0 %v1843_v8  ;;  %v1859_v27 = vld [vmem:[%s2426_s1 + $0x70] sm:$0xff]   ;;  %v1863_v33 = vld [vmem:[%s2426_s1 + $0x78] sm:$0xff]   ;;  %v18_v38 = vld [vmem:[%s2427_s0] sm:$0xff] }
   0xa   :  { %1684 = vmatprep.subr.bf16.mxu1 %v1844_v9  ;;  %v1860_v28 = vld [vmem:[%s2426_s1 + $0xf0] sm:$0xff]   ;;  %v1864_v34 = vld [vmem:[%s2426_s1 + $0xf8] sm:$0xff]   ;;  %v278_v39 = vcombine.high %v18_v38, %v18_v38  ;;  %v285_v40 = vrot.slane %v18_v38, %v2083_v35  ;;  %v1869_v41 = vld [vmem:[%s2426_s1 + $0x140] sm:$0xff]  }
   0xb   :  { %v1861_v31 = vld [vmem:[%s2426_s1 + $0x30] sm:$0xff]   ;;  %v1865_v36 = vld [vmem:[%s2426_s1 + $0x38] sm:$0xff]   ;;  %v1870_v42 = vld [vmem:[%s2426_s1 + $0x1c0] sm:$0xff]  }
   0xc   :  { %1663 = vmatpush3.bf16.msra.mxu0 %v1845_v10  ;;  %v1862_v32 = vld [vmem:[%s2426_s1 + $0xb0] sm:$0xff]   ;;  %v1866_v37 = vld [vmem:[%s2426_s1 + $0xb8] sm:$0xff]   ;;  %v293_v43 = vcombine.high %v285_v40, %v285_v40  ;;  %v301_v44 = vrot.slane %v285_v40, %v2083_v35  ;;  %v2103_v45 = vrot.slane %v278_v39, %v2083_v35  ;;  %v1871_v47 = vld [vmem:[%s2426_s1 + $0x100] sm:$0xff]  }
   0xd   :  { %1685 = vmatpush3.bf16.msra.mxu1 %v1846_v11  ;;  %1664 = vmatprep.subr.bf16.mxu0 %v1847_v12  ;;  %v1873_v50 = vld [vmem:[%s2426_s1 + $0x148] sm:$0xff]   ;;  %v1872_v52 = vld [vmem:[%s2426_s1 + $0x180] sm:$0xff]   ;;  %v1877_v57 = vld [vmem:[%s2426_s1 + $0x150] sm:$0xff]  }
   0xe   :  { %1686 = vmatprep.subr.bf16.mxu1 %v1848_v13  ;;  %v315_v46 = vrot.slane %v293_v43, %v2083_v35  ;;  %v294_v48 = vcombine.high %v2103_v45, %v2103_v45  ;;  %v323_v49 = vcombine.high %v301_v44, %v301_v44  ;;  %v1874_v54 = vld [vmem:[%s2426_s1 + $0x1c8] sm:$0xff]   ;;  %v1878_v59 = vld [vmem:[%s2426_s1 + $0x1d0] sm:$0xff]   ;;  %v1881_v61 = vld [vmem:[%s2426_s1 + $0x158] sm:$0xff]  }
   0xf   :  { %v1875_v55 = vld [vmem:[%s2426_s1 + $0x108] sm:$0xff]   ;;  %v1879_v60 = vld [vmem:[%s2426_s1 + $0x110] sm:$0xff]   ;;  %v1882_v63 = vld [vmem:[%s2426_s1 + $0x1d8] sm:$0xff]  }
  0x10   :  { %1665 = vmatpush3.bf16.msra.mxu0 %v1849_v14  ;;  %1192 = vmatprep.mubr.bf16.mxu0 %v315_v46  ;;  %v325_v51 = vcombine.high %v315_v46, %v315_v46  ;;  %v322_v53 = vrot.slane %v294_v48, %v2083_v35  ;;  %v1876_v58 = vld [vmem:[%s2426_s1 + $0x188] sm:$0xff]   ;;  %v1880_v62 = vld [vmem:[%s2426_s1 + $0x190] sm:$0xff]   ;;  %v1883_v0 = vld [vmem:[%s2426_s1 + $0x118] sm:$0xff]  }
  0x11   :  { %1687 = vmatpush3.bf16.msra.mxu1 %v1850_v15  ;;  %1666 = vmatprep.subr.bf16.mxu0 %v1851_v16  ;;  %v1885_v1 = vld [vmem:[%s2426_s1 + $0x160] sm:$0xff]   ;;  %v1884_v2 = vld [vmem:[%s2426_s1 + $0x198] sm:$0xff]   ;;  %v2163_v5 = vld [vmem:[%s2427_s0 + $0x8] sm:$0xff] }
  0x12   :  { %1688 = vmatprep.subr.bf16.mxu1 %v1852_v17  ;;  %1232 = vmatprep.mubr.bf16.mxu1 %v325_v51  ;;  %v326_v56 = vcombine.high %v322_v53, %v322_v53  ;;  %v1886_v3 = vld [vmem:[%s2426_s1 + $0x1e0] sm:$0xff]   ;;  %v1889_v6 = vld [vmem:[%s2426_s1 + $0x168] sm:$0xff]   ;;  %v1893_v10 = vld [vmem:[%s2426_s1 + $0x170] sm:$0xff]   ;;  %v2185_v12 = vrot.slane %v2163_v5, %v2083_v35  ;;  %v327_v46 = vcombine.high %v2163_v5, %v2163_v5 }
  0x13   :  { %v1887_v4 = vld [vmem:[%s2426_s1 + $0x120] sm:$0xff]   ;;  %v1890_v8 = vld [vmem:[%s2426_s1 + $0x1e8] sm:$0xff]   ;;  %v1894_v13 = vld [vmem:[%s2426_s1 + $0x1f0] sm:$0xff]  }
  0x14   :  { %1667 = vmatpush3.bf16.msra.mxu0 %v1853_v18  ;;  %v1888_v7 = vld [vmem:[%s2426_s1 + $0x1a0] sm:$0xff]   ;;  %v1891_v9 = vld [vmem:[%s2426_s1 + $0x128] sm:$0xff]   ;;  %v1895_v14 = vld [vmem:[%s2426_s1 + $0x130] sm:$0xff]   ;;  %v342_v17 = vcombine.high %v2185_v12, %v2185_v12 }
  0x15   :  { %1689 = vmatpush3.bf16.msra.mxu1 %v1854_v19  ;;  %1668 = vmatprep.subr.bf16.mxu0 %v1855_v20  ;;  %v1892_v11 = vld [vmem:[%s2426_s1 + $0x1a8] sm:$0xff]   ;;  %v1897_v15 = vld [vmem:[%s2426_s1 + $0x178] sm:$0xff]   ;;  %v1896_v16 = vld [vmem:[%s2426_s1 + $0x1b0] sm:$0xff]   ;;  %v308_v20 = vrot.slane %v2103_v45, %v2083_v35 }
  0x16   :  { %1690 = vmatprep.subr.bf16.mxu1 %v1856_v21  ;;  %v1898_v18 = vld [vmem:[%s2426_s1 + $0x1f8] sm:$0xff]   ;;  %v1901_v21 = vld [vmem:[%s2426_s1 + $0x240] sm:$0xff]   ;;  %v364_v23 = vrot.slane %v342_v17, %v2083_v35  ;;  %v1906_v30 = vld [vmem:[%s2426_s1 + $0x2c8] sm:$0xff]  }
  0x17   :  { %v1899_v19 = vld [vmem:[%s2426_s1 + $0x138] sm:$0xff]   ;;  %v1902_v24 = vld [vmem:[%s2426_s1 + $0x2c0] sm:$0xff]   ;;  %v1912_v38 = vld [vmem:[%s2426_s1 + $0x290] sm:$0xff]  }
  0x18   :  { %1669 = vmatpush3.bf16.msra.mxu0 %v1857_v25  ;;  %v1900_v22 = vld [vmem:[%s2426_s1 + $0x1b8] sm:$0xff]   ;;  %v1903_v25 = vld [vmem:[%s2426_s1 + $0x200] sm:$0xff]   ;;  %v374_v29 = vcombine.high %v364_v23, %v364_v23  ;;  %v1921_v45 = vld [vmem:[%s2426_s1 + $0x268] sm:$0xff]  }
  0x19   :  { %1691 = vmatpush3.bf16.msra.mxu1 %v1858_v26  ;;  %1670 = vmatprep.subr.bf16.mxu0 %v1859_v27  ;;  %v324_v26 = vcombine.high %v308_v20, %v308_v20  ;;  %v1905_v27 = vld [vmem:[%s2426_s1 + $0x248] sm:$0xff]   ;;  %v1914_v39 = vld [vmem:[%s2426_s1 + $0x2d8] sm:$0xff]   ;;  %v1918_v43 = vld [vmem:[%s2426_s1 + $0x2e0] sm:$0xff]  }
  0x1a   :  { %1692 = vmatprep.subr.bf16.mxu1 %v1860_v28  ;;  %v1904_v28 = vld [vmem:[%s2426_s1 + $0x280] sm:$0xff]   ;;  %v1915_v40 = vld [vmem:[%s2426_s1 + $0x218] sm:$0xff]   ;;  %v1922_v48 = vld [vmem:[%s2426_s1 + $0x2e8] sm:$0xff]  }
  0x1b   :  { %v1924_v51 = vld [vmem:[%s2426_s1 + $0x2a8] sm:$0xff]   ;;  %v1948_v17 = vld [vmem:[%s2426_s1 + $0x398] sm:$0xff]  }
  0x1c   :  { %1671 = vmatpush3.bf16.msra.mxu0 %v1861_v31  ;;  %v1907_v31 = vld [vmem:[%s2426_s1 + $0x208] sm:$0xff]  }
  0x1d   :  { %1693 = vmatpush3.bf16.msra.mxu1 %v1862_v32  ;;  %1672 = vmatprep.subr.bf16.mxu0 %v1863_v33  ;;  %v1909_v32 = vld [vmem:[%s2426_s1 + $0x250] sm:$0xff]   ;;  %v1908_v33 = vld [vmem:[%s2426_s1 + $0x288] sm:$0xff]  }
  0x1e   :  { %1694 = vmatprep.subr.bf16.mxu1 %v1864_v34  ;;  %v1910_v34 = vld [vmem:[%s2426_s1 + $0x2d0] sm:$0xff]  }
  0x20   :  { %1673 = vmatpush3.bf16.msra.mxu0 %v1865_v36  ;;  %v1911_v36 = vld [vmem:[%s2426_s1 + $0x210] sm:$0xff]  }
  0x21   :  { %1695 = vmatpush3.bf16.msra.mxu1 %v1866_v37  ;;  %1702 = vmatprep.subr.bf16.mxu0 %v1869_v41  ;;  %v1913_v37 = vld [vmem:[%s2426_s1 + $0x258] sm:$0xff]   ;;  %v1917_v41 = vld [vmem:[%s2426_s1 + $0x260] sm:$0xff]  }
  0x22   :  { %1724 = vmatprep.subr.bf16.mxu1 %v1870_v42  ;;  %v1916_v42 = vld [vmem:[%s2426_s1 + $0x298] sm:$0xff]  }
  0x23   :  { %1193 = vmatmul.mubr.bf16.vlgmr.msra.gmra.mrb[0].mxu0 %v301_v44  ;;  %v1919_v44 = vld [vmem:[%s2426_s1 + $0x220] sm:$0xff]  }
  0x24   :  { %1703 = vmatpush3.bf16.msra.mxu0 %v1871_v47  ;;  %1233 = vmatmul.mubr.bf16.vlgmr.msra.gmra.mrb[0].mxu1 %v323_v49  ;;  %v1920_v47 = vld [vmem:[%s2426_s1 + $0x2a0] sm:$0xff]   ;;  %v1923_v49 = vld [vmem:[%s2426_s1 + $0x228] sm:$0xff]  }
  0x25   :  { %1704 = vmatprep.subr.bf16.mxu0 %v1873_v50  ;;  %1725 = vmatpush3.bf16.msra.mxu1 %v1872_v52  ;;  %v1925_v50 = vld [vmem:[%s2426_s1 + $0x270] sm:$0xff]   ;;  %v2291_v52 = vrot.slane %v327_v46, %v2083_v35 }
  0x26   :  { %1272 = vmatprep.mubr.bf16.mxu0 %v322_v53  ;;  %1726 = vmatprep.subr.bf16.mxu1 %v1874_v54  ;;  %v1926_v53 = vld [vmem:[%s2426_s1 + $0x2f0] sm:$0xff]  }
  0x27   :  { %1312 = vmatprep.mubr.bf16.mxu1 %v326_v56  ;;  %v1927_v54 = vld [vmem:[%s2426_s1 + $0x230] sm:$0xff]  }
  0x28   :  { %1705 = vmatpush3.bf16.msra.mxu0 %v1875_v55  ;;  %v1929_v55 = vld [vmem:[%s2426_s1 + $0x278] sm:$0xff]   ;;  %v1928_v56 = vld [vmem:[%s2426_s1 + $0x2b0] sm:$0xff]  }
  0x29   :  { %1706 = vmatprep.subr.bf16.mxu0 %v1877_v57  ;;  %1727 = vmatpush3.bf16.msra.mxu1 %v1876_v58  ;;  %v343_v57 = vcombine.high %v2291_v52, %v2291_v52  ;;  %v1930_v58 = vld [vmem:[%s2426_s1 + $0x2f8] sm:$0xff]  }
  0x2a   :  { %1728 = vmatprep.subr.bf16.mxu1 %v1878_v59  ;;  %v1931_v59 = vld [vmem:[%s2426_s1 + $0x238] sm:$0xff]  }
  0x2c   :  { %1707 = vmatpush3.bf16.msra.mxu0 %v1879_v60  ;;  %v350_v60 = vrot.slane %v2185_v12, %v2083_v35  ;;  %v1945_v12 = vld [vmem:[%s2426_s1 + $0x358] sm:$0xff]  }
  0x2d   :  { %1708 = vmatprep.subr.bf16.mxu0 %v1881_v61  ;;  %1729 = vmatpush3.bf16.msra.mxu1 %v1880_v62  ;;  %v1933_v61 = vld [vmem:[%s2426_s1 + $0x340] sm:$0xff]   ;;  %v1932_v62 = vld [vmem:[%s2426_s1 + $0x2b8] sm:$0xff]  }
  0x2e   :  { %1730 = vmatprep.subr.bf16.mxu1 %v1882_v63  ;;  %v371_v63 = vrot.slane %v343_v57, %v2083_v35 }
  0x30   :  { %1709 = vmatpush3.bf16.msra.mxu0 %v1883_v0  ;;  %v1934_v0 = vld [vmem:[%s2426_s1 + $0x3c0] sm:$0xff]   ;;  %v375_v5 = vcombine.high %v371_v63, %v371_v63 }
  0x31   :  { %1710 = vmatprep.subr.bf16.mxu0 %v1885_v1  ;;  %1731 = vmatpush3.bf16.msra.mxu1 %v1884_v2  ;;  %v1935_v1 = vld [vmem:[%s2426_s1 + $0x300] sm:$0xff]   ;;  %v372_v2 = vcombine.high %v350_v60, %v350_v60 }
  0x32   :  { %1732 = vmatprep.subr.bf16.mxu1 %v1886_v3  ;;  %v1937_v3 = vld [vmem:[%s2426_s1 + $0x348] sm:$0xff]  }
  0x34   :  { %1711 = vmatpush3.bf16.msra.mxu0 %v1887_v4  ;;  %v1936_v4 = vld [vmem:[%s2426_s1 + $0x380] sm:$0xff]  }
  0x35   :  { %1712 = vmatprep.subr.bf16.mxu0 %v1889_v6  ;;  %1733 = vmatpush3.bf16.msra.mxu1 %v1888_v7  ;;  %v1938_v6 = vld [vmem:[%s2426_s1 + $0x3c8] sm:$0xff]  }
  0x36   :  { %1734 = vmatprep.subr.bf16.mxu1 %v1890_v8  ;;  %v1939_v7 = vld [vmem:[%s2426_s1 + $0x308] sm:$0xff]   ;;  %v1941_v8 = vld [vmem:[%s2426_s1 + $0x350] sm:$0xff]  }
  0x38   :  { %1713 = vmatpush3.bf16.msra.mxu0 %v1891_v9  ;;  %v1940_v9 = vld [vmem:[%s2426_s1 + $0x388] sm:$0xff]  }
  0x39   :  { %1714 = vmatprep.subr.bf16.mxu0 %v1893_v10  ;;  %1735 = vmatpush3.bf16.msra.mxu1 %v1892_v11  ;;  %v1942_v10 = vld [vmem:[%s2426_s1 + $0x3d0] sm:$0xff]  }
  0x3a   :  { %1736 = vmatprep.subr.bf16.mxu1 %v1894_v13  ;;  %v1943_v11 = vld [vmem:[%s2426_s1 + $0x310] sm:$0xff]  }
  0x3b   :  { %v1944_v13 = vld [vmem:[%s2426_s1 + $0x390] sm:$0xff]  }
  0x3c   :  { %1715 = vmatpush3.bf16.msra.mxu0 %v1895_v14  ;;  %v1946_v14 = vld [vmem:[%s2426_s1 + $0x3d8] sm:$0xff]  }
  0x3d   :  { %1716 = vmatprep.subr.bf16.mxu0 %v1897_v15  ;;  %1737 = vmatpush3.bf16.msra.mxu1 %v1896_v16  ;;  %v1947_v15 = vld [vmem:[%s2426_s1 + $0x318] sm:$0xff]   ;;  %v1949_v16 = vld [vmem:[%s2426_s1 + $0x360] sm:$0xff]  }
  0x3e   :  { %1738 = vmatprep.subr.bf16.mxu1 %v1898_v18  ;;  %v1950_v18 = vld [vmem:[%s2426_s1 + $0x3e0] sm:$0xff]  }
  0x40   :  { %1717 = vmatpush3.bf16.msra.mxu0 %v1899_v19  ;;  %v1951_v19 = vld [vmem:[%s2426_s1 + $0x320] sm:$0xff]  }
  0x41   :  { %1746 = vmatprep.subr.bf16.mxu0 %v1901_v21  ;;  %1739 = vmatpush3.bf16.msra.mxu1 %v1900_v22  ;;  %v1952_v21 = vld [vmem:[%s2426_s1 + $0x3a0] sm:$0xff]   ;;  %v1954_v22 = vld [vmem:[%s2426_s1 + $0x3e8] sm:$0xff]  }
  0x42   :  { %1768 = vmatprep.subr.bf16.mxu1 %v1902_v24  ;;  %v1957_v24 = vld [vmem:[%s2426_s1 + $0x370] sm:$0xff]  }
  0x43   :  { %1273 = vmatmul.mubr.bf16.vlgmr.msra.gmra.mrb[4].mxu0 %v308_v20  ;;  %v1953_v20 = vld [vmem:[%s2426_s1 + $0x368] sm:$0xff]  }
  0x44   :  { %1747 = vmatpush3.bf16.msra.mxu0 %v1903_v25  ;;  %1352 = vmatprep.mubr.bf16.mxu0 %v364_v23  ;;  %v1955_v23 = vld [vmem:[%s2426_s1 + $0x328] sm:$0xff]  }
  0x45   :  { %1313 = vmatmul.mubr.bf16.vlgmr.msra.gmra.mrb[4].mxu1 %v324_v26  ;;  %1748 = vmatprep.subr.bf16.mxu0 %v1905_v27  ;;  %v1956_v25 = vld [vmem:[%s2426_s1 + $0x3a8] sm:$0xff]   ;;  %v1958_v26 = vld [vmem:[%s2426_s1 + $0x3f0] sm:$0xff]  }
  0x46   :  { %1769 = vmatpush3.bf16.msra.mxu1 %v1904_v28  ;;  %1392 = vmatprep.mubr.bf16.mxu1 %v374_v29  ;;  %v1959_v27 = vld [vmem:[%s2426_s1 + $0x330] sm:$0xff]   ;;  %v1961_v28 = vld [vmem:[%s2426_s1 + $0x378] sm:$0xff]  }
  0x47   :  { %1770 = vmatprep.subr.bf16.mxu1 %v1906_v30  ;;  %v1960_v29 = vld [vmem:[%s2426_s1 + $0x3b0] sm:$0xff]   ;;  %v1962_v30 = vld [vmem:[%s2426_s1 + $0x3f8] sm:$0xff]  }
  0x48   :  { %1749 = vmatpush3.bf16.msra.mxu0 %v1907_v31  ;;  %v1963_v31 = vld [vmem:[%s2426_s1 + $0x338] sm:$0xff]  }
  0x49   :  { %1750 = vmatprep.subr.bf16.mxu0 %v1909_v32  ;;  %v357_v32 = vrot.slane %v2291_v52, %v2083_v35 }
  0x4a   :  { %1771 = vmatpush3.bf16.msra.mxu1 %v1908_v33  ;;  %v1964_v33 = vld [vmem:[%s2426_s1 + $0x3b8] sm:$0xff]  }
  0x4b   :  { %1772 = vmatprep.subr.bf16.mxu1 %v1910_v34  ;;  %v373_v34 = vcombine.high %v357_v32, %v357_v32 }
  0x4c   :  { %1751 = vmatpush3.bf16.msra.mxu0 %v1911_v36 }
  0x4d   :  { %1752 = vmatprep.subr.bf16.mxu0 %v1913_v37 }
  0x4e   :  { %1773 = vmatpush3.bf16.msra.mxu1 %v1912_v38 }
  0x4f   :  { %1774 = vmatprep.subr.bf16.mxu1 %v1914_v39 }
  0x50   :  { %1753 = vmatpush3.bf16.msra.mxu0 %v1915_v40 }
  0x51   :  { %1754 = vmatprep.subr.bf16.mxu0 %v1917_v41 }
  0x52   :  { %1775 = vmatpush3.bf16.msra.mxu1 %v1916_v42 }
  0x53   :  { %1776 = vmatprep.subr.bf16.mxu1 %v1918_v43 }
  0x54   :  { %1755 = vmatpush3.bf16.msra.mxu0 %v1919_v44 }
  0x55   :  { %1756 = vmatprep.subr.bf16.mxu0 %v1921_v45 }
  0x56   :  { %1777 = vmatpush3.bf16.msra.mxu1 %v1920_v47 }
  0x57   :  { %1778 = vmatprep.subr.bf16.mxu1 %v1922_v48 }
  0x58   :  { %1757 = vmatpush3.bf16.msra.mxu0 %v1923_v49 }
  0x59   :  { %1758 = vmatprep.subr.bf16.mxu0 %v1925_v50 }
  0x5a   :  { %1779 = vmatpush3.bf16.msra.mxu1 %v1924_v51 }
  0x5b   :  { %1780 = vmatprep.subr.bf16.mxu1 %v1926_v53 }
  0x5c   :  { %1759 = vmatpush3.bf16.msra.mxu0 %v1927_v54 }
  0x5d   :  { %1760 = vmatprep.subr.bf16.mxu0 %v1929_v55 }
  0x5e   :  { %1781 = vmatpush3.bf16.msra.mxu1 %v1928_v56 }
  0x5f   :  { %1782 = vmatprep.subr.bf16.mxu1 %v1930_v58 }
  0x60   :  { %1761 = vmatpush3.bf16.msra.mxu0 %v1931_v59 }
  0x61   :  { %1790 = vmatprep.subr.bf16.mxu0 %v1933_v61 }
  0x62   :  { %1783 = vmatpush3.bf16.msra.mxu1 %v1932_v62 }
  0x63   :  { %1353 = vmatmul.mubr.bf16.vlgmr.msra.gmra.mrb[8].mxu0 %v350_v60  ;;  %1812 = vmatprep.subr.bf16.mxu1 %v1934_v0 }
  0x64   :  { %1791 = vmatpush3.bf16.msra.mxu0 %v1935_v1  ;;  %1432 = vmatprep.mubr.bf16.mxu0 %v371_v63 }
  0x65   :  { %1393 = vmatmul.mubr.bf16.vlgmr.msra.gmra.mrb[8].mxu1 %v372_v2  ;;  %1792 = vmatprep.subr.bf16.mxu0 %v1937_v3 }
  0x66   :  { %1813 = vmatpush3.bf16.msra.mxu1 %v1936_v4  ;;  %1472 = vmatprep.mubr.bf16.mxu1 %v375_v5 }
  0x67   :  { %1814 = vmatprep.subr.bf16.mxu1 %v1938_v6 }
  0x68   :  { %1793 = vmatpush3.bf16.msra.mxu0 %v1939_v7 }
  0x69   :  { %1794 = vmatprep.subr.bf16.mxu0 %v1941_v8 }
  0x6a   :  { %1815 = vmatpush3.bf16.msra.mxu1 %v1940_v9 }
  0x6b   :  { %1816 = vmatprep.subr.bf16.mxu1 %v1942_v10 }
  0x6c   :  { %1795 = vmatpush3.bf16.msra.mxu0 %v1943_v11 }
  0x6d   :  { %1796 = vmatprep.subr.bf16.mxu0 %v1945_v12 }
  0x6e   :  { %1817 = vmatpush3.bf16.msra.mxu1 %v1944_v13 }
  0x6f   :  { %1818 = vmatprep.subr.bf16.mxu1 %v1946_v14 }
  0x70   :  { %1797 = vmatpush3.bf16.msra.mxu0 %v1947_v15 }
  0x71   :  { %1798 = vmatprep.subr.bf16.mxu0 %v1949_v16 }
  0x72   :  { %1819 = vmatpush3.bf16.msra.mxu1 %v1948_v17 }
  0x73   :  { %1820 = vmatprep.subr.bf16.mxu1 %v1950_v18 }
  0x74   :  { %1799 = vmatpush3.bf16.msra.mxu0 %v1951_v19 }
  0x75   :  { %1800 = vmatprep.subr.bf16.mxu0 %v1953_v20 }
  0x76   :  { %1821 = vmatpush3.bf16.msra.mxu1 %v1952_v21 }
  0x77   :  { %1822 = vmatprep.subr.bf16.mxu1 %v1954_v22 }
  0x78   :  { %1801 = vmatpush3.bf16.msra.mxu0 %v1955_v23 }
  0x79   :  { %1802 = vmatprep.subr.bf16.mxu0 %v1957_v24 }
  0x7a   :  { %1823 = vmatpush3.bf16.msra.mxu1 %v1956_v25 }
  0x7b   :  { %1824 = vmatprep.subr.bf16.mxu1 %v1958_v26 }
  0x7c   :  { %1803 = vmatpush3.bf16.msra.mxu0 %v1959_v27 }
  0x7d   :  { %1804 = vmatprep.subr.bf16.mxu0 %v1961_v28 }
  0x7e   :  { %1825 = vmatpush3.bf16.msra.mxu1 %v1960_v29 }
  0x7f   :  { %1826 = vmatprep.subr.bf16.mxu1 %v1962_v30 }
  0x80   :  { %1805 = vmatpush3.bf16.msra.mxu0 %v1963_v31 }
  0x82   :  { %1827 = vmatpush3.bf16.msra.mxu1 %v1964_v33 }
  0x83   :  { %1433 = vmatmul.mubr.bf16.vlgmr.msra.gmra.mrb[12].mxu0 %v357_v32 }
  0x85   :  { %1473 = vmatmul.mubr.bf16.vlgmr.msra.gmra.mrb[12].mxu1 %v373_v34 }
  0xf6   :  { %v1674_v36 = vpop.f32.mrb[0].mxu0 }
  0xf7   :  { %v1675_v37 = vpop.f32.mrb[1].mxu0  ;;  %v1696_v38 = vpop.f32.mrb[0].mxu1 }
  0xf8   :  { %v1676_v39 = vadd.f32 %v1675_v37, %v1674_v36  ;;  %v1677_v40 = vpop.f32.mrb[2].mxu0  ;;  %v1697_v41 = vpop.f32.mrb[1].mxu1 }
  0xf9   :  { %v1678_v42 = vpop.f32.mrb[3].mxu0  ;;  %v1698_v43 = vadd.f32 %v1697_v41, %v1696_v38  ;;  %v1699_v35 = vpop.f32.mrb[2].mxu1  ;;  %v1657_v41 = vld [vmem:[%s2429_s3] ss:$0 sm:$0xff] }
  0xfa   :  { %v1700_v44 = vpop.f32.mrb[3].mxu1 }
  0xfb   :  { %v1235_v45 = vadd.f32 %v1698_v43, %v1676_v39  ;;  %v1656_v39 = vld [vmem:[%s2428_s2] ss:$0 sm:$0xff] }
 0x116   :  { %v1718_v46 = vpop.f32.mrb[4].mxu0 }
 0x117   :  { %v1719_v47 = vpop.f32.mrb[5].mxu0 }
 0x118   :  { %v1740_v48 = vpop.f32.mrb[4].mxu1  ;;  %v1720_v49 = vadd.f32 %v1719_v47, %v1718_v46  ;;  %v1721_v50 = vpop.f32.mrb[6].mxu0 }
 0x119   :  { %v1741_v51 = vpop.f32.mrb[5].mxu1  ;;  %v1722_v52 = vpop.f32.mrb[7].mxu0 }
 0x11a   :  { %v1275_v53 = vadd.f32 %v1720_v49, %v1235_v45  ;;  %v1742_v54 = vadd.f32 %v1741_v51, %v1740_v48  ;;  %v1743_v55 = vpop.f32.mrb[6].mxu1 }
 0x11b   :  { %v1744_v56 = vpop.f32.mrb[7].mxu1 }
 0x11c   :  { %v1315_v57 = vadd.f32 %v1742_v54, %v1275_v53 }
 0x136   :  { %v1762_v58 = vpop.f32.mrb[8].mxu0 }
 0x137   :  { %v1763_v59 = vpop.f32.mrb[9].mxu0 }
 0x138   :  { %v1784_v60 = vpop.f32.mrb[8].mxu1  ;;  %v1764_v61 = vadd.f32 %v1763_v59, %v1762_v58  ;;  %v1765_v62 = vpop.f32.mrb[10].mxu0 }
 0x139   :  { %v1785_v63 = vpop.f32.mrb[9].mxu1  ;;  %v1766_v0 = vpop.f32.mrb[11].mxu0 }
 0x13a   :  { %v1355_v1 = vadd.f32 %v1764_v61, %v1315_v57  ;;  %v1786_v2 = vadd.f32 %v1785_v63, %v1784_v60  ;;  %v1787_v3 = vpop.f32.mrb[10].mxu1 }
 0x13b   :  { %v1788_v4 = vpop.f32.mrb[11].mxu1 }
 0x13c   :  { %v1395_v5 = vadd.f32 %v1786_v2, %v1355_v1 }
 0x156   :  { %v1806_v6 = vpop.f32.mrb[12].mxu0 }
 0x157   :  { %v1807_v7 = vpop.f32.mrb[13].mxu0 }
 0x158   :  { %v1828_v8 = vpop.f32.mrb[12].mxu1  ;;  %v1808_v9 = vadd.f32 %v1807_v7, %v1806_v6  ;;  %v1809_v10 = vpop.f32.mrb[14].mxu0 }
 0x159   :  { %v1829_v11 = vpop.f32.mrb[13].mxu1  ;;  %v1810_v12 = vpop.f32.mrb[15].mxu0 }
 0x15a   :  { %v1435_v13 = vadd.f32 %v1808_v9, %v1395_v5  ;;  %v1830_v14 = vadd.f32 %v1829_v11, %v1828_v8  ;;  %v1831_v15 = vpop.f32.mrb[14].mxu1 }
 0x15b   :  { %v1832_v16 = vpop.f32.mrb[15].mxu1 }
 0x15c   :  { %v1475_v17 = vadd.f32 %v1830_v14, %v1435_v13 }
 0x15e   :  { %v1481_v18 = vsel %vm1480_vm0, %v1475_v17, 0.0 }
 0x15f   :  { %v1482_v19 = vrot.slane %v1481_v18, 4 }
 0x161   :  { %v1483_v20 = vadd.f32 %v1482_v19, %v1481_v18 }
 0x163   :  { %v1484_v21 = vrot.slane %v1483_v20, 2 }
 0x165   :  { %v1485_v22 = vadd.f32 %v1484_v21, %v1483_v20 }
 0x167   :  { %v1486_v23 = vrot.slane %v1485_v22, 1 }
 0x169   :  { %v1487_v24 = vadd.f32 %v1486_v23, %v1485_v22 }
 0x16b   :  { %v1489_v25 = vmul.f32 0.5, %v1487_v24 }
 0x16d   :  { %v1490_v26 = vsub.f32 %v1475_v17, %v1489_v25 }
 0x16f   :  { %v1491_v27 = vmul.f32 %v1490_v26, %v1490_v26 }
 0x171   :  { %v1492_v28 = vsel %vm1480_vm0, %v1491_v27, 0.0 }
 0x172   :  { %v1493_v29 = vrot.slane %v1492_v28, 4 }
 0x174   :  { %v1494_v30 = vadd.f32 %v1493_v29, %v1492_v28 }
 0x176   :  { %v1495_v31 = vrot.slane %v1494_v30, 2 }
 0x178   :  { %v1496_v32 = vadd.f32 %v1495_v31, %v1494_v30 }
 0x17a   :  { %v1497_v33 = vrot.slane %v1496_v32, 1 }
 0x17c   :  { %v1498_v34 = vadd.f32 %v1497_v33, %v1496_v32 }
 0x17e   :  { %v1499_v36 = vmul.f32 0.5, %v1498_v34 }
 0x180   :  { %v1500_v37 = vadd.f32 1e-05, %v1499_v36 }
 0x182   :  { %1965 = vrsqrt.f32 %v1500_v37 }
 0x18c   :  { %v1966_v38 = vpop.eup %1965 }
 0x18d   :  { %v1502_v40 = vmul.f32 %v1966_v38, %v1490_v26 }
 0x18f   :  { %v1510_v42 = vmul.f32 %v1656_v39, %v1502_v40 }
 0x191   :  { %v1518_v43 = vadd.f32 %v1657_v41, %v1510_v42 }
 0x193   :  { %vm1519_vm1 = vcmp.ge.f32.partialorder %v1518_v43, 0.0  ;;  %v1520_v35 = vmul.f32 0.2, %v1518_v43 }
 0x195   :  { %v1521_v44 = vsel %vm1519_vm1, %v1518_v43, %v1520_v35 }
 0x196   :  { %v1522_v45 = vpack.c.bf16 %v1521_v44, %v1521_v44 }
 0x198   :  { %1523 = vst [vmem:[%s2430_s4] sm:$0x1] %v1522_v45 }

</bundles_post_ra>
